<compile_context>
chip_gen: v5e
topology: v5e:2x2
jax: 0.10.0
libtpu: 0.0.40
codegen_flags: <defaults>
</compile_context>

<pallas_src>
import jax
import jax.numpy as jnp
import numpy as np
from jax.experimental import pallas as pl
from jax.experimental.pallas import tpu as pltpu

_INV_SQRT2 = 0.7071067811865476
_LN_EPS = 1e-6                      # SAM-style LayerNorm2d epsilon
_SQRT_2_OVER_PI = 0.7978845608028654
_GELU_C = 0.044715


def _gelu_tanh(v):
    # tanh-form GELU (approximate): far fewer VPU ops than the erf polynomial,
    # single EUP tanh.  |tanh-GELU - erf-GELU| <= ~1e-3 (well inside tolerance).
    u = _SQRT_2_OVER_PI * (v + _GELU_C * v * v * v)
    return 0.5 * v * (1.0 + jnp.tanh(u))


# --------------------------------------------------------------------------
# Pallas kernels
# --------------------------------------------------------------------------
def _main_kernel(x_ref, w23_ref, b23_ref, w4a_ref, b4a_ref, wmean_ref, bmean_ref,
                 smat_ref, bmatlnw_ref, lnb_ref, w4bd_ref, b4e_ref, o_ref):
    """One row-tile of flattened NHWC pixels -> [o2 | o3 | pad | o4] (24 lanes)."""
    x = x_ref[...]                                                    # (T, 256) bf16

    # final2 and (up3 -> final3), folded into a single (256, 8) matrix.
    o23 = (jnp.dot(x, w23_ref[...], preferred_element_type=jnp.float32)
           + b23_ref[...])                                            # (T, 8) f32

    # up4 first deconv: all four 2x2 offsets in one MXU pass.
    g = (jnp.dot(x, w4a_ref[...], preferred_element_type=jnp.float32)
         + b4a_ref[...])                                              # (T, 256) f32

    # Per-offset LayerNorm statistics at group width (T, 8).
    # Group mean comes straight from x (w4a folded through the group-sum matrix),
    # so no full-width bf16 cast of g is needed.
    mean4 = (jnp.dot(x, wmean_ref[...], preferred_element_type=jnp.float32)
             + bmean_ref[...])                                        # (T, 8) f32
    # E[g^2] via an f32 matmul (avoids bf16 cancellation in E[x^2] - mean^2).
    ex2 = jnp.dot(g * g, smat_ref[...], preferred_element_type=jnp.float32)  # (T, 8)
    var4 = jnp.maximum(ex2 - mean4 * mean4, 0.0)      # clamp: padded rows / roundoff
    invstd4 = jax.lax.rsqrt(var4 + _LN_EPS)                           # (T, 8), EUP
    # Broadcast back to 256 lanes on the MXU with lnw folded into the matrix.
    scale = jnp.dot(invstd4, bmatlnw_ref[...],
                    preferred_element_type=jnp.float32)               # (T, 256)
    shift = jnp.dot(mean4 * invstd4, bmatlnw_ref[...],
                    preferred_element_type=jnp.float32)               # (T, 256)
    gn = g * scale - shift + lnb_ref[...]                             # 3 VPU ops
    ga = _gelu_tanh(gn)

    # (second deconv -> final4), folded to a block-diagonal (256, 16) matrix.
    o4 = (jnp.dot(ga, w4bd_ref[...], preferred_element_type=jnp.float32)
          + b4e_ref[...])                                             # (T, 16) f32

    # Single merged output block: [o2 | o3 | 3 pad lanes | o4].
    o_ref[...] = jnp.concatenate([o23, o4], axis=-1)                  # (T, 24)


def _pool_kernel(xr_ref, w1_ref, b1_ref, o_ref):
    """MaxPool2d(2,2) + final1.  Input lanes are ordered (w-parity, channel)."""
    xr = xr_ref[...]                                           # (TR, 2, Wp, 512) bf16
    v = jnp.maximum(xr[:, 0], xr[:, 1])                        # h-parity max
    m = jnp.maximum(v[:, :, :256], v[:, :, 256:])              # w-parity max (TR,Wp,256)
    o_ref[...] = (jnp.sum(m.astype(jnp.float32) * w1_ref[...], axis=-1)
                  + b1_ref[...])


# --------------------------------------------------------------------------
# Parameter setup + wrapper (glue: layout + offline weight folding only)
# --------------------------------------------------------------------------
def init_params(key):
    ks = jax.random.split(key, 16)

    def rnd(k, shape, scale=0.05):
        return (scale * jax.random.normal(k, shape)).astype(jnp.float32)

    return dict(
        # torch ConvTranspose2d weight layout: (Cin, Cout, kH, kW)
        w3=rnd(ks[0], (256, 64, 2, 2)),  b3=rnd(ks[1], (64,)),
        w4a=rnd(ks[2], (256, 64, 2, 2)), b4a=rnd(ks[3], (64,)),
        lnw=(1.0 + rnd(ks[4], (64,))).astype(jnp.float32),
        lnb=rnd(ks[5], (64,)),
        w4b=rnd(ks[6], (64, 16, 2, 2)),  b4b=rnd(ks[7], (16,)),
        # 1x1 conv heads (Cout=1): stored as (Cin,) + scalar bias
        fw1=rnd(ks[8], (256,)),  fb1=rnd(ks[9], ()),
        fw2=rnd(ks[10], (256,)), fb2=rnd(ks[11], ()),
        fw3=rnd(ks[12], (64,)),  fb3=rnd(ks[13], ()),
        fw4=rnd(ks[14], (16,)),  fb4=rnd(ks[15], ()),
    )


def _ct_weight(w):
    # torch ConvTranspose2d weight (Cin, Cout, 2, 2) -> (Cin, 4*Cout),
    # columns ordered (ki, kj, out_ch).
    cin, cout = w.shape[0], w.shape[1]
    return jnp.transpose(w, (0, 2, 3, 1)).reshape(cin, 4 * cout)


@jax.jit
def spgen_forward(x_nchw, params):
    f32, bf16 = jnp.float32, jnp.bfloat16
    x_nchw = x_nchw.astype(f32)
    B, C, H, W = x_nchw.shape
    assert C == 256 and H % 2 == 0 and W % 2 == 0
    x = jnp.transpose(x_nchw, (0, 2, 3, 1)).astype(bf16)        # NHWC, bf16
    N = B * H * W
    xf = x.reshape(N, C)

    # ---- offline weight folding (small f32 matmuls, done once per call) ----
    eye4 = jnp.eye(4, dtype=f32)
    # branch 2 + branch 3 (up3 -> final3 is purely linear -> fold):
    bd3 = jnp.kron(eye4, params['fw3'].reshape(-1, 1))                    # (256, 4)
    w3_eff = _ct_weight(params['w3']) @ bd3                               # (256, 4)
    b3_eff = jnp.tile(params['b3'], 4)[None, :] @ bd3 + params['fb3']     # (1, 4)
    w23 = jnp.concatenate([params['fw2'][:, None], w3_eff,
                           jnp.zeros((C, 3), f32)], axis=1)               # (256, 8)
    b23 = jnp.concatenate([params['fb2'].reshape(1, 1), b3_eff,
                           jnp.zeros((1, 3), f32)], axis=1)               # (1, 8)

    # branch 4 first deconv: fuse its four 2x2 offsets into one matrix.
    w4a_all = _ct_weight(params['w4a'])                                   # (256, 256)
    b4a_t = jnp.tile(params['b4a'], 4)[None, :]                           # (1, 256)
    lnb_t = jnp.tile(params['lnb'], 4)[None, :]                           # (1, 256)
    # group-sum matrix (per 64-channel offset group), padded to 8 columns.
    smat4 = jnp.kron(eye4, jnp.full((64, 1), 1.0 / 64, f32))              # (256, 4)
    smat = jnp.concatenate([smat4, jnp.zeros((C, 4), f32)], axis=1)       # (256, 8)
    # group means of g computed directly from x (w4a folded through smat).
    wmean = jnp.concatenate([w4a_all @ smat4, jnp.zeros((C, 4), f32)], axis=1)  # (256, 8)
    bmean = jnp.concatenate([b4a_t @ smat4, jnp.zeros((1, 4), f32)], axis=1)    # (1, 8)
    # broadcast matrix with the LayerNorm weight folded in (rows 4..7 zero).
    bmat_lnw = jnp.concatenate([jnp.kron(eye4, params['lnw'][None, :]),
                                jnp.zeros((4, C), f32)], axis=0)          # (8, 256)
    # branch 4 tail (second deconv -> final4 is purely linear -> fold):
    bd4 = jnp.kron(eye4, params['fw4'].reshape(-1, 1))                    # (64, 4)
    w4b_eff = _ct_weight(params['w4b']) @ bd4                             # (64, 4)
    b4_eff = jnp.tile(params['b4b'], 4)[None, :] @ bd4 + params['fb4']    # (1, 4)
    w4bd = jnp.kron(eye4, w4b_eff)                                        # (256, 16)
    b4e = jnp.tile(b4_eff, (1, 4))                                        # (1, 16)

    w23_bf = w23.astype(bf16)
    w4a_bf = w4a_all.astype(bf16)
    wmean_bf = wmean.astype(bf16)

    # ---- main kernel over row-tiles of flattened pixels ----
    # Large row tile independent of divisibility (pad + slice back); for large
    # inputs this yields >= 2 grid steps so both v7x TensorCores get work, and
    # VMEM stays a few MiB even at TILE=512 (fits every generation comfortably).
    if N >= 1024:
        TILE = 512
    else:
        TILE = max(8, ((N + 7) // 8) * 8)
    n_pad = ((N + TILE - 1) // TILE) * TILE
    xfp = xf if n_pad == N else jnp.pad(xf, ((0, n_pad - N), (0, 0)))

    wargs = (w23_bf, b23, w4a_bf, b4a_t, wmean_bf, bmean,
             smat, bmat_lnw, lnb_t, w4bd, b4e)
    fullspec = lambda a: pl.BlockSpec(a.shape, lambda i: (0,) * a.ndim)

    out = pl.pallas_call(
        _main_kernel,
        out_shape=jax.ShapeDtypeStruct((n_pad, 24), f32),
        grid=(n_pad // TILE,),
        in_specs=[pl.BlockSpec((TILE, C), lambda i: (i, 0))]
                 + [fullspec(a) for a in wargs],
        out_specs=pl.BlockSpec((TILE, 24), lambda i: (i, 0)),
        compiler_params=pltpu.CompilerParams(dimension_semantics=("parallel",)),
    )(xfp, *wargs)
    o2f = out[:N, 0:1]
    o3f = out[:N, 1:5]
    o4f = out[:N, 8:24]

    # ---- maxpool branch: free contiguous reshape of the same NHWC buffer ----
    Hp, Wp = H // 2, W // 2
    rows = B * Hp
    xr = x.reshape(rows, 2, Wp, 2 * C)   # (row-pair, h-parity, w_out, (w-parity, C))
    # Cap the per-step input block (~2 MiB) so double-buffering stays well inside
    # v5e's 16 MiB scoped-VMEM default (and leaves headroom on v7x's 64 MiB part).
    row_bytes = 2 * Wp * 2 * C * 2       # bytes per row-pair of the block (bf16)
    cap = max(1, (2 << 20) // row_bytes)
    TR = 1
    for t in range(min(rows, cap, 256), 0, -1):
        if rows % t == 0:
            TR = t
            break
    fw1r = params['fw1'][None, :]        # (1, 256) f32
    fb1r = params['fb1'].reshape(1, 1)   # (1, 1)   f32

    o1 = pl.pallas_call(
        _pool_kernel,
        out_shape=jax.ShapeDtypeStruct((rows, Wp), f32),
        grid=(rows // TR,),
        in_specs=[pl.BlockSpec((TR, 2, Wp, 2 * C), lambda i: (i, 0, 0, 0)),
                  pl.BlockSpec((1, C), lambda i: (0, 0)),
                  pl.BlockSpec((1, 1), lambda i: (0, 0))],
        out_specs=pl.BlockSpec((TR, Wp), lambda i: (i, 0)),
        compiler_params=pltpu.CompilerParams(dimension_semantics=("parallel",)),
    )(xr, fw1r, fb1r)

    # ---- layout glue back to NCHW outputs (channel axis = 1) ----
    x1 = o1.reshape(B, Hp, Wp)[:, None]
    x2 = o2f.reshape(B, H, W)[:, None]
    x3 = (o3f.reshape(B, H, W, 2, 2)
              .transpose(0, 1, 3, 2, 4)
              .reshape(B, 2 * H, 2 * W))[:, None]
    x4 = (o4f.reshape(B, H, W, 2, 2, 2, 2)
              .transpose(0, 1, 3, 5, 2, 4, 6)
              .reshape(B, 4 * H, 4 * W))[:, None]
    return x1, x2, x3, x4


# --------------------------------------------------------------------------
# Pure-JAX reference (independent code path) for a correctness check
# --------------------------------------------------------------------------
def spgen_reference(x_nchw, params):
    hp = jax.lax.Precision.HIGHEST
    erf = jax.scipy.special.erf
    x = jnp.transpose(x_nchw.astype(jnp.float32), (0, 2, 3, 1))
    B, H, W, C = x.shape

    def conv1x1(inp, w, b):
        return jnp.einsum('bhwc,c->bhw', inp, w, precision=hp) + b

    def convT2x2(inp, w, b):  # w: (Cin, Cout, 2, 2)
        y = jnp.einsum('bhwc,coij->bhwijo', inp, w, precision=hp)
        Bq, Hq, Wq = inp.shape[:3]
        y = y.transpose(0, 1, 3, 2, 4, 5).reshape(Bq, 2 * Hq, 2 * Wq, w.shape[1])
        return y + b

    xp = jnp.max(x.reshape(B, H // 2, 2, W // 2, 2, C), axis=(2, 4))
    o1 = conv1x1(xp, params['fw1'], params['fb1'])
    o2 = conv1x1(x, params['fw2'], params['fb2'])
    y3 = convT2x2(x, params['w3'], params['b3'])
    o3 = conv1x1(y3, params['fw3'], params['fb3'])
    y4 = convT2x2(x, params['w4a'], params['b4a'])
    mu = y4.mean(-1, keepdims=True)
    var = ((y4 - mu) ** 2).mean(-1, keepdims=True)
    y4 = (y4 - mu) / jnp.sqrt(var + _LN_EPS) * params['lnw'] + params['lnb']
    y4 = 0.5 * y4 * (1.0 + erf(y4 * _INV_SQRT2))     # exact (erf) GELU reference
    y4 = convT2x2(y4, params['w4b'], params['b4b'])
    o4 = conv1x1(y4, params['fw4'], params['fb4'])
    return o1[:, None], o2[:, None], o3[:, None], o4[:, None]


if __name__ == "__main__":
    key = jax.random.PRNGKey(0)
    pkey, xkey = jax.random.split(key)
    params = init_params(pkey)

    # C must be 256 (fixed by the module).  Second shape exercises the
    # row-padding path (N = 60 -> TILE = 64) and a non-multiple-of-8 pooled width.
    shapes = [(2, 256, 8, 8), (1, 256, 6, 10)]
    for (B, C, H, W) in shapes:
        x = jax.random.normal(jax.random.fold_in(xkey, H * W),
                              (B, C, H, W), dtype=jnp.float32)
        outs = jax.block_until_ready(spgen_forward(x, params))
        refs = spgen_reference(x, params)

        expected = [(B, 1, H // 2, W // 2), (B, 1, H, W),
                    (B, 1, 2 * H, 2 * W), (B, 1, 4 * H, 4 * W)]
        # Tolerance absorbs bf16 MXU operands (f32 accumulation) and tanh-GELU.
        for o, r, es in zip(outs, refs, expected):
            assert o.shape == es, (o.shape, es)
            np.testing.assert_allclose(np.asarray(o), np.asarray(r),
                                       rtol=1e-2, atol=1e-2)
    print("KERNEL_OK")
</pallas_src>

<mosaic_0001>
module attributes {stable_mosaic.version = 11 : i64} {
  func.func @_pool_kernel(%arg0: i32, %arg1: memref<8x2x4x512xbf16, #tpu.memory_space<vmem>>, %arg2: memref<1x256xf32, #tpu.memory_space<vmem>>, %arg3: memref<1x1xf32, #tpu.memory_space<vmem>>, %arg4: memref<8x4xf32, #tpu.memory_space<vmem>>) attributes {dimension_semantics = [#tpu.dimension_semantics<parallel>], iteration_bounds = array<i64: 1>, scalar_prefetch = 0 : i64, scratch_operands = 0 : i64, tpu.core_type = #tpu.core_type<tc>, window_params = [{transform_indices = @transform_0, window_bounds = array<i64: 8, 2, 4, 512>}, {pipeline_mode = #tpu.pipeline_mode<synchronous>, transform_indices = @transform_1, window_bounds = array<i64: 1, 256>}, {pipeline_mode = #tpu.pipeline_mode<synchronous>, transform_indices = @transform_2, window_bounds = array<i64: 1, 1>}, {transform_indices = @transform_3, window_bounds = array<i64: 8, 4>}]} {
    %c0 = arith.constant 0 : index
    %c0_0 = arith.constant 0 : index
    %c0_1 = arith.constant 0 : index
    %c0_2 = arith.constant 0 : index
    %0 = vector.load %arg1[%c0, %c0_0, %c0_1, %c0_2] : memref<8x2x4x512xbf16, #tpu.memory_space<vmem>>, vector<8x2x4x512xbf16>
    %1 = vector.extract_strided_slice %0 {offsets = [0, 0, 0, 0], sizes = [8, 1, 4, 512], strides = [1, 1, 1, 1]} : vector<8x2x4x512xbf16> to vector<8x1x4x512xbf16>
    %2 = vector.shape_cast %1 : vector<8x1x4x512xbf16> to vector<8x4x512xbf16>
    %3 = vector.extract_strided_slice %0 {offsets = [0, 1, 0, 0], sizes = [8, 1, 4, 512], strides = [1, 1, 1, 1]} : vector<8x2x4x512xbf16> to vector<8x1x4x512xbf16>
    %4 = vector.shape_cast %3 : vector<8x1x4x512xbf16> to vector<8x4x512xbf16>
    %5 = arith.maximumf %2, %4 : vector<8x4x512xbf16>
    %6 = vector.extract_strided_slice %5 {offsets = [0, 0, 0], sizes = [8, 4, 256], strides = [1, 1, 1]} : vector<8x4x512xbf16> to vector<8x4x256xbf16>
    %7 = vector.extract_strided_slice %5 {offsets = [0, 0, 256], sizes = [8, 4, 256], strides = [1, 1, 1]} : vector<8x4x512xbf16> to vector<8x4x256xbf16>
    %8 = arith.maximumf %6, %7 : vector<8x4x256xbf16>
    %9 = arith.extf %8 : vector<8x4x256xbf16> to vector<8x4x256xf32>
    %c0_3 = arith.constant 0 : index
    %c0_4 = arith.constant 0 : index
    %10 = vector.load %arg2[%c0_3, %c0_4] : memref<1x256xf32, #tpu.memory_space<vmem>>, vector<1x256xf32>
    %11 = vector.shape_cast %10 : vector<1x256xf32> to vector<1x1x256xf32>
    %12 = vector.broadcast %11 : vector<1x1x256xf32> to vector<8x4x256xf32>
    %13 = arith.mulf %9, %12 : vector<8x4x256xf32>
    %cst = arith.constant dense<0.000000e+00> : vector<8x4xf32>
    %14 = vector.multi_reduction <add>, %13, %cst [2] : vector<8x4x256xf32> to vector<8x4xf32>
    %c0_5 = arith.constant 0 : index
    %c0_6 = arith.constant 0 : index
    %15 = vector.load %arg3[%c0_5, %c0_6] : memref<1x1xf32, #tpu.memory_space<vmem>>, vector<1x1xf32>
    %16 = vector.broadcast %15 : vector<1x1xf32> to vector<8x4xf32>
    %17 = arith.addf %14, %16 : vector<8x4xf32>
    %c0_7 = arith.constant 0 : index
    %c0_8 = arith.constant 0 : index
    %18 = vector.load %arg4[%c0_7, %c0_8] : memref<8x4xf32, #tpu.memory_space<vmem>>, vector<8x4xf32>
    tpu.vector_store %arg4[%c0_7, %c0_8], %17 {strides = array<i32>} : memref<8x4xf32, #tpu.memory_space<vmem>>, vector<8x4xf32>,
    return
  }
  func.func @transform_0(%arg0: i32) -> (i32, i32, i32, i32) {
    %c0_i32 = arith.constant 0 : i32
    %c0_i32_0 = arith.constant 0 : i32
    %c0_i32_1 = arith.constant 0 : i32
    %c0_i32_2 = arith.constant 0 : i32
    return %arg0, %c0_i32, %c0_i32_0, %c0_i32_1 : i32, i32, i32, i32
  }
  func.func @transform_1(%arg0: i32) -> (i32, i32) {
    %c0_i32 = arith.constant 0 : i32
    %c0_i32_0 = arith.constant 0 : i32
    %c0_i32_1 = arith.constant 0 : i32
    return %c0_i32, %c0_i32_0 : i32, i32
  }
  func.func @transform_2(%arg0: i32) -> (i32, i32) {
    %c0_i32 = arith.constant 0 : i32
    %c0_i32_0 = arith.constant 0 : i32
    %c0_i32_1 = arith.constant 0 : i32
    return %c0_i32, %c0_i32_0 : i32, i32
  }
  func.func @transform_3(%arg0: i32) -> (i32, i32) {
    %c0_i32 = arith.constant 0 : i32
    %c0_i32_0 = arith.constant 0 : i32
    return %arg0, %c0_i32 : i32, i32
  }
}

module attributes {stable_mosaic.version = 11 : i64} {
  func.func @_main_kernel(%arg0: i32, %arg1: memref<128x256xbf16, #tpu.memory_space<vmem>>, %arg2: memref<256x8xbf16, #tpu.memory_space<vmem>>, %arg3: memref<1x8xf32, #tpu.memory_space<vmem>>, %arg4: memref<256x256xbf16, #tpu.memory_space<vmem>>, %arg5: memref<1x256xf32, #tpu.memory_space<vmem>>, %arg6: memref<256x8xbf16, #tpu.memory_space<vmem>>, %arg7: memref<1x8xf32, #tpu.memory_space<vmem>>, %arg8: memref<256x8xf32, #tpu.memory_space<vmem>>, %arg9: memref<8x256xf32, #tpu.memory_space<vmem>>, %arg10: memref<1x256xf32, #tpu.memory_space<vmem>>, %arg11: memref<256x16xf32, #tpu.memory_space<vmem>>, %arg12: memref<1x16xf32, #tpu.memory_space<vmem>>, %arg13: memref<128x24xf32, #tpu.memory_space<vmem>>) attributes {dimension_semantics = [#tpu.dimension_semantics<parallel>], iteration_bounds = array<i64: 1>, scalar_prefetch = 0 : i64, scratch_operands = 0 : i64, tpu.core_type = #tpu.core_type<tc>, window_params = [{transform_indices = @transform_0, window_bounds = array<i64: 128, 256>}, {pipeline_mode = #tpu.pipeline_mode<synchronous>, transform_indices = @transform_1, window_bounds = array<i64: 256, 8>}, {pipeline_mode = #tpu.pipeline_mode<synchronous>, transform_indices = @transform_2, window_bounds = array<i64: 1, 8>}, {pipeline_mode = #tpu.pipeline_mode<synchronous>, transform_indices = @transform_3, window_bounds = array<i64: 256, 256>}, {pipeline_mode = #tpu.pipeline_mode<synchronous>, transform_indices = @transform_4, window_bounds = array<i64: 1, 256>}, {pipeline_mode = #tpu.pipeline_mode<synchronous>, transform_indices = @transform_5, window_bounds = array<i64: 256, 8>}, {pipeline_mode = #tpu.pipeline_mode<synchronous>, transform_indices = @transform_6, window_bounds = array<i64: 1, 8>}, {pipeline_mode = #tpu.pipeline_mode<synchronous>, transform_indices = @transform_7, window_bounds = array<i64: 256, 8>}, {pipeline_mode = #tpu.pipeline_mode<synchronous>, transform_indices = @transform_8, window_bounds = array<i64: 8, 256>}, {pipeline_mode = #tpu.pipeline_mode<synchronous>, transform_indices = @transform_9, window_bounds = array<i64: 1, 256>}, {pipeline_mode = #tpu.pipeline_mode<synchronous>, transform_indices = @transform_10, window_bounds = array<i64: 256, 16>}, {pipeline_mode = #tpu.pipeline_mode<synchronous>, transform_indices = @transform_11, window_bounds = array<i64: 1, 16>}, {transform_indices = @transform_12, window_bounds = array<i64: 128, 24>}]} {
    %c0 = arith.constant 0 : index
    %c0_0 = arith.constant 0 : index
    %0 = vector.load %arg1[%c0, %c0_0] : memref<128x256xbf16, #tpu.memory_space<vmem>>, vector<128x256xbf16>
    %c0_1 = arith.constant 0 : index
    %c0_2 = arith.constant 0 : index
    %1 = vector.load %arg2[%c0_1, %c0_2] : memref<256x8xbf16, #tpu.memory_space<vmem>>, vector<256x8xbf16>
    %cst = arith.constant dense<0.000000e+00> : vector<128x8xf32>
    %2 = tpu.matmul %0, %1, %cst {dimension_numbers = #tpu.dot_dimension_numbers<[1], [0], [0], [1], [0, 0, 1, 1], [], []>} : vector<128x256xbf16>, vector<256x8xbf16>, vector<128x8xf32> -> vector<128x8xf32>
    %c0_3 = arith.constant 0 : index
    %c0_4 = arith.constant 0 : index
    %3 = vector.load %arg3[%c0_3, %c0_4] : memref<1x8xf32, #tpu.memory_space<vmem>>, vector<1x8xf32>
    %4 = vector.broadcast %3 : vector<1x8xf32> to vector<128x8xf32>
    %5 = arith.addf %2, %4 : vector<128x8xf32>
    %c0_5 = arith.constant 0 : index
    %c0_6 = arith.constant 0 : index
    %6 = vector.load %arg4[%c0_5, %c0_6] : memref<256x256xbf16, #tpu.memory_space<vmem>>, vector<256x256xbf16>
    %cst_7 = arith.constant dense<0.000000e+00> : vector<128x256xf32>
    %7 = tpu.matmul %0, %6, %cst_7 {dimension_numbers = #tpu.dot_dimension_numbers<[1], [0], [0], [1], [0, 0, 1, 1], [], []>} : vector<128x256xbf16>, vector<256x256xbf16>, vector<128x256xf32> -> vector<128x256xf32>
    %c0_8 = arith.constant 0 : index
    %c0_9 = arith.constant 0 : index
    %8 = vector.load %arg5[%c0_8, %c0_9] : memref<1x256xf32, #tpu.memory_space<vmem>>, vector<1x256xf32>
    %9 = vector.broadcast %8 : vector<1x256xf32> to vector<128x256xf32>
    %10 = arith.addf %7, %9 : vector<128x256xf32>
    %c0_10 = arith.constant 0 : index
    %c0_11 = arith.constant 0 : index
    %11 = vector.load %arg6[%c0_10, %c0_11] : memref<256x8xbf16, #tpu.memory_space<vmem>>, vector<256x8xbf16>
    %cst_12 = arith.constant dense<0.000000e+00> : vector<128x8xf32>
    %12 = tpu.matmul %0, %11, %cst_12 {dimension_numbers = #tpu.dot_dimension_numbers<[1], [0], [0], [1], [0, 0, 1, 1], [], []>} : vector<128x256xbf16>, vector<256x8xbf16>, vector<128x8xf32> -> vector<128x8xf32>
    %c0_13 = arith.constant 0 : index
    %c0_14 = arith.constant 0 : index
    %13 = vector.load %arg7[%c0_13, %c0_14] : memref<1x8xf32, #tpu.memory_space<vmem>>, vector<1x8xf32>
    %14 = vector.broadcast %13 : vector<1x8xf32> to vector<128x8xf32>
    %15 = arith.addf %12, %14 : vector<128x8xf32>
    %16 = arith.mulf %10, %10 : vector<128x256xf32>
    %c0_15 = arith.constant 0 : index
    %c0_16 = arith.constant 0 : index
    %17 = vector.load %arg8[%c0_15, %c0_16] : memref<256x8xf32, #tpu.memory_space<vmem>>, vector<256x8xf32>
    %cst_17 = arith.constant dense<0.000000e+00> : vector<128x8xf32>
    %18 = tpu.matmul %16, %17, %cst_17 {dimension_numbers = #tpu.dot_dimension_numbers<[1], [0], [0], [1], [0, 0, 1, 1], [], []>} : vector<128x256xf32>, vector<256x8xf32>, vector<128x8xf32> -> vector<128x8xf32>
    %19 = arith.mulf %15, %15 : vector<128x8xf32>
    %20 = arith.subf %18, %19 : vector<128x8xf32>
    %cst_18 = arith.constant 0.000000e+00 : f32
    %21 = vector.broadcast %cst_18 : f32 to vector<128x8xf32>
    %22 = arith.maximumf %20, %21 : vector<128x8xf32>
    %cst_19 = arith.constant 9.99999997E-7 : f32
    %23 = vector.broadcast %cst_19 : f32 to vector<128x8xf32>
    %24 = arith.addf %22, %23 : vector<128x8xf32>
    %25 = math.rsqrt %24 : vector<128x8xf32>
    %c0_20 = arith.constant 0 : index
    %c0_21 = arith.constant 0 : index
    %26 = vector.load %arg9[%c0_20, %c0_21] : memref<8x256xf32, #tpu.memory_space<vmem>>, vector<8x256xf32>
    %cst_22 = arith.constant dense<0.000000e+00> : vector<128x256xf32>
    %27 = tpu.matmul %25, %26, %cst_22 {dimension_numbers = #tpu.dot_dimension_numbers<[1], [0], [0], [1], [0, 0, 1, 1], [], []>} : vector<128x8xf32>, vector<8x256xf32>, vector<128x256xf32> -> vector<128x256xf32>
    %28 = arith.mulf %15, %25 : vector<128x8xf32>
    %c0_23 = arith.constant 0 : index
    %c0_24 = arith.constant 0 : index
    %29 = vector.load %arg9[%c0_23, %c0_24] : memref<8x256xf32, #tpu.memory_space<vmem>>, vector<8x256xf32>
    %cst_25 = arith.constant dense<0.000000e+00> : vector<128x256xf32>
    %30 = tpu.matmul %28, %29, %cst_25 {dimension_numbers = #tpu.dot_dimension_numbers<[1], [0], [0], [1], [0, 0, 1, 1], [], []>} : vector<128x8xf32>, vector<8x256xf32>, vector<128x256xf32> -> vector<128x256xf32>
    %31 = arith.mulf %10, %27 : vector<128x256xf32>
    %32 = arith.subf %31, %30 : vector<128x256xf32>
    %c0_26 = arith.constant 0 : index
    %c0_27 = arith.constant 0 : index
    %33 = vector.load %arg10[%c0_26, %c0_27] : memref<1x256xf32, #tpu.memory_space<vmem>>, vector<1x256xf32>
    %34 = vector.broadcast %33 : vector<1x256xf32> to vector<128x256xf32>
    %35 = arith.addf %32, %34 : vector<128x256xf32>
    %cst_28 = arith.constant 4.471500e-02 : f32
    %36 = vector.broadcast %cst_28 : f32 to vector<128x256xf32>
    %37 = arith.mulf %36, %35 : vector<128x256xf32>
    %38 = arith.mulf %37, %35 : vector<128x256xf32>
    %39 = arith.mulf %38, %35 : vector<128x256xf32>
    %40 = arith.addf %35, %39 : vector<128x256xf32>
    %cst_29 = arith.constant 0.797884583 : f32
    %41 = vector.broadcast %cst_29 : f32 to vector<128x256xf32>
    %42 = arith.mulf %41, %40 : vector<128x256xf32>
    %cst_30 = arith.constant 5.000000e-01 : f32
    %43 = vector.broadcast %cst_30 : f32 to vector<128x256xf32>
    %44 = arith.mulf %43, %35 : vector<128x256xf32>
    %45 = math.tanh %42 : vector<128x256xf32>
    %cst_31 = arith.constant 1.000000e+00 : f32
    %46 = vector.broadcast %cst_31 : f32 to vector<128x256xf32>
    %47 = arith.addf %46, %45 : vector<128x256xf32>
    %48 = arith.mulf %44, %47 : vector<128x256xf32>
    %c0_32 = arith.constant 0 : index
    %c0_33 = arith.constant 0 : index
    %49 = vector.load %arg11[%c0_32, %c0_33] : memref<256x16xf32, #tpu.memory_space<vmem>>, vector<256x16xf32>
    %cst_34 = arith.constant dense<0.000000e+00> : vector<128x16xf32>
    %50 = tpu.matmul %48, %49, %cst_34 {dimension_numbers = #tpu.dot_dimension_numbers<[1], [0], [0], [1], [0, 0, 1, 1], [], []>} : vector<128x256xf32>, vector<256x16xf32>, vector<128x16xf32> -> vector<128x16xf32>
    %c0_35 = arith.constant 0 : index
    %c0_36 = arith.constant 0 : index
    %51 = vector.load %arg12[%c0_35, %c0_36] : memref<1x16xf32, #tpu.memory_space<vmem>>, vector<1x16xf32>
    %52 = vector.broadcast %51 : vector<1x16xf32> to vector<128x16xf32>
    %53 = arith.addf %50, %52 : vector<128x16xf32>
    %54 = tpu.concatenate %5, %53 in 1 : vector<128x8xf32>, vector<128x16xf32> -> vector<128x24xf32>
    %c0_37 = arith.constant 0 : index
    %c0_38 = arith.constant 0 : index
    %55 = vector.load %arg13[%c0_37, %c0_38] : memref<128x24xf32, #tpu.memory_space<vmem>>, vector<128x24xf32>
    tpu.vector_store %arg13[%c0_37, %c0_38], %54 {strides = array<i32>} : memref<128x24xf32, #tpu.memory_space<vmem>>, vector<128x24xf32>,
    return
  }
  func.func @transform_0(%arg0: i32) -> (i32, i32) {
    %c0_i32 = arith.constant 0 : i32
    %c0_i32_0 = arith.constant 0 : i32
    return %arg0, %c0_i32 : i32, i32
  }
  func.func @transform_1(%arg0: i32) -> (i32, i32) {
    %c0_i32 = arith.constant 0 : i32
    %c0_i32_0 = arith.constant 0 : i32
    %c0_i32_1 = arith.constant 0 : i32
    return %c0_i32, %c0_i32_0 : i32, i32
  }
  func.func @transform_2(%arg0: i32) -> (i32, i32) {
    %c0_i32 = arith.constant 0 : i32
    %c0_i32_0 = arith.constant 0 : i32
    %c0_i32_1 = arith.constant 0 : i32
    return %c0_i32, %c0_i32_0 : i32, i32
  }
  func.func @transform_3(%arg0: i32) -> (i32, i32) {
    %c0_i32 = arith.constant 0 : i32
    %c0_i32_0 = arith.constant 0 : i32
    %c0_i32_1 = arith.constant 0 : i32
    return %c0_i32, %c0_i32_0 : i32, i32
  }
  func.func @transform_4(%arg0: i32) -> (i32, i32) {
    %c0_i32 = arith.constant 0 : i32
    %c0_i32_0 = arith.constant 0 : i32
    %c0_i32_1 = arith.constant 0 : i32
    return %c0_i32, %c0_i32_0 : i32, i32
  }
  func.func @transform_5(%arg0: i32) -> (i32, i32) {
    %c0_i32 = arith.constant 0 : i32
    %c0_i32_0 = arith.constant 0 : i32
    %c0_i32_1 = arith.constant 0 : i32
    return %c0_i32, %c0_i32_0 : i32, i32
  }
  func.func @transform_6(%arg0: i32) -> (i32, i32) {
    %c0_i32 = arith.constant 0 : i32
    %c0_i32_0 = arith.constant 0 : i32
    %c0_i32_1 = arith.constant 0 : i32
    return %c0_i32, %c0_i32_0 : i32, i32
  }
  func.func @transform_7(%arg0: i32) -> (i32, i32) {
    %c0_i32 = arith.constant 0 : i32
    %c0_i32_0 = arith.constant 0 : i32
    %c0_i32_1 = arith.constant 0 : i32
    return %c0_i32, %c0_i32_0 : i32, i32
  }
  func.func @transform_8(%arg0: i32) -> (i32, i32) {
    %c0_i32 = arith.constant 0 : i32
    %c0_i32_0 = arith.constant 0 : i32
    %c0_i32_1 = arith.constant 0 : i32
    return %c0_i32, %c0_i32_0 : i32, i32
  }
  func.func @transform_9(%arg0: i32) -> (i32, i32) {
    %c0_i32 = arith.constant 0 : i32
    %c0_i32_0 = arith.constant 0 : i32
    %c0_i32_1 = arith.constant 0 : i32
    return %c0_i32, %c0_i32_0 : i32, i32
  }
  func.func @transform_10(%arg0: i32) -> (i32, i32) {
    %c0_i32 = arith.constant 0 : i32
    %c0_i32_0 = arith.constant 0 : i32
    %c0_i32_1 = arith.constant 0 : i32
    return %c0_i32, %c0_i32_0 : i32, i32
  }
  func.func @transform_11(%arg0: i32) -> (i32, i32) {
    %c0_i32 = arith.constant 0 : i32
    %c0_i32_0 = arith.constant 0 : i32
    %c0_i32_1 = arith.constant 0 : i32
    return %c0_i32, %c0_i32_0 : i32, i32
  }
  func.func @transform_12(%arg0: i32) -> (i32, i32) {
    %c0_i32 = arith.constant 0 : i32
    %c0_i32_0 = arith.constant 0 : i32
    return %arg0, %c0_i32 : i32, i32
  }
}

</mosaic_0001>

<bundles_post_ra>
// kernel: tile.33
= control target key start
LH: loop header
LB: loop body
LE: loop exit
PB: predicated region body
PF: predicated region fallthrough
CT: control target
= control target key end

     0   :  { %s22_s0 = inlined_call_operand.vmem [shape: f32[64], index: 0, kind: input, shape index: {}]   ;;  %s23_s1 = inlined_call_operand.vmem [shape: f32[4,64], index: 1, kind: output, shape index: {}]  }
   0x1   :  { %v4_v0 = vld [vmem:[%s22_s0] ss:$0 sm:$0xff] }
   0x2   :  { %5 = vst [vmem:[%s23_s1] sm:$0xf] %v4_v0 }

// kernel: tile.43
= control target key start
LH: loop header
LB: loop body
LE: loop exit
PB: predicated region body
PF: predicated region fallthrough
CT: control target
= control target key end

     0   :  { %s22_s0 = inlined_call_operand.vmem [shape: f32[16], index: 0, kind: input, shape index: {}]   ;;  %s23_s1 = inlined_call_operand.vmem [shape: f32[4,16], index: 1, kind: output, shape index: {}]  }
   0x1   :  { %v4_v0 = vld [vmem:[%s22_s0] ss:$0 sm:$0xff] }
   0x2   :  { %5 = vst [vmem:[%s23_s1] sm:$0xf] %v4_v0 }

// kernel: tile.34
= control target key start
LH: loop header
LB: loop body
LE: loop exit
PB: predicated region body
PF: predicated region fallthrough
CT: control target
= control target key end

     0   :  { %s6_s8 = smov 3  ;;  %vm8_vm0 = vcmask 523264   ;;  %s31_s9 = smov 64   ;;  %vm15_vm1 = vcmask 1048064   ;;  %s51_s0 = inlined_call_operand.vmem [shape: f32[4,64], index: 0, kind: input, shape index: {}]   ;;  %s52_s1 = inlined_call_operand.vmem [shape: f32[1,256], index: 1, kind: output, shape index: {}]  }
   0x1   :  { %v4_v0 = vld [vmem:[%s51_s0] sm:$0xf]  ;;  %s11_s0 = smov 3 }
   0x2   :  { %5 = vst [vmem:[#allocation1] sm:$0xf] %v4_v0 }
   0x9   :  { %v12_v1 = vld [vmem:[#allocation1 + $0x1] ss:$2 sm:%s11_s0]   ;;  %v7_v2 = vld [vmem:[#allocation1] ss:$2 sm:%s6_s8]  }
   0xa   :  { %13 = vrot.lane.b32.xlu0 %v12_v1, %s31_s9  ;;  %9 = vst.msk [vmem:[#allocation0] ss:$8 sm:$0x3] %vm8_vm0, %v7_v2  }
  0x7c   :  { %v14_v3 = vpop.permute.xlu0 %13  }
  0x7d   :  { %16 = vst.msk [vmem:[#allocation0] ss:$8 sm:$0x3] %vm15_vm1, %v14_v3  }
  0x84   :  { %v19_v4 = vld [vmem:[#allocation0] sm:$0x1]  ;;  %v24_v5 = vld [vmem:[#allocation0 + $0x8] sm:$0x1] }
  0x85   :  { %22 = vst [vmem:[%s52_s1] sm:$0x1] %v19_v4 }
  0x86   :  { %29 = vst [vmem:[%s52_s1 + $0x1] sm:$0x1] %v24_v5 }

// kernel: spgen_forward.3
= control target key start
LH: loop header
LB: loop body
LE: loop exit
PB: predicated region body
PF: predicated region fallthrough
CT: control target
= control target key end

     0   :  { %s543_s0 = inlined_call_operand.vmem [shape: bf16[8,2,4,512], index: 0, kind: input, shape index: {}]   ;;  %s544_s1 = inlined_call_operand.vmem [shape: f32[1,256], index: 1, kind: input, shape index: {}]   ;;  %s545_s2 = inlined_call_operand.<no memory space> [shape: f32[1,1], index: 2, kind: input, shape index: {}]   ;;  %s546_s3 = inlined_call_operand.hbm [shape: f32[8,4], index: 3, kind: output, shape index: {}]  }
   0x1   :  { %v8_v0 = vstv %s545_s2 }
   0x2   :  { %9 = vst [vmem:[#allocation2] sm:$0x1] %v8_v0 }
   0x3   :  { %v17_v1 = vld [vmem:[%s543_s0] sm:$0xff]  ;;  %v18_v2 = vld [vmem:[%s543_s0 + $0x8] sm:$0xff]  ;;  %v19_v7 = vld [vmem:[%s543_s0 + $0x10] sm:$0xff] }
   0x4   :  { %v33_v3 = vunpack.c.l.bf16 %v17_v1  ;;  %v34_v4 = vunpack.c.h.bf16 %v17_v1  ;;  %v49_v5 = vunpack.c.l.bf16 %v18_v2  ;;  %v50_v6 = vunpack.c.h.bf16 %v18_v2  ;;  %v21_v8 = vld [vmem:[%s543_s0 + $0x20] sm:$0xff]  ;;  %v22_v9 = vld [vmem:[%s543_s0 + $0x28] sm:$0xff]  ;;  %v20_v12 = vld [vmem:[%s543_s0 + $0x18] sm:$0xff] }
   0x5   :  { %v35_v13 = vunpack.c.l.bf16 %v19_v7  ;;  %v36_v14 = vunpack.c.h.bf16 %v19_v7 }
   0x6   :  { %v65_v10 = vmax.f32 %v33_v3, %v49_v5  ;;  %v66_v11 = vmax.f32 %v34_v4, %v50_v6 }
   0x8   :  { %97 = vst [vmem:[#allocation1] ss:$2 sm:$0xff] %v65_v10 }
   0x9   :  { %10 = vsyncpa [#allocation4], 0  ;;  %v38_v15 = vunpack.c.h.bf16 %v21_v8  ;;  %v54_v16 = vunpack.c.h.bf16 %v22_v9  ;;  %99 = vst [vmem:[#allocation1 + $0x10] ss:$2 sm:$0xff] %v66_v11  ;;  %v51_v17 = vunpack.c.l.bf16 %v20_v12  ;;  %v52_v18 = vunpack.c.h.bf16 %v20_v12  ;;  %v23_v21 = vld [vmem:[%s543_s0 + $0x30] sm:$0xff]  ;;  %v24_v22 = vld [vmem:[%s543_s0 + $0x38] sm:$0xff] }
   0xa   :  { %v37_v19 = vunpack.c.l.bf16 %v21_v8  ;;  %v53_v20 = vunpack.c.l.bf16 %v22_v9  ;;  %v268_v27 = vld [vmem:[%s544_s1] sm:$0x3]  ;;  %v26_v29 = vld [vmem:[%s543_s0 + $0x48] sm:$0xff]  ;;  %v39_v30 = vunpack.c.l.bf16 %v23_v21  ;;  %v55_v31 = vunpack.c.l.bf16 %v24_v22  ;;  %v27_v42 = vld [vmem:[%s543_s0 + $0x50] sm:$0xff]  ;;  %s388_s2 = sshll.u32 %s546_s3, 4  ;;  %s389_s2 = int_to_ptr.hbm [resolvable:$true] %s388_s2 }
   0xb   :  { %v67_v23 = vmax.f32 %v35_v13, %v51_v17  ;;  %v68_v24 = vmax.f32 %v36_v14, %v52_v18  ;;  %v70_v25 = vmax.f32 %v38_v15, %v54_v16  ;;  %v25_v28 = vld [vmem:[%s543_s0 + $0x40] sm:$0xff]  ;;  %v40_v34 = vunpack.c.h.bf16 %v23_v21  ;;  %v28_v49 = vld [vmem:[%s543_s0 + $0x58] sm:$0xff]  ;;  %v30_v0 = vld [vmem:[%s543_s0 + $0x68] sm:$0xff] }
   0xc   :  { %v69_v26 = vmax.f32 %v37_v19, %v53_v20  ;;  %v56_v35 = vunpack.c.h.bf16 %v24_v22  ;;  %v41_v40 = vunpack.c.l.bf16 %v25_v28  ;;  %v57_v41 = vunpack.c.l.bf16 %v26_v29  ;;  %v29_v63 = vld [vmem:[%s543_s0 + $0x60] sm:$0xff]  ;;  %v31_v22 = vld [vmem:[%s543_s0 + $0x70] sm:$0xff] }
   0xd   :  { %105 = vst [vmem:[#allocation1 + $0x20] ss:$2 sm:$0xff] %v67_v23  ;;  %vm290_vm0 = vcmask 1043456   ;;  %v42_v43 = vunpack.c.h.bf16 %v25_v28  ;;  %v58_v44 = vunpack.c.h.bf16 %v26_v29  ;;  %v71_v45 = vmax.f32 %v39_v30, %v55_v31  ;;  %v32_v23 = vld [vmem:[%s543_s0 + $0x78] sm:$0xff]  ;;  %s429_s0 = smov [#allocation3]  }
   0xe   :  { %107 = vst [vmem:[#allocation1 + $0x30] ss:$2 sm:$0xff] %v68_v24  ;;  %v489_v47 = vperm.slane %v268_v27, 0  ;;  %v491_v48 = vperm.slane %v268_v27, 1  ;;  %v72_v50 = vmax.f32 %v40_v34, %v56_v35  ;;  %v43_v51 = vunpack.c.l.bf16 %v27_v42  ;;  %s386_s19 = sshll.u32 %s429_s0, 4  ;;  %s387_s19 = int_to_ptr.vmem [resolvable:$true] %s386_s19 }
   0xf   :  { %v100_v32 = vld.sshfl [vmem:[#allocation1] sm:$0xff pattern:$0x75316420]  ;;  %v101_v33 = vld.sshfl [vmem:[#allocation1 + $0x8] sm:$0xff pattern:$0x75316420]  ;;  %v73_v56 = vmax.f32 %v41_v40, %v57_v41  ;;  %v44_v57 = vunpack.c.h.bf16 %v27_v42  ;;  %v74_v60 = vmax.f32 %v42_v43, %v58_v44  ;;  %v59_v3 = vunpack.c.l.bf16 %v28_v49 }
  0x10   :  { %v102_v36 = vld.sshfl [vmem:[#allocation1 + $0x10] sm:$0xff pattern:$0x75316420]  ;;  %v103_v37 = vld.sshfl [vmem:[#allocation1 + $0x18] sm:$0xff pattern:$0x75316420]  ;;  %v60_v4 = vunpack.c.h.bf16 %v28_v49  ;;  %v46_v12 = vunpack.c.h.bf16 %v29_v63  ;;  %v62_v13 = vunpack.c.h.bf16 %v30_v0  ;;  %v61_v27 = vunpack.c.l.bf16 %v30_v0 }
  0x11   :  { %113 = vst [vmem:[#allocation1 + $0x10] ss:$2 sm:$0xff] %v70_v25  ;;  %v228_v38 = vmax.f32 %v100_v32, %v102_v36  ;;  %v229_v39 = vmax.f32 %v101_v33, %v103_v37  ;;  %v428_v5 = vmov 0   ;;  %v75_v20 = vmax.f32 %v43_v51, %v59_v3 }
  0x12   :  { %112 = vst [vmem:[#allocation1] ss:$2 sm:$0xff] %v69_v26  ;;  %399 = vset.pattern.permute.xlu1 %v428_v5  ;;  %400 = vset.pattern.permute.xlu0 %v428_v5  ;;  %v76_v21 = vmax.f32 %v44_v57, %v60_v4  ;;  %v45_v26 = vunpack.c.l.bf16 %v29_v63  ;;  %v47_v33 = vunpack.c.l.bf16 %v31_v22  ;;  %v48_v34 = vunpack.c.h.bf16 %v31_v22 }
  0x13   :  { %v244_v46 = vpack.c.bf16 %v229_v39, %v228_v38  ;;  %v64_v35 = vunpack.c.h.bf16 %v32_v23  ;;  %v78_v36 = vmax.f32 %v46_v12, %v62_v13  ;;  %v63_v43 = vunpack.c.l.bf16 %v32_v23 }
  0x14   :  { %v108_v52 = vld.sshfl [vmem:[#allocation1 + $0x20] sm:$0xff pattern:$0x75316420]  ;;  %v109_v53 = vld.sshfl [vmem:[#allocation1 + $0x28] sm:$0xff pattern:$0x75316420]  ;;  %v77_v44 = vmax.f32 %v45_v26, %v61_v27 }
  0x15   :  { %v252_v54 = vunpack.c.l.bf16 %v244_v46  ;;  %v253_v55 = vunpack.c.h.bf16 %v244_v46  ;;  %v110_v58 = vld.sshfl [vmem:[#allocation1 + $0x30] sm:$0xff pattern:$0x75316420]  ;;  %v111_v59 = vld.sshfl [vmem:[#allocation1 + $0x38] sm:$0xff pattern:$0x75316420] }
  0x16   :  { %118 = vst [vmem:[#allocation1 + $0x20] ss:$2 sm:$0xff] %v71_v45  ;;  %v230_v61 = vmax.f32 %v108_v52, %v110_v58  ;;  %v231_v62 = vmax.f32 %v109_v53, %v111_v59  ;;  %v80_v53 = vmax.f32 %v48_v34, %v64_v35  ;;  %vm364_vm1 = vcmask 1041409  }
  0x17   :  { %v274_v1 = vmul.f32 %v489_v47, %v252_v54  ;;  %v275_v2 = vmul.f32 %v491_v48, %v253_v55  ;;  %119 = vst [vmem:[#allocation1 + $0x30] ss:$2 sm:$0xff] %v72_v50  ;;  %vm366_vm2 = vcmask 1042434   ;;  %vm368_vm3 = vcmask 1043459  }
  0x18   :  { %v116_v6 = vld.sshfl [vmem:[#allocation1 + $0x10] sm:$0xff pattern:$0x75316420]  ;;  %v117_v7 = vld.sshfl [vmem:[#allocation1 + $0x18] sm:$0xff pattern:$0x75316420]  ;;  %v245_v8 = vpack.c.bf16 %v231_v62, %v230_v61 }
  0x19   :  { %v291_v9 = vsel %vm290_vm0, %v274_v1, 0.0  ;;  %v292_v10 = vsel %vm290_vm0, %v275_v2, 0.0  ;;  %v114_v11 = vld.sshfl [vmem:[#allocation1] sm:$0xff pattern:$0x75316420]  ;;  %v79_v1 = vmax.f32 %v47_v33, %v63_v43  ;;  %vm370_vm4 = vcmask 1044484  }
  0x1a   :  { %v293_v14 = vadd.f32 %v292_v10, %v291_v9  ;;  %v115_v15 = vld.sshfl [vmem:[#allocation1 + $0x8] sm:$0xff pattern:$0x75316420]  ;;  %125 = vst [vmem:[#allocation1 + $0x10] ss:$2 sm:$0xff] %v74_v60  ;;  %v232_v16 = vmax.f32 %v114_v11, %v116_v6  ;;  %v254_v17 = vunpack.c.l.bf16 %v245_v8  ;;  %v255_v18 = vunpack.c.h.bf16 %v245_v8 }
  0x1b   :  { %v233_v19 = vmax.f32 %v115_v15, %v117_v7  ;;  %124 = vst [vmem:[#allocation1] ss:$2 sm:$0xff] %v73_v56  ;;  %vm372_vm5 = vcmask 1045509   ;;  %vm374_vm6 = vcmask 1046534   ;;  %vm376_vm7 = vcmask 1047559  }
  0x1c   :  { %294 = vadd.xlane.f32.xlu0 %v293_v14  ;;  %v276_v24 = vmul.f32 %v489_v47, %v254_v17  ;;  %v277_v25 = vmul.f32 %v491_v48, %v255_v18  ;;  %vm379_vm8 = vcmask 31744  }
  0x1d   :  { %v246_v28 = vpack.c.bf16 %v233_v19, %v232_v16  ;;  %v120_v29 = vld.sshfl [vmem:[#allocation1 + $0x20] sm:$0xff pattern:$0x75316420]  ;;  %v121_v30 = vld.sshfl [vmem:[#allocation1 + $0x28] sm:$0xff pattern:$0x75316420] }
  0x1e   :  { %v122_v31 = vld.sshfl [vmem:[#allocation1 + $0x30] sm:$0xff pattern:$0x75316420]  ;;  %v123_v32 = vld.sshfl [vmem:[#allocation1 + $0x38] sm:$0xff pattern:$0x75316420] }
  0x1f   :  { %v256_v37 = vunpack.c.l.bf16 %v246_v28  ;;  %v257_v38 = vunpack.c.h.bf16 %v246_v28  ;;  %131 = vst [vmem:[#allocation1 + $0x30] ss:$2 sm:$0xff] %v76_v21  ;;  %v234_v39 = vmax.f32 %v120_v29, %v122_v31  ;;  %v235_v40 = vmax.f32 %v121_v30, %v123_v32 }
  0x20   :  { %130 = vst [vmem:[#allocation1 + $0x20] ss:$2 sm:$0xff] %v75_v20  ;;  %v296_v41 = vsel %vm290_vm0, %v276_v24, 0.0  ;;  %v297_v42 = vsel %vm290_vm0, %v277_v25, 0.0 }
  0x21   :  { %v278_v45 = vmul.f32 %v489_v47, %v256_v37  ;;  %v279_v46 = vmul.f32 %v491_v48, %v257_v38  ;;  %v247_v49 = vpack.c.bf16 %v235_v40, %v234_v39  ;;  %v298_v50 = vadd.f32 %v297_v42, %v296_v41  ;;  %v128_v51 = vld.sshfl [vmem:[#allocation1 + $0x10] sm:$0xff pattern:$0x75316420]  ;;  %v129_v52 = vld.sshfl [vmem:[#allocation1 + $0x18] sm:$0xff pattern:$0x75316420] }
  0x22   :  { %v126_v54 = vld.sshfl [vmem:[#allocation1] sm:$0xff pattern:$0x75316420]  ;;  %v127_v55 = vld.sshfl [vmem:[#allocation1 + $0x8] sm:$0xff pattern:$0x75316420] }
  0x23   :  { %v301_v56 = vsel %vm290_vm0, %v278_v45, 0.0  ;;  %v302_v57 = vsel %vm290_vm0, %v279_v46, 0.0  ;;  %v258_v58 = vunpack.c.l.bf16 %v247_v49  ;;  %v259_v59 = vunpack.c.h.bf16 %v247_v49  ;;  %137 = vst [vmem:[#allocation1 + $0x10] ss:$2 sm:$0xff] %v78_v36 }
  0x24   :  { %v303_v60 = vadd.f32 %v302_v57, %v301_v56  ;;  %299 = vadd.xlane.f32.xlu0 %v298_v50  ;;  %v236_v61 = vmax.f32 %v126_v54, %v128_v51  ;;  %v237_v62 = vmax.f32 %v127_v55, %v129_v52  ;;  %136 = vst [vmem:[#allocation1] ss:$2 sm:$0xff] %v77_v44  ;;  %v401_v57 = vld [vmem:[#allocation2] ss:$0 sm:$0xff] }
  0x25   :  { %v280_v63 = vmul.f32 %v489_v47, %v258_v58  ;;  %v281_v0 = vmul.f32 %v491_v48, %v259_v59 }
  0x26   :  { %304 = vadd.xlane.f32.xlu1 %v303_v60  ;;  %v134_v2 = vld.sshfl [vmem:[#allocation1 + $0x30] sm:$0xff pattern:$0x75316420]  ;;  %v135_v3 = vld.sshfl [vmem:[#allocation1 + $0x38] sm:$0xff pattern:$0x75316420]  ;;  %v248_v4 = vpack.c.bf16 %v237_v62, %v236_v61 }
  0x27   :  { %v306_v5 = vsel %vm290_vm0, %v280_v63, 0.0  ;;  %v307_v6 = vsel %vm290_vm0, %v281_v0, 0.0  ;;  %v132_v7 = vld.sshfl [vmem:[#allocation1 + $0x20] sm:$0xff pattern:$0x75316420]  ;;  %v354_v0 = vlaneseq }
  0x28   :  { %v308_v8 = vadd.f32 %v307_v6, %v306_v5  ;;  %v133_v9 = vld.sshfl [vmem:[#allocation1 + $0x28] sm:$0xff pattern:$0x75316420]  ;;  %143 = vst [vmem:[#allocation1 + $0x30] ss:$2 sm:$0xff] %v80_v53  ;;  %v238_v10 = vmax.f32 %v132_v7, %v134_v2  ;;  %v260_v11 = vunpack.c.l.bf16 %v248_v4  ;;  %v261_v12 = vunpack.c.h.bf16 %v248_v4 }
  0x29   :  { %142 = vst [vmem:[#allocation1 + $0x20] ss:$2 sm:$0xff] %v79_v1  ;;  %v239_v13 = vmax.f32 %v133_v9, %v135_v3  ;;  %v355_v1 = vand.u32 127, %v354_v0 }
  0x2a   :  { %309 = vadd.xlane.f32.xlu2 %v308_v8  ;;  %v282_v14 = vmul.f32 %v489_v47, %v260_v11  ;;  %v283_v15 = vmul.f32 %v491_v48, %v261_v12  ;;  %v140_v16 = vld.sshfl [vmem:[#allocation1 + $0x10] sm:$0xff pattern:$0x75316420]  ;;  %v141_v17 = vld.sshfl [vmem:[#allocation1 + $0x18] sm:$0xff pattern:$0x75316420] }
  0x2b   :  { %v249_v18 = vpack.c.bf16 %v239_v13, %v238_v10  ;;  %v138_v19 = vld.sshfl [vmem:[#allocation1] sm:$0xff pattern:$0x75316420]  ;;  %v139_v20 = vld.sshfl [vmem:[#allocation1 + $0x8] sm:$0xff pattern:$0x75316420] }
  0x2c   :  { %v311_v21 = vsel %vm290_vm0, %v282_v14, 0.0  ;;  %v312_v22 = vsel %vm290_vm0, %v283_v15, 0.0  ;;  %v240_v23 = vmax.f32 %v138_v19, %v140_v16  ;;  %v241_v24 = vmax.f32 %v139_v20, %v141_v17 }
  0x2d   :  { %v262_v25 = vunpack.c.l.bf16 %v249_v18  ;;  %v263_v26 = vunpack.c.h.bf16 %v249_v18  ;;  %v313_v27 = vadd.f32 %v312_v22, %v311_v21 }
  0x2e   :  { %v250_v28 = vpack.c.bf16 %v241_v24, %v240_v23 }
  0x2f   :  { %v284_v29 = vmul.f32 %v489_v47, %v262_v25  ;;  %v285_v30 = vmul.f32 %v491_v48, %v263_v26  ;;  %v146_v31 = vld.sshfl [vmem:[#allocation1 + $0x30] sm:$0xff pattern:$0x75316420]  ;;  %v147_v32 = vld.sshfl [vmem:[#allocation1 + $0x38] sm:$0xff pattern:$0x75316420] }
  0x30   :  { %v144_v33 = vld.sshfl [vmem:[#allocation1 + $0x20] sm:$0xff pattern:$0x75316420]  ;;  %v145_v34 = vld.sshfl [vmem:[#allocation1 + $0x28] sm:$0xff pattern:$0x75316420]  ;;  %v264_v35 = vunpack.c.l.bf16 %v250_v28  ;;  %v265_v36 = vunpack.c.h.bf16 %v250_v28 }
  0x31   :  { %v316_v37 = vsel %vm290_vm0, %v284_v29, 0.0  ;;  %v317_v38 = vsel %vm290_vm0, %v285_v30, 0.0  ;;  %v242_v39 = vmax.f32 %v144_v33, %v146_v31  ;;  %v243_v40 = vmax.f32 %v145_v34, %v147_v32 }
  0x32   :  { %v318_v41 = vadd.f32 %v317_v38, %v316_v37  ;;  %314 = vadd.xlane.f32.xlu2 %v313_v27  ;;  %v286_v42 = vmul.f32 %v489_v47, %v264_v35  ;;  %v287_v43 = vmul.f32 %v491_v48, %v265_v36 }
  0x33   :  { %v251_v44 = vpack.c.bf16 %v243_v40, %v242_v39 }
  0x34   :  { %319 = vadd.xlane.f32.xlu0 %v318_v41  ;;  %v321_v45 = vsel %vm290_vm0, %v286_v42, 0.0  ;;  %v322_v46 = vsel %vm290_vm0, %v287_v43, 0.0 }
  0x35   :  { %v266_v49 = vunpack.c.l.bf16 %v251_v44  ;;  %v267_v50 = vunpack.c.h.bf16 %v251_v44  ;;  %v323_v51 = vadd.f32 %v322_v46, %v321_v45 }
  0x37   :  { %v288_v52 = vmul.f32 %v489_v47, %v266_v49  ;;  %v289_v53 = vmul.f32 %v491_v48, %v267_v50 }
  0x39   :  { %v326_v54 = vsel %vm290_vm0, %v288_v52, 0.0  ;;  %v327_v55 = vsel %vm290_vm0, %v289_v53, 0.0 }
  0x3a   :  { %v328_v56 = vadd.f32 %v327_v55, %v326_v54  ;;  %324 = vadd.xlane.f32.xlu2 %v323_v51 }
  0x3c   :  { %329 = vadd.xlane.f32.xlu0 %v328_v56 }
  0x3f   :  { %335 = vperm.xlu1 %399, %v401_v57  }
  0x8f   :  { %v295_v58 = vpop.xlane.xlu0 %294 }
  0x97   :  { %v300_v60 = vpop.xlane.xlu0 %299 }
  0x99   :  { %v305_v62 = vpop.xlane.xlu1 %304 }
  0x9d   :  { %v310_v59 = vpop.xlane.xlu2 %309 }
  0xa5   :  { %v315_v61 = vpop.xlane.xlu2 %314 }
  0xa7   :  { %v320_v63 = vpop.xlane.xlu0 %319 }
  0xad   :  { %v325_v5 = vpop.xlane.xlu2 %324 }
  0xaf   :  { %v330_v6 = vpop.xlane.xlu0 %329 }
  0xb1   :  { %v336_v47 = vpop.permute.xlu1 %335 }
  0xb2   :  { %v338_v2 = vadd.f32 %v336_v47, %v295_v58  ;;  %v339_v48 = vadd.f32 %v336_v47, %v300_v60  ;;  %v340_v3 = vadd.f32 %v336_v47, %v305_v62  ;;  %v341_v4 = vadd.f32 %v336_v47, %v310_v59 }
  0xb3   :  { %v342_v7 = vadd.f32 %v336_v47, %v315_v61  ;;  %v343_v11 = vadd.f32 %v336_v47, %v320_v63  ;;  %v344_v12 = vadd.f32 %v336_v47, %v325_v5  ;;  %v345_v14 = vadd.f32 %v336_v47, %v330_v6 }
  0xb4   :  { %v356_v8 = vperm.slane %v338_v2, %v355_v1  ;;  %v357_v9 = vperm.slane %v339_v48, %v355_v1  ;;  %v358_v10 = vperm.slane %v340_v3, %v355_v1  ;;  %v359_v13 = vperm.slane %v341_v4, %v355_v1 }
  0xb5   :  { %v360_v16 = vperm.slane %v342_v7, %v355_v1  ;;  %v361_v18 = vperm.slane %v343_v11, %v355_v1  ;;  %v362_v20 = vperm.slane %v344_v12, %v355_v1  ;;  %v363_v22 = vperm.slane %v345_v14, %v355_v1 }
  0xb6   :  { %v365_v15 = vsel %vm364_vm1, %v357_v9, %v356_v8 }
  0xb7   :  { %v367_v17 = vsel %vm366_vm2, %v358_v10, %v365_v15 }
  0xb8   :  { %v369_v19 = vsel %vm368_vm3, %v359_v13, %v367_v17 }
  0xb9   :  { %v371_v21 = vsel %vm370_vm4, %v360_v16, %v369_v19 }
  0xba   :  { %v373_v23 = vsel %vm372_vm5, %v361_v18, %v371_v21 }
  0xbb   :  { %v375_v24 = vsel %vm374_vm6, %v362_v20, %v373_v23 }
  0xbc   :  { %v377_v25 = vsel %vm376_vm7, %v363_v22, %v375_v24 }
  0xbd   :  { %380 = vst.msk [vmem:[#allocation3] sm:$0xff] %vm379_vm8, %v377_v25 }
  0xbe   :  { %391 = dma.vmem_to_hbm [thread:$0]  %s387_s19, 128, %s389_s2, [#allocation4]  }
  0xbf   :  { %426 = dma.done.wait [#allocation4], 128  }
  0xc0   :  { %427 = vsyncadd [#allocation4], 4294967168 }
  0xc1   :  { %396 = vsyncpa [#allocation4], 1 }

// kernel: spgen_forward.2
= control target key start
LH: loop header
LB: loop body
LE: loop exit
PB: predicated region body
PF: predicated region fallthrough
CT: control target
= control target key end

     0   :  { %vm1411_vm2 = vcmask 64512   ;;  %s3006_s27 = smov 8   ;;  %s4610_s1 = inlined_call_operand.vmem [shape: bf16[256,8], index: 1, kind: input, shape index: {}]   ;;  %s4611_s2 = inlined_call_operand.vmem [shape: f32[1,8], index: 2, kind: input, shape index: {}]   ;;  %s4612_s0 = inlined_call_operand.vmem [shape: bf16[128,256], index: 0, kind: input, shape index: {}]   ;;  %s4613_s3 = inlined_call_operand.vmem [shape: bf16[256,256], index: 3, kind: input, shape index: {}]   ;;  %s4614_s5 = inlined_call_operand.vmem [shape: bf16[256,8], index: 5, kind: input, shape index: {}]   ;;  %s4615_s7 = inlined_call_operand.vmem [shape: f32[256,8], index: 7, kind: input, shape index: {}]   ;;  %s4616_s4 = inlined_call_operand.vmem [shape: f32[1,256], index: 4, kind: input, shape index: {}]   ;;  %s4617_s8 = inlined_call_operand.vmem [shape: f32[8,256], index: 8, kind: input, shape index: {}]   ;;  %s4618_s6 = inlined_call_operand.vmem [shape: f32[1,8], index: 6, kind: input, shape index: {}]   ;;  %s4619_s10 = inlined_call_operand.vmem [shape: f32[256,16], index: 10, kind: input, shape index: {}]   ;;  %s4620_s9 = inlined_call_operand.vmem [shape: f32[1,256], index: 9, kind: input, shape index: {}]   ;;  %s4621_s11 = inlined_call_operand.vmem [shape: f32[1,16], index: 11, kind: input, shape index: {}]   ;;  %s4622_s12 = inlined_call_operand.vmem [shape: f32[128,24], index: 12, kind: output, shape index: {}]  }
   0x1   :  { %v2848_v0 = vld [vmem:[%s4610_s1 + $0x38] sm:$0xff]  ;;  %v2847_v2 = vld [vmem:[%s4610_s1 + $0x30] sm:$0xff]  ;;  %v2846_v4 = vld [vmem:[%s4610_s1 + $0x28] sm:$0xff] }
   0x2   :  { %v2856_v1 = vld [vmem:[%s4610_s1 + $0x78] sm:$0xff]  ;;  %269 = vmatpush.bf16.msra.mxu0 %v2848_v0  ;;  %v2855_v3 = vld [vmem:[%s4610_s1 + $0x70] sm:$0xff]  ;;  %v2854_v5 = vld [vmem:[%s4610_s1 + $0x68] sm:$0xff] }
   0x3   :  { %318 = vmatpush.bf16.msra.mxu1 %v2856_v1  ;;  %v2845_v6 = vld [vmem:[%s4610_s1 + $0x20] sm:$0xff]  ;;  %v2844_v8 = vld [vmem:[%s4610_s1 + $0x18] sm:$0xff]  ;;  %v2843_v10 = vld [vmem:[%s4610_s1 + $0x10] sm:$0xff] }
   0x4   :  { %v2853_v7 = vld [vmem:[%s4610_s1 + $0x60] sm:$0xff]  ;;  %v2852_v9 = vld [vmem:[%s4610_s1 + $0x58] sm:$0xff]  ;;  %v2851_v11 = vld [vmem:[%s4610_s1 + $0x50] sm:$0xff] }
   0x5   :  { %v2842_v12 = vld [vmem:[%s4610_s1 + $0x8] sm:$0xff]  ;;  %v2871_v14 = vld [vmem:[%s4613_s3 + $0x74] sm:$0xf]  ;;  %v2629_v15 = vld [vmem:[%s4613_s3 + $0x78] sm:$0xf0] }
   0x6   :  { %270 = vmatpush.bf16.msra.mxu0 %v2847_v2  ;;  %v2850_v13 = vld [vmem:[%s4610_s1 + $0x48] sm:$0xff]  ;;  %v2887_v16 = vld [vmem:[%s4613_s3 + $0xf4] sm:$0xf]  ;;  %v2693_v17 = vld [vmem:[%s4613_s3 + $0xf8] sm:$0xf0]  ;;  %v2632_v24 = vor.u32 %v2871_v14, %v2629_v15 }
   0x7   :  { %319 = vmatpush.bf16.msra.mxu1 %v2855_v3  ;;  %v2841_v18 = vld [vmem:[%s4610_s1] sm:$0xff]  ;;  %v2826_v21 = vld [vmem:[%s4612_s0 + $0x4] sm:$0xf0]  ;;  %v2445_v23 = vld [vmem:[%s4612_s0 + $0x8] sm:$0xf0]  ;;  %v2696_v25 = vor.u32 %v2887_v16, %v2693_v17 }
   0x8   :  { %v2849_v19 = vld [vmem:[%s4610_s1 + $0x40] sm:$0xff]  ;;  %v2621_v27 = vld [vmem:[%s4613_s3 + $0x68] sm:$0xf0]  ;;  %v2867_v34 = vld [vmem:[%s4613_s3 + $0x54] sm:$0xf] }
   0x9   :  { %v2443_v20 = vld [vmem:[%s4612_s0] sm:$0xf]  ;;  %v2825_v22 = vld [vmem:[%s4612_s0 + $0x4] sm:$0xf]  ;;  %v2685_v29 = vld [vmem:[%s4613_s3 + $0xe8] sm:$0xf0] }
   0xa   :  { %271 = vmatpush.bf16.msra.mxu0 %v2846_v4  ;;  %v2869_v26 = vld [vmem:[%s4613_s3 + $0x64] sm:$0xf]  ;;  %v3156_v30 = vor.u32 %v2826_v21, %v2443_v20  ;;  %v3158_v31 = vor.u32 %v2825_v22, %v2445_v23  ;;  %v2613_v35 = vld [vmem:[%s4613_s3 + $0x58] sm:$0xf0]  ;;  %v2883_v36 = vld [vmem:[%s4613_s3 + $0xd4] sm:$0xf] }
   0xb   :  { %320 = vmatpush.bf16.msra.mxu1 %v2854_v5  ;;  %v2885_v28 = vld [vmem:[%s4613_s3 + $0xe4] sm:$0xf]  ;;  %v2624_v32 = vor.u32 %v2869_v26, %v2621_v27  ;;  %v2677_v37 = vld [vmem:[%s4613_s3 + $0xd8] sm:$0xf0]  ;;  %v2616_v38 = vor.u32 %v2867_v34, %v2613_v35  ;;  %v2451_v40 = vld [vmem:[%s4612_s0 + $0x10] sm:$0xf] }
   0xc   :  { %v2688_v33 = vor.u32 %v2885_v28, %v2685_v29  ;;  %v2680_v39 = vor.u32 %v2883_v36, %v2677_v37  ;;  %v2828_v41 = vld [vmem:[%s4612_s0 + $0x14] sm:$0xf0]  ;;  %v2827_v42 = vld [vmem:[%s4612_s0 + $0x14] sm:$0xf]  ;;  %v2453_v43 = vld [vmem:[%s4612_s0 + $0x18] sm:$0xf0] }
   0xd   :  { %v3186_v44 = vor.u32 %v2828_v41, %v2451_v40  ;;  %v3188_v45 = vor.u32 %v2827_v42, %v2453_v43  ;;  %v2865_v46 = vld [vmem:[%s4613_s3 + $0x44] sm:$0xf]  ;;  %v2605_v47 = vld [vmem:[%s4613_s3 + $0x48] sm:$0xf0]  ;;  %v2459_v52 = vld [vmem:[%s4612_s0 + $0x20] sm:$0xf] }
   0xe   :  { %272 = vmatpush.bf16.msra.mxu0 %v2845_v6  ;;  %v2881_v48 = vld [vmem:[%s4613_s3 + $0xc4] sm:$0xf]  ;;  %v2608_v49 = vor.u32 %v2865_v46, %v2605_v47  ;;  %v2669_v50 = vld [vmem:[%s4613_s3 + $0xc8] sm:$0xf0]  ;;  %v2830_v53 = vld [vmem:[%s4612_s0 + $0x24] sm:$0xf0] }
   0xf   :  { %321 = vmatpush.bf16.msra.mxu1 %v2853_v7  ;;  %v2672_v51 = vor.u32 %v2881_v48, %v2669_v50  ;;  %v2829_v54 = vld [vmem:[%s4612_s0 + $0x24] sm:$0xf]  ;;  %v2461_v55 = vld [vmem:[%s4612_s0 + $0x28] sm:$0xf0]  ;;  %v3216_v56 = vor.u32 %v2830_v53, %v2459_v52  ;;  %v2863_v58 = vld [vmem:[%s4613_s3 + $0x34] sm:$0xf] }
  0x10   :  { %v3218_v57 = vor.u32 %v2829_v54, %v2461_v55  ;;  %v2597_v59 = vld [vmem:[%s4613_s3 + $0x38] sm:$0xf0]  ;;  %v2879_v60 = vld [vmem:[%s4613_s3 + $0xb4] sm:$0xf]  ;;  %v2467_v0 = vld [vmem:[%s4612_s0 + $0x30] sm:$0xf] }
  0x11   :  { %v2600_v61 = vor.u32 %v2863_v58, %v2597_v59  ;;  %v2661_v62 = vld [vmem:[%s4613_s3 + $0xb8] sm:$0xf0]  ;;  %v2832_v1 = vld [vmem:[%s4612_s0 + $0x34] sm:$0xf0]  ;;  %v2831_v2 = vld [vmem:[%s4612_s0 + $0x34] sm:$0xf] }
  0x12   :  { %273 = vmatpush.bf16.msra.mxu0 %v2844_v8  ;;  %v2664_v63 = vor.u32 %v2879_v60, %v2661_v62  ;;  %v2469_v3 = vld [vmem:[%s4612_s0 + $0x38] sm:$0xf0]  ;;  %v3246_v4 = vor.u32 %v2832_v1, %v2467_v0  ;;  %v2861_v6 = vld [vmem:[%s4613_s3 + $0x24] sm:$0xf]  ;;  %v2589_v7 = vld [vmem:[%s4613_s3 + $0x28] sm:$0xf0] }
  0x13   :  { %322 = vmatpush.bf16.msra.mxu1 %v2852_v9  ;;  %v3248_v5 = vor.u32 %v2831_v2, %v2469_v3  ;;  %v2877_v8 = vld [vmem:[%s4613_s3 + $0xa4] sm:$0xf]  ;;  %v2592_v9 = vor.u32 %v2861_v6, %v2589_v7  ;;  %v2691_v15 = vld [vmem:[%s4613_s3 + $0xf0] sm:$0xf]  ;;  %v2888_v16 = vld [vmem:[%s4613_s3 + $0xf4] sm:$0xf0] }
  0x14   :  { %v2619_v17 = vld [vmem:[%s4613_s3 + $0x60] sm:$0xf]  ;;  %v2886_v21 = vld [vmem:[%s4613_s3 + $0xe4] sm:$0xf0]  ;;  %v2675_v26 = vld [vmem:[%s4613_s3 + $0xd0] sm:$0xf] }
  0x15   :  { %v2683_v20 = vld [vmem:[%s4613_s3 + $0xe0] sm:$0xf]  ;;  %v2884_v27 = vld [vmem:[%s4613_s3 + $0xd4] sm:$0xf0]  ;;  %v2477_v34 = vld [vmem:[%s4612_s0 + $0x48] sm:$0xf0] }
  0x16   :  { %274 = vmatpush.bf16.msra.mxu0 %v2843_v10  ;;  %v2653_v10 = vld [vmem:[%s4613_s3 + $0xa8] sm:$0xf0]  ;;  %v2684_v23 = vor.u32 %v2886_v21, %v2683_v20  ;;  %v2475_v28 = vld [vmem:[%s4612_s0 + $0x40] sm:$0xf]  ;;  %v2676_v35 = vor.u32 %v2884_v27, %v2675_v26  ;;  %v2866_v37 = vld [vmem:[%s4613_s3 + $0x44] sm:$0xf0] }
  0x17   :  { %323 = vmatpush.bf16.msra.mxu1 %v2851_v11  ;;  %v2627_v11 = vld [vmem:[%s4613_s3 + $0x70] sm:$0xf]  ;;  %v2603_v36 = vld [vmem:[%s4613_s3 + $0x40] sm:$0xf]  ;;  %v2882_v42 = vld [vmem:[%s4613_s3 + $0xc4] sm:$0xf0] }
  0x18   :  { %v2604_v40 = vor.u32 %v2866_v37, %v2603_v36  ;;  %v2667_v41 = vld [vmem:[%s4613_s3 + $0xc0] sm:$0xf]  ;;  %v2859_v46 = vld [vmem:[%s4613_s3 + $0x14] sm:$0xf]  ;;  %v2581_v47 = vld [vmem:[%s4613_s3 + $0x18] sm:$0xf0] }
  0x19   :  { %v2668_v43 = vor.u32 %v2882_v42, %v2667_v41  ;;  %v2875_v48 = vld [vmem:[%s4613_s3 + $0x94] sm:$0xf]  ;;  %v2645_v50 = vld [vmem:[%s4613_s3 + $0x98] sm:$0xf0]  ;;  %v2864_v52 = vld [vmem:[%s4613_s3 + $0x34] sm:$0xf0] }
  0x1a   :  { %275 = vmatpush.bf16.msra.mxu0 %v2842_v12  ;;  %v2872_v12 = vld [vmem:[%s4613_s3 + $0x74] sm:$0xf0]  ;;  %v2648_v53 = vor.u32 %v2875_v48, %v2645_v50  ;;  %v2659_v55 = vld [vmem:[%s4613_s3 + $0xb0] sm:$0xf]  ;;  %v2587_v59 = vld [vmem:[%s4613_s3 + $0x20] sm:$0xf] }
  0x1b   :  { %324 = vmatpush.bf16.msra.mxu1 %v2850_v13  ;;  %v2656_v13 = vor.u32 %v2877_v8, %v2653_v10  ;;  %v2628_v14 = vor.u32 %v2872_v12, %v2627_v11  ;;  %v2880_v58 = vld [vmem:[%s4613_s3 + $0xb4] sm:$0xf0]  ;;  %v2651_v62 = vld [vmem:[%s4613_s3 + $0xa0] sm:$0xf]  ;;  %v2579_v2 = vld [vmem:[%s4613_s3 + $0x10] sm:$0xf] }
  0x1c   :  { %v2660_v60 = vor.u32 %v2880_v58, %v2659_v55  ;;  %v2860_v3 = vld [vmem:[%s4613_s3 + $0x14] sm:$0xf0]  ;;  %v2643_v6 = vld [vmem:[%s4613_s3 + $0x90] sm:$0xf]  ;;  %v2835_v10 = vld [vmem:[%s4612_s0 + $0x54] sm:$0xf] }
  0x1d   :  { %565 = vmatpush.bf16.msra.mxu2 %v2628_v14  ;;  %v2876_v7 = vld [vmem:[%s4613_s3 + $0x94] sm:$0xf0]  ;;  %v2483_v8 = vld [vmem:[%s4612_s0 + $0x50] sm:$0xf]  ;;  %v2485_v11 = vld [vmem:[%s4612_s0 + $0x58] sm:$0xf0]  ;;  %v2580_v12 = vor.u32 %v2860_v3, %v2579_v2 }
  0x1e   :  { %276 = vmatpush.bf16.msra.mxu0 %v2841_v18  ;;  %v2692_v18 = vor.u32 %v2888_v16, %v2691_v15  ;;  %v2571_v14 = vld [vmem:[%s4613_s3] sm:$0xf]  ;;  %v2858_v15 = vld [vmem:[%s4613_s3 + $0x4] sm:$0xf0]  ;;  %v2637_v26 = vld [vmem:[%s4613_s3 + $0x88] sm:$0xf0] }
  0x1f   :  { %325 = vmatpush.bf16.msra.mxu1 %v2849_v19  ;;  %v2870_v19 = vld [vmem:[%s4613_s3 + $0x64] sm:$0xf0]  ;;  %v2896_v27 = vld [vmem:[%s4614_s5 + $0x38] sm:$0xff]  ;;  %v2499_v42 = vld [vmem:[%s4612_s0 + $0x70] sm:$0xf] }
  0x20   :  { %v2620_v22 = vor.u32 %v2870_v19, %v2619_v17  ;;  %614 = vmatpush.bf16.msra.mxu3 %v2692_v18  ;;  %v3398_v17 = vor.u32 %v2835_v10, %v2485_v11  ;;  %v2572_v18 = vor.u32 %v2858_v15, %v2571_v14  ;;  %v2635_v19 = vld [vmem:[%s4613_s3 + $0x80] sm:$0xf]  ;;  %v2874_v20 = vld [vmem:[%s4613_s3 + $0x84] sm:$0xf0]  ;;  %v1054_v41 = vld [vmem:[%s4615_s7 + $0xf8] sm:$0xff] }
  0x21   :  { %277 = vmatmul.bf16.vlgmr.msra.gmra.mxu0 %v3156_v30  ;;  %v2636_v21 = vor.u32 %v2874_v20, %v2635_v19  ;;  %v1037_v48 = vld [vmem:[%s4615_s7 + $0x70] sm:$0xff]  ;;  %v2501_v50 = vld [vmem:[%s4612_s0 + $0x78] sm:$0xf0]  ;;  %v1052_v55 = vld [vmem:[%s4615_s7 + $0xe8] sm:$0xff] }
  0x22   :  { %663 = vmatpush.bf16.msrb.mxu0 %v2632_v24  ;;  %326 = vmatmul.bf16.vlgmr.msra.gmra.mxu1 %v3158_v31  ;;  %v2611_v24 = vld [vmem:[%s4613_s3 + $0x50] sm:$0xf]  ;;  %v2894_v58 = vld [vmem:[%s4614_s5 + $0x28] sm:$0xff]  ;;  %v1034_v3 = vld [vmem:[%s4615_s7 + $0x58] sm:$0xff] }
  0x23   :  { %712 = vmatpush.bf16.msrb.mxu1 %v2696_v25  ;;  %v2868_v25 = vld [vmem:[%s4613_s3 + $0x54] sm:$0xf0]  ;;  %566 = vmatpush.bf16.msra.mxu2 %v2620_v22  ;;  %v2857_v22 = vld [vmem:[%s4613_s3 + $0x4] sm:$0xf]  ;;  %v1049_v14 = vld [vmem:[%s4615_s7 + $0xd0] sm:$0xff] }
  0x24   :  { %v2612_v29 = vor.u32 %v2868_v25, %v2611_v24  ;;  %615 = vmatpush.bf16.msra.mxu3 %v2684_v23  ;;  %v2573_v23 = vld [vmem:[%s4613_s3 + $0x8] sm:$0xf0]  ;;  %v2873_v24 = vld [vmem:[%s4613_s3 + $0x84] sm:$0xf] }
  0x25   :  { %v2576_v25 = vor.u32 %v2857_v22, %v2573_v23  ;;  %v2893_v11 = vld [vmem:[%s4614_s5 + $0x20] sm:$0xff]  ;;  %v1048_v22 = vld [vmem:[%s4615_s7 + $0xc8] sm:$0xff] }
  0x26   :  { %664 = vmatpush.bf16.msrb.mxu0 %v2624_v32  ;;  %v2834_v32 = vld [vmem:[%s4612_s0 + $0x44] sm:$0xf0] }
  0x27   :  { %713 = vmatpush.bf16.msrb.mxu1 %v2688_v33  ;;  %v2833_v33 = vld [vmem:[%s4612_s0 + $0x44] sm:$0xf]  ;;  %567 = vmatpush.bf16.msra.mxu2 %v2612_v29  ;;  %v2904_v29 = vld [vmem:[%s4614_s5 + $0x78] sm:$0xff] }
  0x28   :  { %616 = vmatpush.bf16.msra.mxu3 %v2676_v35  ;;  %v2493_v35 = vld [vmem:[%s4612_s0 + $0x68] sm:$0xf0] }
  0x2a   :  { %665 = vmatpush.bf16.msrb.mxu0 %v2616_v38  ;;  %v3318_v38 = vor.u32 %v2834_v32, %v2475_v28  ;;  %v2640_v28 = vor.u32 %v2873_v24, %v2637_v26  ;;  %v2491_v32 = vld [vmem:[%s4612_s0 + $0x60] sm:$0xf] }
  0x2b   :  { %714 = vmatpush.bf16.msrb.mxu1 %v2680_v39  ;;  %v3320_v39 = vor.u32 %v2833_v33, %v2477_v34  ;;  %568 = vmatpush.bf16.msra.mxu2 %v2604_v40  ;;  %v2838_v33 = vld [vmem:[%s4612_s0 + $0x64] sm:$0xf0]  ;;  %v2837_v34 = vld [vmem:[%s4612_s0 + $0x64] sm:$0xf]  ;;  %v1038_v40 = vld [vmem:[%s4615_s7 + $0x78] sm:$0xff] }
  0x2c   :  { %617 = vmatpush.bf16.msra.mxu3 %v2668_v43  ;;  %v3440_v36 = vor.u32 %v2838_v33, %v2491_v32  ;;  %v3442_v37 = vor.u32 %v2837_v34, %v2493_v35  ;;  %v2840_v43 = vld [vmem:[%s4612_s0 + $0x74] sm:$0xf0]  ;;  %v1047_v32 = vld [vmem:[%s4615_s7 + $0xc0] sm:$0xff] }
  0x2e   :  { %666 = vmatpush.bf16.msrb.mxu0 %v2608_v49  ;;  %v2584_v49 = vor.u32 %v2859_v46, %v2581_v47  ;;  %v2895_v46 = vld [vmem:[%s4614_s5 + $0x30] sm:$0xff] }
  0x2f   :  { %715 = vmatpush.bf16.msrb.mxu1 %v2672_v51  ;;  %v2595_v51 = vld [vmem:[%s4613_s3 + $0x30] sm:$0xf] }
  0x30   :  { %v2596_v54 = vor.u32 %v2864_v52, %v2595_v51  ;;  %618 = vmatpush.bf16.msra.mxu3 %v2660_v60  ;;  %v2903_v47 = vld [vmem:[%s4614_s5 + $0x70] sm:$0xff]  ;;  %v3478_v52 = vor.u32 %v2840_v43, %v2499_v42  ;;  %v1035_v60 = vld [vmem:[%s4615_s7 + $0x60] sm:$0xff]  ;;  %v1046_v42 = vld [vmem:[%s4615_s7 + $0xb8] sm:$0xff] }
  0x31   :  { %282 = vmatmul.bf16.gmra.mxu0 %v3186_v44  ;;  %v1053_v51 = vld [vmem:[%s4615_s7 + $0xf0] sm:$0xff] }
  0x32   :  { %331 = vmatmul.bf16.gmra.mxu1 %v3188_v45  ;;  %667 = vmatpush.bf16.msrb.mxu0 %v2600_v61  ;;  %v2862_v61 = vld [vmem:[%s4613_s3 + $0x24] sm:$0xf0] }
  0x33   :  { %716 = vmatpush.bf16.msrb.mxu1 %v2664_v63  ;;  %v2878_v63 = vld [vmem:[%s4613_s3 + $0xa4] sm:$0xf0]  ;;  %569 = vmatpush.bf16.msra.mxu2 %v2596_v54  ;;  %v2588_v0 = vor.u32 %v2862_v61, %v2587_v59  ;;  %v1051_v61 = vld [vmem:[%s4615_s7 + $0xe0] sm:$0xff] }
  0x34   :  { %v2652_v1 = vor.u32 %v2878_v63, %v2651_v62  ;;  %v1036_v54 = vld [vmem:[%s4615_s7 + $0x68] sm:$0xff]  ;;  %v3507_v62 = vld [vmem:[%s4611_s2] ss:$0 sm:$0xff] }
  0x35   :  { %v2902_v59 = vld [vmem:[%s4614_s5 + $0x68] sm:$0xff] }
  0x36   :  { %668 = vmatpush.bf16.msrb.mxu0 %v2592_v9  ;;  %v2836_v9 = vld [vmem:[%s4612_s0 + $0x54] sm:$0xf0]  ;;  %619 = vmatpush.bf16.msra.mxu3 %v2652_v1 }
  0x37   :  { %717 = vmatpush.bf16.msrb.mxu1 %v2656_v13  ;;  %570 = vmatpush.bf16.msra.mxu2 %v2588_v0  ;;  %v2644_v13 = vor.u32 %v2876_v7, %v2643_v6  ;;  %v3396_v16 = vor.u32 %v2836_v9, %v2483_v8  ;;  %v1050_v6 = vld [vmem:[%s4615_s7 + $0xd8] sm:$0xff] }
  0x3a   :  { %669 = vmatpush.bf16.msrb.mxu0 %v2584_v49  ;;  %620 = vmatpush.bf16.msra.mxu3 %v2644_v13  ;;  %v2839_v49 = vld [vmem:[%s4612_s0 + $0x74] sm:$0xf] }
  0x3b   :  { %718 = vmatpush.bf16.msrb.mxu1 %v2648_v53  ;;  %571 = vmatpush.bf16.msra.mxu2 %v2580_v12  ;;  %v3480_v53 = vor.u32 %v2839_v49, %v2501_v50  ;;  %v2901_v12 = vld [vmem:[%s4614_s5 + $0x60] sm:$0xff]  ;;  %v1033_v13 = vld [vmem:[%s4615_s7 + $0x50] sm:$0xff] }
  0x3c   :  { %v2891_v49 = vld [vmem:[%s4614_s5 + $0x10] sm:$0xff] }
  0x3d   :  { %v2899_v50 = vld [vmem:[%s4614_s5 + $0x50] sm:$0xff] }
  0x3e   :  { %621 = vmatpush.bf16.msra.mxu3 %v2636_v21  ;;  %670 = vmatpush.bf16.msrb.mxu0 %v2576_v25  ;;  %v1032_v21 = vld [vmem:[%s4615_s7 + $0x48] sm:$0xff] }
  0x3f   :  { %572 = vmatpush.bf16.msra.mxu2 %v2572_v18  ;;  %719 = vmatpush.bf16.msrb.mxu1 %v2640_v28  ;;  %v2900_v28 = vld [vmem:[%s4614_s5 + $0x58] sm:$0xff] }
  0x41   :  { %287 = vmatmul.bf16.gmra.mxu0 %v3216_v56  ;;  %622 = vmatmul.bf16.vlgmr.msra.gmra.mxu3 %v3158_v31 }
  0x42   :  { %336 = vmatmul.bf16.gmra.mxu1 %v3218_v57  ;;  %573 = vmatmul.bf16.vlgmr.msra.gmra.mxu2 %v3156_v30 }
  0x43   :  { %893 = vmatpush.bf16.msrb.mxu2 %v2896_v27  ;;  %942 = vmatpush.bf16.msrb.mxu3 %v2904_v29  ;;  %v2892_v27 = vld [vmem:[%s4614_s5 + $0x18] sm:$0xff]  ;;  %v1031_v29 = vld [vmem:[%s4615_s7 + $0x40] sm:$0xff] }
  0x44   :  { %1055 = vmatpush.msra.mxu0 %v1038_v40  ;;  %1120 = vmatpush.msra.mxu1 %v1054_v41  ;;  %v1030_v41 = vld [vmem:[%s4615_s7 + $0x38] sm:$0xff] }
  0x46   :  { %1056 = vmatpush.msra.mxu0 %v1037_v48  ;;  %1121 = vmatpush.msra.mxu1 %v1053_v51  ;;  %v1029_v51 = vld [vmem:[%s4615_s7 + $0x30] sm:$0xff] }
  0x47   :  { %894 = vmatpush.bf16.msrb.mxu2 %v2895_v46  ;;  %943 = vmatpush.bf16.msrb.mxu3 %v2903_v47 }
  0x48   :  { %1057 = vmatpush.msra.mxu0 %v1036_v54  ;;  %1122 = vmatpush.msra.mxu1 %v1052_v55  ;;  %v1045_v54 = vld [vmem:[%s4615_s7 + $0xb0] sm:$0xff] }
  0x4a   :  { %1058 = vmatpush.msra.mxu0 %v1035_v60  ;;  %1123 = vmatpush.msra.mxu1 %v1051_v61  ;;  %v1028_v61 = vld [vmem:[%s4615_s7 + $0x28] sm:$0xff] }
  0x4b   :  { %895 = vmatpush.bf16.msrb.mxu2 %v2894_v58  ;;  %944 = vmatpush.bf16.msrb.mxu3 %v2902_v59 }
  0x4c   :  { %1059 = vmatpush.msra.mxu0 %v1034_v3  ;;  %1124 = vmatpush.msra.mxu1 %v1050_v6 }
  0x4e   :  { %1060 = vmatpush.msra.mxu0 %v1033_v13  ;;  %1125 = vmatpush.msra.mxu1 %v1049_v14  ;;  %v1026_v13 = vld [vmem:[%s4615_s7 + $0x18] sm:$0xff] }
  0x4f   :  { %896 = vmatpush.bf16.msrb.mxu2 %v2893_v11  ;;  %945 = vmatpush.bf16.msrb.mxu3 %v2901_v12  ;;  %v1043_v11 = vld [vmem:[%s4615_s7 + $0xa0] sm:$0xff]  ;;  %v1042_v14 = vld [vmem:[%s4615_s7 + $0x98] sm:$0xff] }
  0x50   :  { %1061 = vmatpush.msra.mxu0 %v1032_v21  ;;  %1126 = vmatpush.msra.mxu1 %v1048_v22  ;;  %v2897_v21 = vld [vmem:[%s4614_s5 + $0x40] sm:$0xff]  ;;  %v1025_v22 = vld [vmem:[%s4615_s7 + $0x10] sm:$0xff] }
  0x51   :  { %292 = vmatmul.bf16.gmra.mxu0 %v3246_v4  ;;  %627 = vmatmul.bf16.gmra.mxu3 %v3188_v45 }
  0x52   :  { %341 = vmatmul.bf16.gmra.mxu1 %v3248_v5  ;;  %578 = vmatmul.bf16.gmra.mxu2 %v3186_v44 }
  0x53   :  { %1062 = vmatpush.msra.mxu0 %v1031_v29  ;;  %897 = vmatpush.bf16.msrb.mxu2 %v2892_v27  ;;  %v1024_v27 = vld [vmem:[%s4615_s7 + $0x8] sm:$0xff] }
  0x54   :  { %946 = vmatpush.bf16.msrb.mxu3 %v2900_v28  ;;  %1127 = vmatpush.msra.mxu1 %v1047_v32  ;;  %v1040_v28 = vld [vmem:[%s4615_s7 + $0x88] sm:$0xff] }
  0x55   :  { %1063 = vmatpush.msra.mxu0 %v1030_v41  ;;  %v1039_v41 = vld [vmem:[%s4615_s7 + $0x80] sm:$0xff] }
  0x56   :  { %1128 = vmatpush.msra.mxu1 %v1046_v42 }
  0x57   :  { %1064 = vmatpush.msra.mxu0 %v1029_v51  ;;  %898 = vmatpush.bf16.msrb.mxu2 %v2891_v49 }
  0x58   :  { %947 = vmatpush.bf16.msrb.mxu3 %v2899_v50  ;;  %1129 = vmatpush.msra.mxu1 %v1045_v54 }
  0x59   :  { %1065 = vmatpush.msra.mxu0 %v1028_v61 }
  0x61   :  { %297 = vmatmul.bf16.gmra.mxu0 %v3318_v38  ;;  %632 = vmatmul.bf16.gmra.mxu3 %v3218_v57 }
  0x62   :  { %346 = vmatmul.bf16.gmra.mxu1 %v3320_v39  ;;  %583 = vmatmul.bf16.gmra.mxu2 %v3216_v56 }
  0x71   :  { %302 = vmatmul.bf16.gmra.mxu0 %v3396_v16  ;;  %637 = vmatmul.bf16.gmra.mxu3 %v3248_v5 }
  0x72   :  { %351 = vmatmul.bf16.gmra.mxu1 %v3398_v17  ;;  %588 = vmatmul.bf16.gmra.mxu2 %v3246_v4 }
  0x81   :  { %307 = vmatmul.bf16.gmra.mxu0 %v3440_v36  ;;  %642 = vmatmul.bf16.gmra.mxu3 %v3320_v39 }
  0x82   :  { %356 = vmatmul.bf16.gmra.mxu1 %v3442_v37  ;;  %593 = vmatmul.bf16.gmra.mxu2 %v3318_v38 }
  0x91   :  { %312 = vmatmul.bf16.gmra.mxu0 %v3478_v52  ;;  %647 = vmatmul.bf16.gmra.mxu3 %v3398_v17 }
  0x92   :  { %361 = vmatmul.bf16.gmra.mxu1 %v3480_v53  ;;  %598 = vmatmul.bf16.gmra.mxu2 %v3396_v16 }
  0x9e   :  { %v278_v63 = vpop.f32.mrf.mxu0 }
  0x9f   :  { %v327_v0 = vpop.f32.mrf.mxu1  ;;  %v279_v1 = vadd.f32 %v3507_v62, %v278_v63  ;;  %v1044_v63 = vld [vmem:[%s4615_s7 + $0xa8] sm:$0xff] }
  0xa0   :  { %1130 = vmatpush.msra.mxu1 %v1044_v63 }
  0xa1   :  { %v3510_v2 = vadd.f32 %v327_v0, %v279_v1  ;;  %671 = vmatmul.bf16.vlgmr.msrb.gmra.mxu0 %v3156_v30  ;;  %652 = vmatmul.bf16.gmra.mxu3 %v3442_v37 }
  0xa2   :  { %720 = vmatmul.bf16.vlgmr.msrb.gmra.mxu1 %v3158_v31  ;;  %603 = vmatmul.bf16.gmra.mxu2 %v3440_v36 }
  0xa3   :  { %4623 = vst [vmem:[#allocation2_spill] sm:$0xff] %v3510_v2  ;;  %1131 = vmatpush.msra.mxu1 %v1043_v11 }
  0xa5   :  { %1132 = vmatpush.msra.mxu1 %v1042_v14 }
  0xa6   :  { %v280_v7 = vpop.f32.mrf.mxu0 }
  0xa7   :  { %v329_v8 = vpop.f32.mrf.mxu1  ;;  %v281_v9 = vadd.f32 %v3507_v62, %v280_v7  ;;  %v2890_v7 = vld [vmem:[%s4614_s5 + $0x8] sm:$0xff] }
  0xa8   :  { %899 = vmatpush.bf16.msrb.mxu2 %v2890_v7 }
  0xa9   :  { %v3523_v10 = vadd.f32 %v329_v8, %v281_v9  ;;  %v2898_v8 = vld [vmem:[%s4614_s5 + $0x48] sm:$0xff]  ;;  %v1027_v9 = vld [vmem:[%s4615_s7 + $0x20] sm:$0xff] }
  0xaa   :  { %1066 = vmatpush.msra.mxu0 %v1027_v9  ;;  %948 = vmatpush.bf16.msrb.mxu3 %v2898_v8  ;;  %v1409_v9 = vld [vmem:[%s4617_s8] sm:$0xff] }
  0xab   :  { %4624 = vst [vmem:[#allocation3_spill] sm:$0xff] %v3523_v10 }
  0xac   :  { %1067 = vmatpush.msra.mxu0 %v1026_v13 }
  0xae   :  { %v283_v15 = vpop.f32.mrf.mxu0  ;;  %1068 = vmatpush.msra.mxu0 %v1025_v22  ;;  %949 = vmatpush.bf16.msrb.mxu3 %v2897_v21 }
  0xaf   :  { %v332_v18 = vpop.f32.mrf.mxu1  ;;  %v284_v19 = vadd.f32 %v3507_v62, %v283_v15 }
  0xb0   :  { %1069 = vmatpush.msra.mxu0 %v1024_v27  ;;  %v1410_v27 = vld [vmem:[%s4617_s8 + $0x8] sm:$0xff] }
  0xb1   :  { %v3538_v20 = vadd.f32 %v332_v18, %v284_v19  ;;  %676 = vmatmul.bf16.gmra.mxu0 %v3186_v44  ;;  %657 = vmatmul.bf16.gmra.mxu3 %v3480_v53  ;;  %v2889_v19 = vld [vmem:[%s4614_s5] sm:$0xff] }
  0xb2   :  { %725 = vmatmul.bf16.gmra.mxu1 %v3188_v45  ;;  %608 = vmatmul.bf16.gmra.mxu2 %v3478_v52 }
  0xb3   :  { %4625 = vst [vmem:[#allocation4_spill] sm:$0xff] %v3538_v20  ;;  %900 = vmatpush.bf16.msrb.mxu2 %v2889_v19  ;;  %1540 = vmatpush.msra.mxu3 %v1410_v27 }
  0xb6   :  { %v285_v23 = vpop.f32.mrf.mxu0 }
  0xb7   :  { %v334_v24 = vpop.f32.mrf.mxu1  ;;  %v286_v25 = vadd.f32 %v3507_v62, %v285_v23  ;;  %v1041_v23 = vld [vmem:[%s4615_s7 + $0x90] sm:$0xff]  ;;  %1475 = vmatpush.msra.mxu2 %v1409_v9 }
  0xb8   :  { %1133 = vmatpush.msra.mxu1 %v1041_v23 }
  0xb9   :  { %v3551_v26 = vadd.f32 %v334_v24, %v286_v25 }
  0xba   :  { %1134 = vmatpush.msra.mxu1 %v1040_v28 }
  0xbb   :  { %4626 = vst [vmem:[#allocation5_spill] sm:$0xff] %v3551_v26 }
  0xbc   :  { %1135 = vmatpush.msra.mxu1 %v1039_v41 }
  0xbe   :  { %v288_v33 = vpop.f32.mrf.mxu0  ;;  %1734 = vmatpush.msrb.mxu1 %v1410_v27 }
  0xbf   :  { %v337_v34 = vpop.f32.mrf.mxu1  ;;  %v289_v35 = vadd.f32 %v3507_v62, %v288_v33 }
  0xc1   :  { %v3566_v40 = vadd.f32 %v337_v34, %v289_v35  ;;  %681 = vmatmul.bf16.gmra.mxu0 %v3216_v56  ;;  %950 = vmatmul.bf16.vlgmr.msrb.gmra.mxu3 %v3158_v31  ;;  %v1023_v35 = vld [vmem:[%s4615_s7] sm:$0xff] }
  0xc2   :  { %730 = vmatmul.bf16.gmra.mxu1 %v3218_v57  ;;  %901 = vmatmul.bf16.vlgmr.msrb.gmra.mxu2 %v3156_v30 }
  0xc3   :  { %4627 = vst [vmem:[#allocation6_spill] sm:$0xff] %v3566_v40  ;;  %1070 = vmatpush.msra.mxu0 %v1023_v35 }
  0xc4   :  { %v623_v34 = vpop.f32.mrf.mxu3 }
  0xc5   :  { %v574_v33 = vpop.f32.mrf.mxu2  ;;  %1669 = vmatpush.msrb.mxu0 %v1409_v9 }
  0xc6   :  { %v290_v43 = vpop.f32.mrf.mxu0 }
  0xc7   :  { %v339_v46 = vpop.f32.mrf.mxu1  ;;  %v291_v47 = vadd.f32 %v3507_v62, %v290_v43 }
  0xc9   :  { %v3579_v48 = vadd.f32 %v339_v46, %v291_v47 }
  0xcb   :  { %4628 = vst [vmem:[#allocation7_spill] sm:$0xff] %v3579_v48 }
  0xcc   :  { %v625_v31 = vpop.f32.mrf.mxu3 }
  0xcd   :  { %v576_v43 = vpop.f32.mrf.mxu2 }
  0xce   :  { %v293_v55 = vpop.f32.mrf.mxu0 }
  0xcf   :  { %v342_v58 = vpop.f32.mrf.mxu1  ;;  %v294_v59 = vadd.f32 %v3507_v62, %v293_v55  ;;  %v399_v55 = vld [vmem:[%s4616_s4] sm:$0x3] }
  0xd0   :  { %v3707_v7 = vperm.slane %v399_v55, 1 }
  0xd1   :  { %v3594_v60 = vadd.f32 %v342_v58, %v294_v59  ;;  %686 = vmatmul.bf16.gmra.mxu0 %v3246_v4  ;;  %955 = vmatmul.bf16.gmra.mxu3 %v3188_v45 }
  0xd2   :  { %735 = vmatmul.bf16.gmra.mxu1 %v3248_v5  ;;  %906 = vmatmul.bf16.gmra.mxu2 %v3186_v44  ;;  %v3696_v44 = vperm.slane %v399_v55, 0 }
  0xd3   :  { %4629 = vst [vmem:[#allocation8_spill] sm:$0xff] %v3594_v60 }
  0xd4   :  { %v628_v50 = vpop.f32.mrf.mxu3  ;;  %v575_v45 = vadd.f32 %v574_v33, %v3696_v44  ;;  %v577_v13 = vadd.f32 %v576_v43, %v3696_v44 }
  0xd5   :  { %v579_v49 = vpop.f32.mrf.mxu2 }
  0xd6   :  { %v295_v0 = vpop.f32.mrf.mxu0  ;;  %v3720_v23 = vadd.f32 %v625_v31, %v577_v13  ;;  %v580_v28 = vadd.f32 %v579_v49, %v3696_v44 }
  0xd7   :  { %v344_v1 = vpop.f32.mrf.mxu1  ;;  %v296_v3 = vadd.f32 %v3507_v62, %v295_v0 }
  0xd8   :  { %v993_v35 = vmul.f32 %v3720_v23, %v3720_v23  ;;  %v3733_v55 = vadd.f32 %v628_v50, %v580_v28 }
  0xd9   :  { %v3607_v6 = vadd.f32 %v344_v1, %v296_v3  ;;  %v3705_v1 = vadd.f32 %v623_v34, %v575_v45 }
  0xdb   :  { %4630 = vst [vmem:[#allocation9_spill] sm:$0xff] %v3607_v6  ;;  %v991_v8 = vmul.f32 %v3705_v1, %v3705_v1 }
  0xdc   :  { %v630_v59 = vpop.f32.mrf.mxu3 }
  0xdd   :  { %v581_v58 = vpop.f32.mrf.mxu2 }
  0xde   :  { %v3621_v62 = vpop.f32.mrf.mxu0  ;;  %v582_v9 = vadd.f32 %v581_v58, %v3696_v44 }
  0xdf   :  { %4631 = vst [vmem:[#allocation10_spill] sm:$0xff] %v3621_v62  ;;  %v3623_v12 = vpop.f32.mrf.mxu1 }
  0xe0   :  { %4632 = vst [vmem:[#allocation11_spill] sm:$0xff] %v3623_v12 }
  0xe1   :  { %691 = vmatmul.bf16.gmra.mxu0 %v3318_v38  ;;  %960 = vmatmul.bf16.gmra.mxu3 %v3218_v57 }
  0xe2   :  { %740 = vmatmul.bf16.gmra.mxu1 %v3320_v39  ;;  %911 = vmatmul.bf16.gmra.mxu2 %v3216_v56 }
  0xe4   :  { %v633_v3 = vpop.f32.mrf.mxu3 }
  0xe5   :  { %v584_v0 = vpop.f32.mrf.mxu2 }
  0xe6   :  { %v3634_v15 = vpop.f32.mrf.mxu0  ;;  %v585_v27 = vadd.f32 %v584_v0, %v3696_v44 }
  0xe7   :  { %4633 = vst [vmem:[#allocation12_spill] sm:$0xff] %v3634_v15  ;;  %v3636_v18 = vpop.f32.mrf.mxu1 }
  0xe8   :  { %4634 = vst [vmem:[#allocation13_spill] sm:$0xff] %v3636_v18 }
  0xec   :  { %v635_v21 = vpop.f32.mrf.mxu3 }
  0xed   :  { %v586_v14 = vpop.f32.mrf.mxu2 }
  0xee   :  { %v3651_v24 = vpop.f32.mrf.mxu0 }
  0xef   :  { %4635 = vst [vmem:[#allocation14_spill] sm:$0xff] %v3651_v24  ;;  %v3653_v25 = vpop.f32.mrf.mxu1 }
  0xf0   :  { %4636 = vst [vmem:[#allocation15_spill] sm:$0xff] %v3653_v25 }
  0xf1   :  { %696 = vmatmul.bf16.gmra.mxu0 %v3396_v16  ;;  %965 = vmatmul.bf16.gmra.mxu3 %v3248_v5 }
  0xf2   :  { %745 = vmatmul.bf16.gmra.mxu1 %v3398_v17  ;;  %916 = vmatmul.bf16.gmra.mxu2 %v3246_v4  ;;  %v995_v4 = vmul.f32 %v3733_v55, %v3733_v55 }
  0xf4   :  { %v638_v45 = vpop.f32.mrf.mxu3 }
  0xf5   :  { %v589_v43 = vpop.f32.mrf.mxu2 }
  0xf6   :  { %v3664_v29 = vpop.f32.mrf.mxu0 }
  0xf7   :  { %4637 = vst [vmem:[#allocation16_spill] sm:$0xff] %v3664_v29  ;;  %v3666_v32 = vpop.f32.mrf.mxu1 }
  0xf8   :  { %4638 = vst [vmem:[#allocation17_spill] sm:$0xff] %v3666_v32 }
  0xfc   :  { %v640_v50 = vpop.f32.mrf.mxu3 }
  0xfe   :  { %v3675_v42 = vpop.f32.mrf.mxu0 }
  0xff   :  { %4639 = vst [vmem:[#allocation18_spill] sm:$0xff] %v3675_v42  ;;  %v3677_v30 = vpop.f32.mrf.mxu1 }
 0x100   :  { %4640 = vst [vmem:[#allocation19_spill] sm:$0xff] %v3677_v30 }
 0x101   :  { %701 = vmatmul.bf16.gmra.mxu0 %v3440_v36  ;;  %970 = vmatmul.bf16.gmra.mxu3 %v3320_v39 }
 0x102   :  { %750 = vmatmul.bf16.gmra.mxu1 %v3442_v37  ;;  %921 = vmatmul.bf16.gmra.mxu2 %v3318_v38 }
 0x106   :  { %v3682_v46 = vpop.f32.mrf.mxu0 }
 0x107   :  { %4641 = vst [vmem:[#allocation20_spill] sm:$0xff] %v3682_v46  ;;  %v3684_v47 = vpop.f32.mrf.mxu1 }
 0x108   :  { %4642 = vst [vmem:[#allocation21_spill] sm:$0xff] %v3684_v47 }
 0x10e   :  { %v3687_v51 = vpop.f32.mrf.mxu0 }
 0x10f   :  { %4643 = vst [vmem:[#allocation22_spill] sm:$0xff] %v3687_v51  ;;  %v3689_v54 = vpop.f32.mrf.mxu1 }
 0x110   :  { %4644 = vst [vmem:[#allocation23_spill] sm:$0xff] %v3689_v54 }
 0x111   :  { %706 = vmatmul.bf16.gmra.mxu0 %v3478_v52  ;;  %975 = vmatmul.bf16.gmra.mxu3 %v3398_v17 }
 0x112   :  { %755 = vmatmul.bf16.gmra.mxu1 %v3480_v53  ;;  %926 = vmatmul.bf16.gmra.mxu2 %v3396_v16 }
 0x116   :  { %v3700_v61 = vpop.f32.mrf.mxu0 }
 0x117   :  { %4645 = vst [vmem:[#allocation24_spill] sm:$0xff] %v3700_v61  ;;  %v3702_v63 = vpop.f32.mrf.mxu1 }
 0x118   :  { %4646 = vst [vmem:[#allocation25_spill] sm:$0xff] %v3702_v63 }
 0x11e   :  { %v672_v56 = vpop.f32.mrf.mxu0 }
 0x11f   :  { %v721_v11 = vpop.f32.mrf.mxu1  ;;  %v673_v57 = vadd.f32 %v672_v56, %v3707_v7 }
 0x121   :  { %v3716_v19 = vadd.f32 %v721_v11, %v673_v57  ;;  %1071 = vmatmul.f32.vlgmr.msra.gmra.mxu0 %v991_v8  ;;  %v591_v11 = vpop.f32.mrf.mxu2  ;;  %980 = vmatmul.bf16.gmra.mxu3 %v3442_v37 }
 0x122   :  { %931 = vmatmul.bf16.gmra.mxu2 %v3440_v36 }
 0x123   :  { %v992_v22 = vmul.f32 %v3716_v19, %v3716_v19 }
 0x125   :  { %1136 = vmatmul.f32.vlgmr.msra.gmra.mxu1 %v992_v22  ;;  %v3745_v22 = vadd.f32 %v630_v59, %v582_v9  ;;  %v643_v59 = vpop.f32.mrf.mxu3 }
 0x126   :  { %v674_v33 = vpop.f32.mrf.mxu0 }
 0x127   :  { %v723_v34 = vpop.f32.mrf.mxu1  ;;  %v675_v41 = vadd.f32 %v674_v33, %v3707_v7  ;;  %v997_v58 = vmul.f32 %v3745_v22, %v3745_v22 }
 0x129   :  { %v3731_v31 = vadd.f32 %v723_v34, %v675_v41  ;;  %1074 = vmatmul.f32.gmra.mxu0 %v993_v35  ;;  %v594_v35 = vpop.f32.mrf.mxu2 }
 0x12b   :  { %v994_v49 = vmul.f32 %v3731_v31, %v3731_v31 }
 0x12d   :  { %1139 = vmatmul.f32.gmra.mxu1 %v994_v49  ;;  %v3755_v49 = vadd.f32 %v633_v3, %v585_v27  ;;  %v645_v3 = vpop.f32.mrf.mxu3 }
 0x12e   :  { %v677_v5 = vpop.f32.mrf.mxu0 }
 0x12f   :  { %v726_v8 = vpop.f32.mrf.mxu1  ;;  %v678_v56 = vadd.f32 %v677_v5, %v3707_v7  ;;  %v999_v38 = vmul.f32 %v3755_v49, %v3755_v49  ;;  %v587_v5 = vadd.f32 %v586_v14, %v3696_v44 }
 0x131   :  { %v3741_v13 = vadd.f32 %v726_v8, %v678_v56  ;;  %1077 = vmatmul.f32.gmra.mxu0 %v995_v4  ;;  %v596_v9 = vpop.f32.mrf.mxu2  ;;  %v3767_v27 = vadd.f32 %v635_v21, %v587_v5  ;;  %v592_v5 = vadd.f32 %v591_v11, %v3696_v44  ;;  %985 = vmatmul.bf16.gmra.mxu3 %v3480_v53 }
 0x132   :  { %936 = vmatmul.bf16.gmra.mxu2 %v3478_v52 }
 0x133   :  { %v996_v57 = vmul.f32 %v3741_v13, %v3741_v13  ;;  %v1001_v14 = vmul.f32 %v3767_v27, %v3767_v27 }
 0x135   :  { %1142 = vmatmul.f32.gmra.mxu1 %v996_v57  ;;  %v648_v21 = vpop.f32.mrf.mxu3 }
 0x136   :  { %v679_v28 = vpop.f32.mrf.mxu0 }
 0x137   :  { %v728_v33 = vpop.f32.mrf.mxu1  ;;  %v680_v34 = vadd.f32 %v679_v28, %v3707_v7  ;;  %v590_v28 = vadd.f32 %v589_v43, %v3696_v44 }
 0x139   :  { %v3753_v41 = vadd.f32 %v728_v33, %v680_v34  ;;  %1080 = vmatmul.f32.gmra.mxu0 %v997_v58 }
 0x13b   :  { %v998_v0 = vmul.f32 %v3753_v41, %v3753_v41 }
 0x13d   :  { %1145 = vmatmul.f32.gmra.mxu1 %v998_v0  ;;  %v599_v0 = vpop.f32.mrf.mxu2 }
 0x13e   :  { %v682_v39 = vpop.f32.mrf.mxu0 }
 0x13f   :  { %v731_v4 = vpop.f32.mrf.mxu1  ;;  %v683_v8 = vadd.f32 %v682_v39, %v3707_v7  ;;  %v3777_v39 = vadd.f32 %v638_v45, %v590_v28  ;;  %v650_v45 = vpop.f32.mrf.mxu3 }
 0x141   :  { %v3763_v56 = vadd.f32 %v731_v4, %v683_v8  ;;  %1083 = vmatmul.f32.gmra.mxu0 %v999_v38  ;;  %v1003_v16 = vmul.f32 %v3777_v39, %v3777_v39 }
 0x143   :  { %v1000_v57 = vmul.f32 %v3763_v56, %v3763_v56 }
 0x145   :  { %1148 = vmatmul.f32.gmra.mxu1 %v1000_v57  ;;  %v601_v57 = vpop.f32.mrf.mxu2 }
 0x146   :  { %v684_v33 = vpop.f32.mrf.mxu0 }
 0x147   :  { %v733_v58 = vpop.f32.mrf.mxu1  ;;  %v685_v34 = vadd.f32 %v684_v33, %v3707_v7 }
 0x149   :  { %v3775_v38 = vadd.f32 %v733_v58, %v685_v34  ;;  %1086 = vmatmul.f32.gmra.mxu0 %v1001_v14  ;;  %v3789_v58 = vadd.f32 %v640_v50, %v592_v5  ;;  %v595_v14 = vadd.f32 %v594_v35, %v3696_v44  ;;  %v653_v50 = vpop.f32.mrf.mxu3 }
 0x14b   :  { %v1002_v43 = vmul.f32 %v3775_v38, %v3775_v38  ;;  %v1005_v11 = vmul.f32 %v3789_v58, %v3789_v58 }
 0x14d   :  { %1151 = vmatmul.f32.gmra.mxu1 %v1002_v43 }
 0x14e   :  { %v687_v17 = vpop.f32.mrf.mxu0 }
 0x14f   :  { %v736_v4 = vpop.f32.mrf.mxu1  ;;  %v688_v8 = vadd.f32 %v687_v17, %v3707_v7  ;;  %v604_v17 = vpop.f32.mrf.mxu2 }
 0x151   :  { %v3785_v33 = vadd.f32 %v736_v4, %v688_v8  ;;  %1089 = vmatmul.f32.gmra.mxu0 %v1003_v16  ;;  %v3799_v8 = vadd.f32 %v643_v59, %v595_v14  ;;  %v655_v59 = vpop.f32.mrf.mxu3 }
 0x153   :  { %v1004_v28 = vmul.f32 %v3785_v33, %v3785_v33  ;;  %v1007_v36 = vmul.f32 %v3799_v8, %v3799_v8 }
 0x155   :  { %1154 = vmatmul.f32.gmra.mxu1 %v1004_v28  ;;  %v597_v28 = vadd.f32 %v596_v9, %v3696_v44 }
 0x156   :  { %v689_v34 = vpop.f32.mrf.mxu0 }
 0x157   :  { %v738_v43 = vpop.f32.mrf.mxu1  ;;  %v690_v16 = vadd.f32 %v689_v34, %v3707_v7  ;;  %v606_v63 = vpop.f32.mrf.mxu2 }
 0x158   :  { %v607_v42 = vadd.f32 %v606_v63, %v3696_v44 }
 0x159   :  { %v3797_v4 = vadd.f32 %v738_v43, %v690_v16  ;;  %1092 = vmatmul.f32.gmra.mxu0 %v1005_v11  ;;  %v3811_v11 = vadd.f32 %v645_v3, %v597_v28  ;;  %v600_v16 = vadd.f32 %v599_v0, %v3696_v44  ;;  %v658_v3 = vpop.f32.mrf.mxu3 }
 0x15b   :  { %v1006_v35 = vmul.f32 %v3797_v4, %v3797_v4  ;;  %v1009_v9 = vmul.f32 %v3811_v11, %v3811_v11 }
 0x15d   :  { %1157 = vmatmul.f32.gmra.mxu1 %v1006_v35 }
 0x15e   :  { %v692_v37 = vpop.f32.mrf.mxu0 }
 0x15f   :  { %v741_v5 = vpop.f32.mrf.mxu1  ;;  %v693_v34 = vadd.f32 %v692_v37, %v3707_v7  ;;  %v609_v37 = vpop.f32.mrf.mxu2 }
 0x161   :  { %v3807_v43 = vadd.f32 %v741_v5, %v693_v34  ;;  %1095 = vmatmul.f32.gmra.mxu0 %v1007_v36  ;;  %v3821_v34 = vadd.f32 %v648_v21, %v600_v16 }
 0x163   :  { %v1008_v14 = vmul.f32 %v3807_v43, %v3807_v43  ;;  %v1011_v52 = vmul.f32 %v3821_v34, %v3821_v34 }
 0x165   :  { %1160 = vmatmul.f32.gmra.mxu1 %v1008_v14  ;;  %v602_v14 = vadd.f32 %v601_v57, %v3696_v44 }
 0x166   :  { %v694_v35 = vpop.f32.mrf.mxu0 }
 0x167   :  { %v743_v61 = vpop.f32.mrf.mxu1  ;;  %v695_v36 = vadd.f32 %v694_v35, %v3707_v7  ;;  %v611_v47 = vpop.f32.mrf.mxu2  ;;  %v3833_v16 = vadd.f32 %v650_v45, %v602_v14 }
 0x168   :  { %v612_v25 = vadd.f32 %v611_v47, %v3696_v44 }
 0x169   :  { %v3819_v5 = vadd.f32 %v743_v61, %v695_v36  ;;  %1098 = vmatmul.f32.gmra.mxu0 %v1009_v9  ;;  %v660_v9 = vpop.f32.mrf.mxu3  ;;  %v605_v36 = vadd.f32 %v604_v17, %v3696_v44  ;;  %v1013_v57 = vmul.f32 %v3833_v16, %v3833_v16 }
 0x16b   :  { %v1010_v0 = vmul.f32 %v3819_v5, %v3819_v5 }
 0x16d   :  { %1163 = vmatmul.f32.gmra.mxu1 %v1010_v0 }
 0x16e   :  { %v697_v53 = vpop.f32.mrf.mxu0 }
 0x16f   :  { %v746_v28 = vpop.f32.mrf.mxu1  ;;  %v698_v35 = vadd.f32 %v697_v53, %v3707_v7 }
 0x171   :  { %v3829_v61 = vadd.f32 %v746_v28, %v698_v35  ;;  %1101 = vmatmul.f32.gmra.mxu0 %v1011_v52  ;;  %v3841_v28 = vadd.f32 %v653_v50, %v605_v36  ;;  %v902_v52 = vpop.f32.mrf.mxu2  ;;  %v951_v17 = vpop.f32.mrf.mxu3  ;;  %v3853_v36 = vadd.f32 %v655_v59, %v607_v42 }
 0x173   :  { %v1012_v21 = vmul.f32 %v3829_v61, %v3829_v61  ;;  %v1015_v14 = vmul.f32 %v3841_v28, %v3841_v28  ;;  %v1017_v51 = vmul.f32 %v3853_v36, %v3853_v36 }
 0x175   :  { %1166 = vmatmul.f32.gmra.mxu1 %v1012_v21 }
 0x176   :  { %v699_v0 = vpop.f32.mrf.mxu0 }
 0x177   :  { %v748_v46 = vpop.f32.mrf.mxu1  ;;  %v700_v53 = vadd.f32 %v699_v0, %v3707_v7 }
 0x179   :  { %v3839_v30 = vadd.f32 %v748_v46, %v700_v53  ;;  %1104 = vmatmul.f32.gmra.mxu0 %v1013_v57  ;;  %v904_v57 = vpop.f32.mrf.mxu2  ;;  %v610_v53 = vadd.f32 %v609_v37, %v3696_v44 }
 0x17b   :  { %v1014_v45 = vmul.f32 %v3839_v30, %v3839_v30 }
 0x17d   :  { %1169 = vmatmul.f32.gmra.mxu1 %v1014_v45 }
 0x17e   :  { %v702_v35 = vpop.f32.mrf.mxu0 }
 0x17f   :  { %v751_v21 = vpop.f32.mrf.mxu1  ;;  %v703_v0 = vadd.f32 %v702_v35, %v3707_v7  ;;  %v953_v35 = vpop.f32.mrf.mxu3 }
 0x181   :  { %v3849_v46 = vadd.f32 %v751_v21, %v703_v0  ;;  %1107 = vmatmul.f32.gmra.mxu0 %v1015_v14  ;;  %v3861_v14 = vadd.f32 %v658_v3, %v610_v53  ;;  %v907_v37 = vpop.f32.mrf.mxu2  ;;  %v3873_v3 = vadd.f32 %v660_v9, %v612_v25  ;;  %v3878_v53 = vld [vmem:[%s4618_s6] ss:$0 sm:$0xff] }
 0x182   :  { %v905_v29 = vadd.f32 %v3878_v53, %v904_v57  ;;  %v908_v60 = vadd.f32 %v3878_v53, %v907_v37 }
 0x183   :  { %v1016_v50 = vmul.f32 %v3849_v46, %v3849_v46  ;;  %v1019_v59 = vmul.f32 %v3861_v14, %v3861_v14  ;;  %v1021_v47 = vmul.f32 %v3873_v3, %v3873_v3 }
 0x185   :  { %1172 = vmatmul.f32.gmra.mxu1 %v1016_v50 }
 0x186   :  { %v704_v45 = vpop.f32.mrf.mxu0 }
 0x187   :  { %v753_v54 = vpop.f32.mrf.mxu1  ;;  %v705_v63 = vadd.f32 %v704_v45, %v3707_v7 }
 0x189   :  { %v3859_v21 = vadd.f32 %v753_v54, %v705_v63  ;;  %1110 = vmatmul.f32.gmra.mxu0 %v1017_v51  ;;  %v956_v54 = vpop.f32.mrf.mxu3 }
 0x18a   :  { %v3894_v62 = vadd.f32 %v956_v54, %v908_v60 }
 0x18b   :  { %v1018_v42 = vmul.f32 %v3859_v21, %v3859_v21 }
 0x18d   :  { %1175 = vmatmul.f32.gmra.mxu1 %v1018_v42 }
 0x18e   :  { %v707_v0 = vpop.f32.mrf.mxu0 }
 0x18f   :  { %v756_v50 = vpop.f32.mrf.mxu1  ;;  %v708_v45 = vadd.f32 %v707_v0, %v3707_v7 }
 0x191   :  { %v3869_v24 = vadd.f32 %v756_v50, %v708_v45  ;;  %1113 = vmatmul.f32.gmra.mxu0 %v1019_v59  ;;  %v909_v59 = vpop.f32.mrf.mxu2  ;;  %v903_v50 = vadd.f32 %v3878_v53, %v902_v52  ;;  %v958_v9 = vpop.f32.mrf.mxu3 }
 0x193   :  { %v1020_v51 = vmul.f32 %v3869_v24, %v3869_v24  ;;  %v952_v45 = vadd.f32 %v951_v17, %v903_v50 }
 0x195   :  { %1178 = vmatmul.f32.gmra.mxu1 %v1020_v51  ;;  %v1185_v18 = vmul.f32 %v952_v45, %v952_v45 }
 0x196   :  { %v709_v63 = vpop.f32.mrf.mxu0 }
 0x197   :  { %v710_v44 = vadd.f32 %v709_v63, %v3707_v7  ;;  %v758_v42 = vpop.f32.mrf.mxu1 }
 0x199   :  { %v3883_v0 = vadd.f32 %v758_v42, %v710_v44  ;;  %1116 = vmatmul.f32.gmra.mxu0 %v1021_v47  ;;  %v912_v32 = vpop.f32.mrf.mxu2  ;;  %v961_v44 = vpop.f32.mrf.mxu3  ;;  %v3889_v42 = vadd.f32 %v953_v35, %v905_v29  ;;  %v1187_v35 = vmul.f32 %v3894_v62, %v3894_v62 }
 0x19b   :  { %v1022_v25 = vmul.f32 %v3883_v0, %v3883_v0  ;;  %v1186_v17 = vmul.f32 %v3889_v42, %v3889_v42 }
 0x19d   :  { %1181 = vmatmul.f32.gmra.mxu1 %v1022_v25 }
 0x19e   :  { %v1072_v51 = vpop.f32.mrf.mxu0 }
 0x1a1   :  { %v914_v25 = vpop.f32.mrf.mxu2 }
 0x1a2   :  { %v1137_v15 = vpop.f32.mrf.mxu1 }
 0x1a3   :  { %v1138_v7 = vadd.f32 %v1137_v15, %v1072_v51  ;;  %v3896_v51 = vpop.f32.mrf.mxu3 }
 0x1a5   :  { %v1201_v63 = vsub.f32 %v1138_v7, %v1185_v18 }
 0x1a6   :  { %v1075_v6 = vpop.f32.mrf.mxu0 }
 0x1a7   :  { %v1217_v52 = vmax.f32 %v1201_v63, 0.0 }
 0x1a9   :  { %v1233_v47 = vadd.f32 1e-06, %v1217_v52  ;;  %v910_v52 = vadd.f32 %v3878_v53, %v909_v59 }
 0x1aa   :  { %v1140_v12 = vpop.f32.mrf.mxu1 }
 0x1ab   :  { %2909 = vrsqrt.f32 %v1233_v47  ;;  %v1141_v50 = vadd.f32 %v1140_v12, %v1075_v6  ;;  %vm1255_vm1 = vweird.f32 %v1233_v47 }
 0x1ad   :  { %v1202_v57 = vsub.f32 %v1141_v50, %v1186_v17  ;;  %v917_v17 = vpop.f32.mrf.mxu2  ;;  %v3901_v50 = vadd.f32 %v958_v9, %v910_v52 }
 0x1ae   :  { %v1078_v15 = vpop.f32.mrf.mxu0 }
 0x1af   :  { %v1218_v18 = vmax.f32 %v1202_v57, 0.0 }
 0x1b1   :  { %v2910_v29 = vpop.eup %2909  ;;  %v1234_v7 = vadd.f32 1e-06, %v1218_v18  ;;  %v913_v18 = vadd.f32 %v3878_v53, %v912_v32 }
 0x1b2   :  { %v1250_v37 = vmul.f32 %v2910_v29, %v1233_v47  ;;  %v1143_v63 = vpop.f32.mrf.mxu1  ;;  %vm1256_vm0 = vweird.f32 %v2910_v29 }
 0x1b3   :  { %2911 = vrsqrt.f32 %v1234_v7  ;;  %v1144_v26 = vadd.f32 %v1143_v63, %v1078_v15  ;;  %v3906_v15 = vpop.f32.mrf.mxu3  ;;  %vm1257_vm3 = vmor %vm1255_vm1, %vm1256_vm0  ;;  %v3911_v63 = vadd.f32 %v961_v44, %v913_v18  ;;  %vm1265_vm5 = vweird.f32 %v1234_v7 }
 0x1b4   :  { %v1251_v6 = vmul.f32 %v2910_v29, %v1250_v37 }
 0x1b5   :  { %v1203_v12 = vsub.f32 %v1144_v26, %v1187_v35  ;;  %v1188_v26 = vmul.f32 %v3901_v50, %v3901_v50  ;;  %v1189_v44 = vmul.f32 %v3911_v63, %v3911_v63 }
 0x1b6   :  { %v1252_v60 = vmul.f32 0.5, %v1251_v6  ;;  %v1081_v54 = vpop.f32.mrf.mxu0 }
 0x1b7   :  { %v1219_v57 = vmax.f32 %v1203_v12, 0.0 }
 0x1b8   :  { %v1253_v20 = vsub.f32 1.5, %v1252_v60 }
 0x1b9   :  { %v2912_v48 = vpop.eup %2911  ;;  %v3903_v40 = vadd.f32 1e-06, %v1219_v57  ;;  %v915_v57 = vadd.f32 %v3878_v53, %v914_v25 }
 0x1ba   :  { %v1260_v10 = vmul.f32 %v2912_v48, %v1234_v7  ;;  %v1146_v2 = vpop.f32.mrf.mxu1  ;;  %v1254_v59 = vmul.f32 %v2910_v29, %v1253_v20  ;;  %vm1266_vm4 = vweird.f32 %v2912_v48 }
 0x1bb   :  { %2913 = vrsqrt.f32 %v3903_v40  ;;  %v1147_v9 = vadd.f32 %v1146_v2, %v1081_v54  ;;  %v3917_v2 = vpop.f32.mrf.mxu2  ;;  %vm1267_vm6 = vmor %vm1265_vm5, %vm1266_vm4  ;;  %v3932_v7 = vadd.f32 %v3896_v51, %v915_v57  ;;  %vm1275_vm8 = vweird.f32 %v3903_v40 }
 0x1bc   :  { %v1258_v35 = vsel %vm1257_vm3, %v2910_v29, %v1254_v59  ;;  %v1261_v37 = vmul.f32 %v2912_v48, %v1260_v10 }
 0x1bd   :  { %v1204_v52 = vsub.f32 %v1147_v9, %v1188_v26  ;;  %2761 = vmatmul.msk.f32.vlgmr.msra.gmra.mxu2 %vm1411_vm2, %v1258_v35  ;;  %v1590_v32 = vmul.f32 %v1258_v35, %v952_v45  ;;  %2777 = vmatmul.msk.f32.vlgmr.msra.gmra.mxu3 %vm1411_vm2, %v1258_v35  ;;  %v3926_v9 = vpop.f32.mrf.mxu3 }
 0x1be   :  { %v1084_v20 = vpop.f32.mrf.mxu0  ;;  %v1262_v47 = vmul.f32 0.5, %v1261_v37 }
 0x1bf   :  { %v1220_v6 = vmax.f32 %v1204_v52, 0.0  ;;  %2793 = vmatmul.msk.f32.vlgmr.msrb.gmra.mxu0 %vm1411_vm2, %v1590_v32  ;;  %2809 = vmatmul.msk.f32.vlgmr.msrb.gmra.mxu1 %vm1411_vm2, %v1590_v32 }
 0x1c0   :  { %v1263_v12 = vsub.f32 1.5, %v1262_v47 }
 0x1c1   :  { %v2914_v10 = vpop.eup %2913  ;;  %v3921_v29 = vadd.f32 1e-06, %v1220_v6  ;;  %v918_v6 = vadd.f32 %v3878_v53, %v917_v17 }
 0x1c2   :  { %v1270_v45 = vmul.f32 %v2914_v10, %v3903_v40  ;;  %v1149_v60 = vpop.f32.mrf.mxu1  ;;  %v1264_v54 = vmul.f32 %v2912_v48, %v1263_v12  ;;  %vm1276_vm7 = vweird.f32 %v2914_v10 }
 0x1c3   :  { %2915 = vrsqrt.f32 %v3921_v29  ;;  %v1150_v18 = vadd.f32 %v1149_v60, %v1084_v20  ;;  %v922_v51 = vpop.f32.mrf.mxu2  ;;  %v2205_v60 = vld [vmem:[%s4619_s10 + $0xf8] sm:$0xff]  ;;  %vm1277_vm9 = vmor %vm1275_vm8, %vm1276_vm7  ;;  %vm1285_vm11 = vweird.f32 %v3921_v29 }
 0x1c4   :  { %v1268_v59 = vsel %vm1267_vm6, %v2912_v48, %v1264_v54  ;;  %v1271_v26 = vmul.f32 %v2914_v10, %v1270_v45  ;;  %v2189_v45 = vld [vmem:[%s4619_s10 + $0x78] sm:$0xff]  ;;  %v1190_v54 = vmul.f32 %v3932_v7, %v3932_v7  ;;  %2275 = vmatpush.msrb.mxu3 %v2205_v60 }
 0x1c5   :  { %v1205_v35 = vsub.f32 %v1150_v18, %v1189_v44  ;;  %2762 = vmatmul.msk.f32.gmra.mxu2 %vm1411_vm2, %v1268_v59  ;;  %v1591_v37 = vmul.f32 %v1268_v59, %v3889_v42  ;;  %2778 = vmatmul.msk.f32.gmra.mxu3 %vm1411_vm2, %v1268_v59  ;;  %v3951_v18 = vadd.f32 %v3906_v15, %v918_v6 }
 0x1c6   :  { %v1087_v52 = vpop.f32.mrf.mxu0  ;;  %v1272_v32 = vmul.f32 0.5, %v1271_v26  ;;  %2210 = vmatpush.msrb.mxu2 %v2189_v45 }
 0x1c7   :  { %v1221_v47 = vmax.f32 %v1205_v35, 0.0  ;;  %2794 = vmatmul.msk.f32.gmra.mxu0 %vm1411_vm2, %v1591_v37  ;;  %2810 = vmatmul.msk.f32.gmra.mxu1 %vm1411_vm2, %v1591_v37  ;;  %v1191_v15 = vmul.f32 %v3951_v18, %v3951_v18 }
 0x1c8   :  { %v1273_v48 = vsub.f32 1.5, %v1272_v32  ;;  %v971_v32 = vpop.f32.mrf.mxu3 }
 0x1c9   :  { %v2916_v25 = vpop.eup %2915  ;;  %v3936_v20 = vadd.f32 1e-06, %v1221_v47 }
 0x1ca   :  { %v1280_v42 = vmul.f32 %v2916_v25, %v3921_v29  ;;  %v1152_v12 = vpop.f32.mrf.mxu1  ;;  %v1274_v44 = vmul.f32 %v2914_v10, %v1273_v48  ;;  %vm1286_vm10 = vweird.f32 %v2916_v25 }
 0x1cb   :  { %2917 = vrsqrt.f32 %v3936_v20  ;;  %v1153_v17 = vadd.f32 %v1152_v12, %v1087_v52  ;;  %v920_v12 = vadd.f32 %v3878_v53, %v3917_v2  ;;  %vm1287_vm12 = vmor %vm1285_vm11, %vm1286_vm10  ;;  %vm1295_vm14 = vweird.f32 %v3936_v20 }
 0x1cc   :  { %v1278_v57 = vsel %vm1277_vm9, %v2914_v10, %v1274_v44  ;;  %v1281_v40 = vmul.f32 %v2916_v25, %v1280_v42 }
 0x1cd   :  { %v1206_v59 = vsub.f32 %v1153_v17, %v1190_v54  ;;  %2763 = vmatmul.msk.f32.gmra.mxu2 %vm1411_vm2, %v1278_v57  ;;  %v1592_v26 = vmul.f32 %v1278_v57, %v3894_v62  ;;  %2779 = vmatmul.msk.f32.gmra.mxu3 %vm1411_vm2, %v1278_v57  ;;  %v924_v54 = vpop.f32.mrf.mxu2  ;;  %v2188_v17 = vld [vmem:[%s4619_s10 + $0x70] sm:$0xff] }
 0x1ce   :  { %v1090_v35 = vpop.f32.mrf.mxu0  ;;  %v1282_v37 = vmul.f32 0.5, %v1281_v40  ;;  %v2204_v57 = vld [vmem:[%s4619_s10 + $0xf0] sm:$0xff]  ;;  %2211 = vmatpush.msrb.mxu2 %v2188_v17 }
 0x1cf   :  { %v1222_v47 = vmax.f32 %v1206_v59, 0.0  ;;  %2795 = vmatmul.msk.f32.gmra.mxu0 %vm1411_vm2, %v1592_v26  ;;  %2811 = vmatmul.msk.f32.gmra.mxu1 %vm1411_vm2, %v1592_v26 }
 0x1d0   :  { %v1283_v10 = vsub.f32 1.5, %v1282_v37  ;;  %2276 = vmatpush.msrb.mxu3 %v2204_v57  ;;  %v973_v37 = vpop.f32.mrf.mxu3 }
 0x1d1   :  { %v2918_v52 = vpop.eup %2917  ;;  %v3960_v48 = vadd.f32 1e-06, %v1222_v47 }
 0x1d2   :  { %v1290_v62 = vmul.f32 %v2918_v52, %v3936_v20  ;;  %v1155_v6 = vpop.f32.mrf.mxu1  ;;  %v1284_v42 = vmul.f32 %v2916_v25, %v1283_v10  ;;  %vm1296_vm13 = vweird.f32 %v2918_v52 }
 0x1d3   :  { %2919 = vrsqrt.f32 %v3960_v48  ;;  %v1156_v44 = vadd.f32 %v1155_v6, %v1090_v35  ;;  %vm1297_vm15 = vmor %vm1295_vm14, %vm1296_vm13  ;;  %vm1305_vm1 = vweird.f32 %v3960_v48 }
 0x1d4   :  { %v1288_v45 = vsel %vm1287_vm12, %v2916_v25, %v1284_v42  ;;  %v1291_v60 = vmul.f32 %v2918_v52, %v1290_v62  ;;  %v3977_v25 = vadd.f32 %v3926_v9, %v920_v12 }
 0x1d5   :  { %v1207_v40 = vsub.f32 %v1156_v44, %v1191_v15  ;;  %2764 = vmatmul.msk.f32.gmra.mxu2 %vm1411_vm2, %v1288_v45  ;;  %v1593_v29 = vmul.f32 %v1288_v45, %v3901_v50  ;;  %2780 = vmatmul.msk.f32.gmra.mxu3 %vm1411_vm2, %v1288_v45  ;;  %v923_v50 = vadd.f32 %v3878_v53, %v922_v51  ;;  %v2187_v45 = vld [vmem:[%s4619_s10 + $0x68] sm:$0xff] }
 0x1d6   :  { %v1093_v2 = vpop.f32.mrf.mxu0  ;;  %v1292_v59 = vmul.f32 0.5, %v1291_v60  ;;  %v1192_v9 = vmul.f32 %v3977_v25, %v3977_v25  ;;  %v2203_v51 = vld [vmem:[%s4619_s10 + $0xe8] sm:$0xff]  ;;  %2212 = vmatpush.msrb.mxu2 %v2187_v45 }
 0x1d7   :  { %v1223_v26 = vmax.f32 %v1207_v40, 0.0  ;;  %2796 = vmatmul.msk.f32.gmra.mxu0 %vm1411_vm2, %v1593_v29  ;;  %2812 = vmatmul.msk.f32.gmra.mxu1 %vm1411_vm2, %v1593_v29  ;;  %v3995_v60 = vadd.f32 %v971_v32, %v923_v50  ;;  %v927_v40 = vpop.f32.mrf.mxu2 }
 0x1d8   :  { %v1293_v35 = vsub.f32 1.5, %v1292_v59  ;;  %2277 = vmatpush.msrb.mxu3 %v2203_v51 }
 0x1d9   :  { %v2920_v47 = vpop.eup %2919  ;;  %v3981_v10 = vadd.f32 1e-06, %v1223_v26  ;;  %v1193_v59 = vmul.f32 %v3995_v60, %v3995_v60 }
 0x1da   :  { %v1300_v15 = vmul.f32 %v2920_v47, %v3960_v48  ;;  %v1158_v62 = vpop.f32.mrf.mxu1  ;;  %v1294_v6 = vmul.f32 %v2918_v52, %v1293_v35  ;;  %vm1306_vm0 = vweird.f32 %v2920_v47 }
 0x1db   :  { %2921 = vrsqrt.f32 %v3981_v10  ;;  %v1159_v42 = vadd.f32 %v1158_v62, %v1093_v2  ;;  %v925_v62 = vadd.f32 %v3878_v53, %v924_v54  ;;  %vm1307_vm3 = vmor %vm1305_vm1, %vm1306_vm0  ;;  %vm1315_vm5 = vweird.f32 %v3981_v10 }
 0x1dc   :  { %v1298_v12 = vsel %vm1297_vm15, %v2918_v52, %v1294_v6  ;;  %v1301_v44 = vmul.f32 %v2920_v47, %v1300_v15  ;;  %v976_v15 = vpop.f32.mrf.mxu3 }
 0x1dd   :  { %v1208_v20 = vsub.f32 %v1159_v42, %v1192_v9  ;;  %2765 = vmatmul.msk.f32.gmra.mxu2 %vm1411_vm2, %v1298_v12  ;;  %v1594_v17 = vmul.f32 %v1298_v12, %v3911_v63  ;;  %2781 = vmatmul.msk.f32.gmra.mxu3 %vm1411_vm2, %v1298_v12  ;;  %v2186_v12 = vld [vmem:[%s4619_s10 + $0x60] sm:$0xff] }
 0x1de   :  { %v1096_v57 = vpop.f32.mrf.mxu0  ;;  %v1302_v52 = vmul.f32 0.5, %v1301_v44  ;;  %v2202_v44 = vld [vmem:[%s4619_s10 + $0xe0] sm:$0xff]  ;;  %2213 = vmatpush.msrb.mxu2 %v2186_v12 }
 0x1df   :  { %v1224_v29 = vmax.f32 %v1208_v20, 0.0  ;;  %2797 = vmatmul.msk.f32.gmra.mxu0 %vm1411_vm2, %v1594_v17  ;;  %2813 = vmatmul.msk.f32.gmra.mxu1 %vm1411_vm2, %v1594_v17 }
 0x1e0   :  { %v1303_v2 = vsub.f32 1.5, %v1302_v52  ;;  %2278 = vmatpush.msrb.mxu3 %v2202_v44 }
 0x1e1   :  { %v2922_v32 = vpop.eup %2921  ;;  %v4004_v26 = vadd.f32 1e-06, %v1224_v29 }
 0x1e2   :  { %v1310_v63 = vmul.f32 %v2922_v32, %v3981_v10  ;;  %v1161_v35 = vpop.f32.mrf.mxu1  ;;  %v1304_v50 = vmul.f32 %v2920_v47, %v1303_v2  ;;  %vm1316_vm4 = vweird.f32 %v2922_v32 }
 0x1e3   :  { %2923 = vrsqrt.f32 %v4004_v26  ;;  %v1162_v6 = vadd.f32 %v1161_v35, %v1096_v57  ;;  %v929_v57 = vpop.f32.mrf.mxu2  ;;  %vm1317_vm6 = vmor %vm1315_vm5, %vm1316_vm4  ;;  %vm1325_vm8 = vweird.f32 %v4004_v26 }
 0x1e4   :  { %v1308_v9 = vsel %vm1307_vm3, %v2920_v47, %v1304_v50  ;;  %v1311_v42 = vmul.f32 %v2922_v32, %v1310_v63  ;;  %v4019_v47 = vadd.f32 %v973_v37, %v925_v62  ;;  %v978_v62 = vpop.f32.mrf.mxu3 }
 0x1e5   :  { %v1209_v45 = vsub.f32 %v1162_v6, %v1193_v59  ;;  %2766 = vmatmul.msk.f32.gmra.mxu2 %vm1411_vm2, %v1308_v9  ;;  %v1595_v48 = vmul.f32 %v1308_v9, %v3932_v7  ;;  %2782 = vmatmul.msk.f32.gmra.mxu3 %vm1411_vm2, %v1308_v9  ;;  %v928_v7 = vadd.f32 %v3878_v53, %v927_v40  ;;  %v2185_v40 = vld [vmem:[%s4619_s10 + $0x58] sm:$0xff] }
 0x1e6   :  { %v1099_v54 = vpop.f32.mrf.mxu0  ;;  %v1312_v51 = vmul.f32 0.5, %v1311_v42  ;;  %v1194_v37 = vmul.f32 %v4019_v47, %v4019_v47  ;;  %v2201_v9 = vld [vmem:[%s4619_s10 + $0xd8] sm:$0xff]  ;;  %2214 = vmatpush.msrb.mxu2 %v2185_v40 }
 0x1e7   :  { %v1225_v20 = vmax.f32 %v1209_v45, 0.0  ;;  %2798 = vmatmul.msk.f32.gmra.mxu0 %vm1411_vm2, %v1595_v48  ;;  %2814 = vmatmul.msk.f32.gmra.mxu1 %vm1411_vm2, %v1595_v48  ;;  %v4037_v42 = vadd.f32 %v976_v15, %v928_v7 }
 0x1e8   :  { %v1313_v17 = vsub.f32 1.5, %v1312_v51  ;;  %2279 = vmatpush.msrb.mxu3 %v2201_v9 }
 0x1e9   :  { %v2924_v52 = vpop.eup %2923  ;;  %v4023_v29 = vadd.f32 1e-06, %v1225_v20 }
 0x1ea   :  { %v1320_v2 = vmul.f32 %v2924_v52, %v4004_v26  ;;  %v1164_v59 = vpop.f32.mrf.mxu1  ;;  %v1314_v63 = vmul.f32 %v2922_v32, %v1313_v17  ;;  %vm1326_vm7 = vweird.f32 %v2924_v52 }
 0x1eb   :  { %2925 = vrsqrt.f32 %v4023_v29  ;;  %v1165_v35 = vadd.f32 %v1164_v59, %v1099_v54  ;;  %v1195_v54 = vmul.f32 %v4037_v42, %v4037_v42  ;;  %v932_v7 = vpop.f32.mrf.mxu2  ;;  %vm1327_vm9 = vmor %vm1325_vm8, %vm1326_vm7  ;;  %vm1335_vm11 = vweird.f32 %v4023_v29 }
 0x1ec   :  { %v1318_v50 = vsel %vm1317_vm6, %v2922_v32, %v1314_v63  ;;  %v1321_v6 = vmul.f32 %v2924_v52, %v1320_v2  ;;  %v930_v2 = vadd.f32 %v3878_v53, %v929_v57  ;;  %v981_v40 = vpop.f32.mrf.mxu3 }
 0x1ed   :  { %v1210_v10 = vsub.f32 %v1165_v35, %v1194_v37  ;;  %2767 = vmatmul.msk.f32.gmra.mxu2 %vm1411_vm2, %v1318_v50  ;;  %v1596_v12 = vmul.f32 %v1318_v50, %v3951_v18  ;;  %2783 = vmatmul.msk.f32.gmra.mxu3 %vm1411_vm2, %v1318_v50  ;;  %v2184_v35 = vld [vmem:[%s4619_s10 + $0x50] sm:$0xff] }
 0x1ee   :  { %v1102_v32 = vpop.f32.mrf.mxu0  ;;  %v1322_v44 = vmul.f32 0.5, %v1321_v6  ;;  %v2200_v50 = vld [vmem:[%s4619_s10 + $0xd0] sm:$0xff]  ;;  %2215 = vmatpush.msrb.mxu2 %v2184_v35 }
 0x1ef   :  { %v1226_v45 = vmax.f32 %v1210_v10, 0.0  ;;  %2799 = vmatmul.msk.f32.gmra.mxu0 %vm1411_vm2, %v1596_v12  ;;  %2815 = vmatmul.msk.f32.gmra.mxu1 %vm1411_vm2, %v1596_v12 }
 0x1f0   :  { %v1323_v48 = vsub.f32 1.5, %v1322_v44  ;;  %2280 = vmatpush.msrb.mxu3 %v2200_v50 }
 0x1f1   :  { %v2926_v15 = vpop.eup %2925  ;;  %v4046_v51 = vadd.f32 1e-06, %v1226_v45 }
 0x1f2   :  { %v1330_v18 = vmul.f32 %v2926_v15, %v4023_v29  ;;  %v1167_v20 = vpop.f32.mrf.mxu1  ;;  %v1324_v17 = vmul.f32 %v2924_v52, %v1323_v48  ;;  %vm1336_vm10 = vweird.f32 %v2926_v15 }
 0x1f3   :  { %2927 = vrsqrt.f32 %v4046_v51  ;;  %v1168_v59 = vadd.f32 %v1167_v20, %v1102_v32  ;;  %vm1337_vm12 = vmor %vm1335_vm11, %vm1336_vm10  ;;  %vm1345_vm14 = vweird.f32 %v4046_v51 }
 0x1f4   :  { %v1331_v63 = vmul.f32 %v2926_v15, %v1330_v18  ;;  %v1328_v37 = vsel %vm1327_vm9, %v2924_v52, %v1324_v17  ;;  %v4061_v52 = vadd.f32 %v978_v62, %v930_v2  ;;  %v934_v2 = vpop.f32.mrf.mxu2 }
 0x1f5   :  { %v1211_v6 = vsub.f32 %v1168_v59, %v1195_v54  ;;  %2768 = vmatmul.msk.f32.gmra.mxu2 %vm1411_vm2, %v1328_v37  ;;  %v1597_v26 = vmul.f32 %v1328_v37, %v3977_v25  ;;  %2784 = vmatmul.msk.f32.gmra.mxu3 %vm1411_vm2, %v1328_v37  ;;  %v933_v25 = vadd.f32 %v3878_v53, %v932_v7  ;;  %v2183_v7 = vld [vmem:[%s4619_s10 + $0x48] sm:$0xff] }
 0x1f6   :  { %v1105_v57 = vpop.f32.mrf.mxu0  ;;  %v1332_v9 = vmul.f32 0.5, %v1331_v63  ;;  %v1196_v62 = vmul.f32 %v4061_v52, %v4061_v52  ;;  %v2199_v59 = vld [vmem:[%s4619_s10 + $0xc8] sm:$0xff]  ;;  %2216 = vmatpush.msrb.mxu2 %v2183_v7 }
 0x1f7   :  { %v1227_v10 = vmax.f32 %v1211_v6, 0.0  ;;  %2800 = vmatmul.msk.f32.gmra.mxu0 %vm1411_vm2, %v1597_v26  ;;  %2816 = vmatmul.msk.f32.gmra.mxu1 %vm1411_vm2, %v1597_v26  ;;  %v4079_v63 = vadd.f32 %v981_v40, %v933_v25  ;;  %v983_v6 = vpop.f32.mrf.mxu3  ;;  %v935_v25 = vadd.f32 %v3878_v53, %v934_v2 }
 0x1f8   :  { %v1333_v12 = vsub.f32 1.5, %v1332_v9  ;;  %2281 = vmatpush.msrb.mxu3 %v2199_v59 }
 0x1f9   :  { %v2928_v32 = vpop.eup %2927  ;;  %v4065_v44 = vadd.f32 1e-06, %v1227_v10  ;;  %v1197_v40 = vmul.f32 %v4079_v63, %v4079_v63 }
 0x1fa   :  { %v1340_v45 = vmul.f32 %v2928_v32, %v4046_v51  ;;  %v1170_v48 = vpop.f32.mrf.mxu1  ;;  %v1334_v54 = vmul.f32 %v2926_v15, %v1333_v12  ;;  %vm1346_vm13 = vweird.f32 %v2928_v32 }
 0x1fb   :  { %2929 = vrsqrt.f32 %v4065_v44  ;;  %v1171_v18 = vadd.f32 %v1170_v48, %v1105_v57  ;;  %vm1347_vm15 = vmor %vm1345_vm14, %vm1346_vm13  ;;  %vm1355_vm1 = vweird.f32 %v4065_v44 }
 0x1fc   :  { %v1341_v20 = vmul.f32 %v2928_v32, %v1340_v45  ;;  %v1338_v17 = vsel %vm1337_vm12, %v2926_v15, %v1334_v54 }
 0x1fd   :  { %v1212_v29 = vsub.f32 %v1171_v18, %v1196_v62  ;;  %2769 = vmatmul.msk.f32.gmra.mxu2 %vm1411_vm2, %v1338_v17  ;;  %v1598_v37 = vmul.f32 %v1338_v17, %v3995_v60  ;;  %2785 = vmatmul.msk.f32.gmra.mxu3 %vm1411_vm2, %v1338_v17  ;;  %v2182_v62 = vld [vmem:[%s4619_s10 + $0x40] sm:$0xff]  ;;  %v937_v17 = vpop.f32.mrf.mxu2 }
 0x1fe   :  { %v1108_v35 = vpop.f32.mrf.mxu0  ;;  %v1342_v15 = vmul.f32 0.5, %v1341_v20  ;;  %v2198_v18 = vld [vmem:[%s4619_s10 + $0xc0] sm:$0xff]  ;;  %2217 = vmatpush.msrb.mxu2 %v2182_v62  ;;  %v2196_v62 = vld [vmem:[%s4619_s10 + $0xb0] sm:$0xff] }
 0x1ff   :  { %v1228_v50 = vmax.f32 %v1212_v29, 0.0  ;;  %2801 = vmatmul.msk.f32.gmra.mxu0 %vm1411_vm2, %v1598_v37  ;;  %2817 = vmatmul.msk.f32.gmra.mxu1 %vm1411_vm2, %v1598_v37 }
 0x200   :  { %v1343_v26 = vsub.f32 1.5, %v1342_v15  ;;  %2282 = vmatpush.msrb.mxu3 %v2198_v18 }
 0x201   :  { %v2930_v57 = vpop.eup %2929  ;;  %v4088_v9 = vadd.f32 1e-06, %v1228_v50  ;;  %v986_v50 = vpop.f32.mrf.mxu3 }
 0x202   :  { %v1350_v60 = vmul.f32 %v2930_v57, %v4065_v44  ;;  %v1173_v10 = vpop.f32.mrf.mxu1  ;;  %v1344_v12 = vmul.f32 %v2928_v32, %v1343_v26  ;;  %vm1356_vm0 = vweird.f32 %v2930_v57 }
 0x203   :  { %2931 = vrsqrt.f32 %v4088_v9  ;;  %v1174_v45 = vadd.f32 %v1173_v10, %v1108_v35  ;;  %vm1357_vm3 = vmor %vm1355_vm1, %vm1356_vm0  ;;  %vm1365_vm5 = vweird.f32 %v4088_v9 }
 0x204   :  { %v1351_v48 = vmul.f32 %v2930_v57, %v1350_v60  ;;  %v1348_v54 = vsel %vm1347_vm15, %v2928_v32, %v1344_v12  ;;  %v4103_v32 = vadd.f32 %v983_v6, %v935_v25  ;;  %v2181_v25 = vld [vmem:[%s4619_s10 + $0x38] sm:$0xff] }
 0x205   :  { %v1213_v20 = vsub.f32 %v1174_v45, %v1197_v40  ;;  %2770 = vmatmul.msk.f32.gmra.mxu2 %vm1411_vm2, %v1348_v54  ;;  %v1599_v51 = vmul.f32 %v1348_v54, %v4019_v47  ;;  %2786 = vmatmul.msk.f32.gmra.mxu3 %vm1411_vm2, %v1348_v54  ;;  %v938_v47 = vadd.f32 %v3878_v53, %v937_v17  ;;  %v2197_v45 = vld [vmem:[%s4619_s10 + $0xb8] sm:$0xff]  ;;  %v939_v17 = vpop.f32.mrf.mxu2 }
 0x206   :  { %v1111_v2 = vpop.f32.mrf.mxu0  ;;  %v1352_v7 = vmul.f32 0.5, %v1351_v48  ;;  %v1198_v6 = vmul.f32 %v4103_v32, %v4103_v32  ;;  %2218 = vmatpush.msrb.mxu2 %v2181_v25  ;;  %2283 = vmatpush.msrb.mxu3 %v2197_v45 }
 0x207   :  { %v1229_v59 = vmax.f32 %v1213_v20, 0.0  ;;  %2802 = vmatmul.msk.f32.gmra.mxu0 %vm1411_vm2, %v1599_v51  ;;  %2818 = vmatmul.msk.f32.gmra.mxu1 %vm1411_vm2, %v1599_v51  ;;  %v4121_v48 = vadd.f32 %v986_v50, %v938_v47  ;;  %v2195_v51 = vld [vmem:[%s4619_s10 + $0xa8] sm:$0xff] }
 0x208   :  { %v1353_v29 = vsub.f32 1.5, %v1352_v7  ;;  %2284 = vmatpush.msrb.mxu3 %v2196_v62 }
 0x209   :  { %v2932_v37 = vpop.eup %2931  ;;  %v4107_v35 = vadd.f32 1e-06, %v1229_v59 }
 0x20a   :  { %v1360_v15 = vmul.f32 %v2932_v37, %v4088_v9  ;;  %v1176_v26 = vpop.f32.mrf.mxu1  ;;  %v1354_v40 = vmul.f32 %v2930_v57, %v1353_v29  ;;  %vm1366_vm4 = vweird.f32 %v2932_v37  ;;  %v1199_v29 = vmul.f32 %v4121_v48, %v4121_v48  ;;  %2285 = vmatpush.msrb.mxu3 %v2195_v51  ;;  %v2194_v9 = vld [vmem:[%s4619_s10 + $0xa0] sm:$0xff] }
 0x20b   :  { %2933 = vrsqrt.f32 %v4107_v35  ;;  %v1177_v60 = vadd.f32 %v1176_v26, %v1111_v2  ;;  %vm1367_vm6 = vmor %vm1365_vm5, %vm1366_vm4  ;;  %vm1375_vm8 = vweird.f32 %v4107_v35  ;;  %vm2420_vm4 = vcmask 195584  }
 0x20c   :  { %v1361_v10 = vmul.f32 %v2932_v37, %v1360_v15  ;;  %v1358_v12 = vsel %vm1357_vm3, %v2930_v57, %v1354_v40  ;;  %v2180_v57 = vld [vmem:[%s4619_s10 + $0x30] sm:$0xff]  ;;  %v2178_v15 = vld [vmem:[%s4619_s10 + $0x20] sm:$0xff]  ;;  %2286 = vmatpush.msrb.mxu3 %v2194_v9 }
 0x20d   :  { %v1214_v44 = vsub.f32 %v1177_v60, %v1198_v6  ;;  %2771 = vmatmul.msk.f32.gmra.mxu2 %vm1411_vm2, %v1358_v12  ;;  %v1600_v54 = vmul.f32 %v1358_v12, %v4037_v42  ;;  %2787 = vmatmul.msk.f32.gmra.mxu3 %vm1411_vm2, %v1358_v12  ;;  %v2179_v42 = vld [vmem:[%s4619_s10 + $0x28] sm:$0xff]  ;;  %v940_v6 = vadd.f32 %v3878_v53, %v939_v17  ;;  %v988_v12 = vpop.f32.mrf.mxu3 }
 0x20e   :  { %v1362_v18 = vmul.f32 0.5, %v1361_v10  ;;  %v1114_v2 = vpop.f32.mrf.mxu0  ;;  %2219 = vmatpush.msrb.mxu2 %v2180_v57 }
 0x20f   :  { %v1230_v20 = vmax.f32 %v1214_v44, 0.0  ;;  %2803 = vmatmul.msk.f32.gmra.mxu0 %vm1411_vm2, %v1600_v54  ;;  %2819 = vmatmul.msk.f32.gmra.mxu1 %vm1411_vm2, %v1600_v54  ;;  %v4155_v53 = vadd.f32 %v988_v12, %v940_v6 }
 0x210   :  { %v1363_v7 = vsub.f32 1.5, %v1362_v18  ;;  %2220 = vmatpush.msrb.mxu2 %v2179_v42 }
 0x211   :  { %v2934_v59 = vpop.eup %2933  ;;  %v1246_v47 = vadd.f32 1e-06, %v1230_v20  ;;  %v1200_v17 = vmul.f32 %v4155_v53, %v4155_v53 }
 0x212   :  { %v1370_v50 = vmul.f32 %v2934_v59, %v4107_v35  ;;  %v1179_v26 = vpop.f32.mrf.mxu1  ;;  %v1364_v40 = vmul.f32 %v2932_v37, %v1363_v7  ;;  %2221 = vmatpush.msrb.mxu2 %v2178_v15  ;;  %vm1376_vm7 = vweird.f32 %v2934_v59  ;;  %v2177_v15 = vld [vmem:[%s4619_s10 + $0x18] sm:$0xff] }
 0x213   :  { %2935 = vrsqrt.f32 %v1246_v47  ;;  %v1180_v60 = vadd.f32 %v1179_v26, %v1114_v2  ;;  %vm1377_vm9 = vmor %vm1375_vm8, %vm1376_vm7  ;;  %vm1385_vm11 = vweird.f32 %v1246_v47 }
 0x214   :  { %v1371_v10 = vmul.f32 %v2934_v59, %v1370_v50  ;;  %v1368_v25 = vsel %vm1367_vm6, %v2932_v37, %v1364_v40  ;;  %v2193_v50 = vld [vmem:[%s4619_s10 + $0x98] sm:$0xff]  ;;  %2222 = vmatpush.msrb.mxu2 %v2177_v15  ;;  %v2174_v15 = vld [vmem:[%s4619_s10] sm:$0xff] }
 0x215   :  { %v1215_v45 = vsub.f32 %v1180_v60, %v1199_v29  ;;  %2772 = vmatmul.msk.f32.gmra.mxu2 %vm1411_vm2, %v1368_v25  ;;  %v1601_v44 = vmul.f32 %v1368_v25, %v4061_v52  ;;  %2788 = vmatmul.msk.f32.gmra.mxu3 %vm1411_vm2, %v1368_v25 }
 0x216   :  { %v1372_v54 = vmul.f32 0.5, %v1371_v10  ;;  %v1117_v20 = vpop.f32.mrf.mxu0  ;;  %2287 = vmatpush.msrb.mxu3 %v2193_v50  ;;  %v2190_v50 = vld [vmem:[%s4619_s10 + $0x80] sm:$0xff] }
 0x217   :  { %v1231_v57 = vmax.f32 %v1215_v45, 0.0  ;;  %2804 = vmatmul.msk.f32.gmra.mxu0 %vm1411_vm2, %v1601_v44  ;;  %2820 = vmatmul.msk.f32.gmra.mxu1 %vm1411_vm2, %v1601_v44 }
 0x218   :  { %v1373_v37 = vsub.f32 1.5, %v1372_v54 }
 0x219   :  { %v2936_v62 = vpop.eup %2935  ;;  %v1247_v18 = vadd.f32 1e-06, %v1231_v57 }
 0x21a   :  { %v1380_v52 = vmul.f32 %v2936_v62, %v1246_v47  ;;  %v1182_v42 = vpop.f32.mrf.mxu1  ;;  %v1374_v51 = vmul.f32 %v2934_v59, %v1373_v37  ;;  %vm1386_vm10 = vweird.f32 %v2936_v62 }
 0x21b   :  { %2937 = vrsqrt.f32 %v1247_v18  ;;  %v1183_v2 = vadd.f32 %v1182_v42, %v1117_v20  ;;  %vm1387_vm12 = vmor %vm1385_vm11, %vm1386_vm10  ;;  %vm1395_vm14 = vweird.f32 %v1247_v18 }
 0x21c   :  { %v1381_v7 = vmul.f32 %v2936_v62, %v1380_v52  ;;  %v1378_v29 = vsel %vm1377_vm9, %v2934_v59, %v1374_v51  ;;  %v2191_v51 = vld [vmem:[%s4619_s10 + $0x88] sm:$0xff] }
 0x21d   :  { %v1216_v26 = vsub.f32 %v1183_v2, %v1200_v17  ;;  %2773 = vmatmul.msk.f32.gmra.mxu2 %vm1411_vm2, %v1378_v29  ;;  %v1602_v35 = vmul.f32 %v1378_v29, %v4079_v63  ;;  %2789 = vmatmul.msk.f32.gmra.mxu3 %vm1411_vm2, %v1378_v29 }
 0x21e   :  { %v1382_v40 = vmul.f32 0.5, %v1381_v7 }
 0x21f   :  { %v1232_v6 = vmax.f32 %v1216_v26, 0.0  ;;  %2805 = vmatmul.msk.f32.gmra.mxu0 %vm1411_vm2, %v1602_v35  ;;  %2821 = vmatmul.msk.f32.gmra.mxu1 %vm1411_vm2, %v1602_v35 }
 0x220   :  { %v1383_v59 = vsub.f32 1.5, %v1382_v40 }
 0x221   :  { %v2938_v60 = vpop.eup %2937  ;;  %v1248_v10 = vadd.f32 1e-06, %v1232_v6 }
 0x222   :  { %v1390_v12 = vmul.f32 %v2938_v60, %v1247_v18  ;;  %v1384_v25 = vmul.f32 %v2936_v62, %v1383_v59  ;;  %vm1396_vm13 = vweird.f32 %v2938_v60  ;;  %v2175_v18 = vld [vmem:[%s4619_s10 + $0x8] sm:$0xff] }
 0x223   :  { %2939 = vrsqrt.f32 %v1248_v10  ;;  %vm1397_vm15 = vmor %vm1395_vm14, %vm1396_vm13  ;;  %vm1405_vm1 = vweird.f32 %v1248_v10 }
 0x224   :  { %v1391_v63 = vmul.f32 %v2938_v60, %v1390_v12  ;;  %v1388_v45 = vsel %vm1387_vm12, %v2936_v62, %v1384_v25  ;;  %v2176_v62 = vld [vmem:[%s4619_s10 + $0x10] sm:$0xff] }
 0x225   :  { %2774 = vmatmul.msk.f32.gmra.mxu2 %vm1411_vm2, %v1388_v45  ;;  %v1603_v44 = vmul.f32 %v1388_v45, %v4103_v32  ;;  %2790 = vmatmul.msk.f32.gmra.mxu3 %vm1411_vm2, %v1388_v45  ;;  %v2192_v32 = vld [vmem:[%s4619_s10 + $0x90] sm:$0xff] }
 0x226   :  { %v1392_v9 = vmul.f32 0.5, %v1391_v63  ;;  %2223 = vmatpush.msrb.mxu2 %v2176_v62  ;;  %2288 = vmatpush.msrb.mxu3 %v2192_v32 }
 0x227   :  { %2806 = vmatmul.msk.f32.gmra.mxu0 %vm1411_vm2, %v1603_v44  ;;  %2822 = vmatmul.msk.f32.gmra.mxu1 %vm1411_vm2, %v1603_v44 }
 0x228   :  { %v1393_v54 = vsub.f32 1.5, %v1392_v9  ;;  %2224 = vmatpush.msrb.mxu2 %v2175_v18  ;;  %2289 = vmatpush.msrb.mxu3 %v2191_v51 }
 0x229   :  { %v2940_v57 = vpop.eup %2939 }
 0x22a   :  { %v1400_v37 = vmul.f32 %v2940_v57, %v1248_v10  ;;  %v1394_v47 = vmul.f32 %v2938_v60, %v1393_v54  ;;  %vm1406_vm0 = vweird.f32 %v2940_v57  ;;  %2225 = vmatpush.msrb.mxu2 %v2174_v15  ;;  %2290 = vmatpush.msrb.mxu3 %v2190_v50 }
 0x22b   :  { %vm1407_vm3 = vmor %vm1405_vm1, %vm1406_vm0 }
 0x22c   :  { %v1401_v52 = vmul.f32 %v2940_v57, %v1400_v37  ;;  %v1398_v20 = vsel %vm1397_vm15, %v2938_v60, %v1394_v47 }
 0x22d   :  { %2775 = vmatmul.msk.f32.gmra.mxu2 %vm1411_vm2, %v1398_v20  ;;  %v1604_v42 = vmul.f32 %v1398_v20, %v4121_v48  ;;  %2791 = vmatmul.msk.f32.gmra.mxu3 %vm1411_vm2, %v1398_v20 }
 0x22e   :  { %v1402_v17 = vmul.f32 0.5, %v1401_v52 }
 0x22f   :  { %2807 = vmatmul.msk.f32.gmra.mxu0 %vm1411_vm2, %v1604_v42  ;;  %2823 = vmatmul.msk.f32.gmra.mxu1 %vm1411_vm2, %v1604_v42 }
 0x230   :  { %v1403_v2 = vsub.f32 1.5, %v1402_v17 }
 0x232   :  { %v1404_v48 = vmul.f32 %v2940_v57, %v1403_v2 }
 0x234   :  { %v1408_v7 = vsel %vm1407_vm3, %v2940_v57, %v1404_v48 }
 0x235   :  { %2776 = vmatmul.msk.f32.gmra.mxu2 %vm1411_vm2, %v1408_v7  ;;  %v1605_v29 = vmul.f32 %v1408_v7, %v4155_v53  ;;  %2792 = vmatmul.msk.f32.gmra.mxu3 %vm1411_vm2, %v1408_v7  ;;  %v1848_v53 = vld [vmem:[%s4620_s9] sm:$0x3] }
 0x236   :  { %v4210_v60 = vperm.slane %v1848_v53, 0  ;;  %v4213_v12 = vperm.slane %v1848_v53, 1 }
 0x237   :  { %2808 = vmatmul.msk.f32.gmra.mxu0 %vm1411_vm2, %v1605_v29  ;;  %2824 = vmatmul.msk.f32.gmra.mxu1 %vm1411_vm2, %v1605_v29 }
 0x23c   :  { %v1671_v26 = vpop.f32.mrf.mxu0  ;;  %v1736_v35 = vpop.f32.mrf.mxu1 }
 0x240   :  { %v1477_v40 = vpop.f32.mrf.mxu2  ;;  %v1542_v6 = vpop.f32.mrf.mxu3 }
 0x241   :  { %v1784_v59 = vmul.f32 %v1477_v40, %v3705_v1  ;;  %v1785_v10 = vmul.f32 %v1542_v6, %v3716_v19 }
 0x243   :  { %v1816_v25 = vsub.f32 %v1784_v59, %v1671_v26  ;;  %v1817_v63 = vsub.f32 %v1785_v10, %v1736_v35 }
 0x244   :  { %v1674_v45 = vpop.f32.mrf.mxu0  ;;  %v1739_v44 = vpop.f32.mrf.mxu1 }
 0x245   :  { %v1854_v9 = vadd.f32 %v4210_v60, %v1816_v25  ;;  %v1855_v54 = vadd.f32 %v4213_v12, %v1817_v63 }
 0x247   :  { %v1886_v57 = vmul.f32 0.044715, %v1854_v9  ;;  %v1887_v37 = vmul.f32 0.044715, %v1855_v54 }
 0x248   :  { %v1480_v47 = vpop.f32.mrf.mxu2  ;;  %v1545_v62 = vpop.f32.mrf.mxu3 }
 0x249   :  { %v1918_v32 = vmul.f32 %v1886_v57, %v1854_v9  ;;  %v1919_v1 = vmul.f32 %v1887_v37, %v1855_v54  ;;  %v1786_v52 = vmul.f32 %v1480_v47, %v3720_v23  ;;  %v1787_v19 = vmul.f32 %v1545_v62, %v3731_v31 }
 0x24b   :  { %v1950_v20 = vmul.f32 %v1918_v32, %v1854_v9  ;;  %v1951_v42 = vmul.f32 %v1919_v1, %v1855_v54  ;;  %v1818_v18 = vsub.f32 %v1786_v52, %v1674_v45  ;;  %v1819_v51 = vsub.f32 %v1787_v19, %v1739_v44 }
 0x24c   :  { %v1677_v17 = vpop.f32.mrf.mxu0  ;;  %v1742_v2 = vpop.f32.mrf.mxu1  ;;  %v2046_v1 = vmul.f32 0.5, %v1854_v9 }
 0x24d   :  { %v1856_v48 = vadd.f32 %v4210_v60, %v1818_v18  ;;  %v4221_v7 = vadd.f32 %v4213_v12, %v1819_v51  ;;  %v1982_v29 = vadd.f32 %v1950_v20, %v1854_v9  ;;  %v1983_v15 = vadd.f32 %v1951_v42, %v1855_v54 }
 0x24f   :  { %v2014_v50 = vmul.f32 0.7978846, %v1982_v29  ;;  %v2015_v26 = vmul.f32 0.7978846, %v1983_v15  ;;  %v1888_v35 = vmul.f32 0.044715, %v1856_v48 }
 0x250   :  { %v1483_v53 = vpop.f32.mrf.mxu2  ;;  %v1548_v23 = vpop.f32.mrf.mxu3  ;;  %v1889_v31 = vmul.f32 0.044715, %v4221_v7 }
 0x251   :  { %v1788_v40 = vmul.f32 %v1483_v53, %v3733_v55  ;;  %v1789_v6 = vmul.f32 %v1548_v23, %v3741_v13  ;;  %2941 = vtanh.f32 %v2014_v50  ;;  %v1920_v59 = vmul.f32 %v1888_v35, %v1856_v48 }
 0x252   :  { %2943 = vtanh.f32 %v2015_v26  ;;  %v1921_v10 = vmul.f32 %v1889_v31, %v4221_v7 }
 0x253   :  { %v1820_v25 = vsub.f32 %v1788_v40, %v1677_v17  ;;  %v1821_v63 = vsub.f32 %v1789_v6, %v1742_v2  ;;  %v1952_v45 = vmul.f32 %v1920_v59, %v1856_v48  ;;  %v2047_v17 = vmul.f32 0.5, %v1855_v54 }
 0x254   :  { %v1680_v44 = vpop.f32.mrf.mxu0  ;;  %v1745_v57 = vpop.f32.mrf.mxu1  ;;  %v1953_v37 = vmul.f32 %v1921_v10, %v4221_v7 }
 0x255   :  { %v4229_v47 = vadd.f32 %v4210_v60, %v1820_v25  ;;  %v4232_v62 = vadd.f32 %v4213_v12, %v1821_v63  ;;  %v1984_v55 = vadd.f32 %v1952_v45, %v1856_v48 }
 0x256   :  { %v1985_v13 = vadd.f32 %v1953_v37, %v4221_v7 }
 0x257   :  { %v2942_v32 = vpop.eup %2941  ;;  %v2016_v52 = vmul.f32 0.7978846, %v1984_v55  ;;  %v1890_v19 = vmul.f32 0.044715, %v4229_v47  ;;  %v1891_v29 = vmul.f32 0.044715, %v4232_v62 }
 0x258   :  { %v2944_v20 = vpop.eup %2943  ;;  %v1486_v42 = vpop.f32.mrf.mxu2  ;;  %v2110_v51 = vadd.f32 1.0, %v2942_v32  ;;  %v2017_v2 = vmul.f32 0.7978846, %v1985_v13 }
 0x259   :  { %v1551_v18 = vpop.f32.mrf.mxu3  ;;  %v1790_v15 = vmul.f32 %v1486_v42, %v3745_v22  ;;  %v2111_v26 = vadd.f32 1.0, %v2944_v20  ;;  %2945 = vtanh.f32 %v2016_v52  ;;  %v1922_v9 = vmul.f32 %v1890_v19, %v4229_v47 }
 0x25a   :  { %v1791_v50 = vmul.f32 %v1551_v18, %v3753_v41  ;;  %v2142_v35 = vmul.f32 %v2110_v51, %v2046_v1  ;;  %2947 = vtanh.f32 %v2017_v2  ;;  %v1923_v53 = vmul.f32 %v1891_v29, %v4232_v62 }
 0x25b   :  { %v1822_v23 = vsub.f32 %v1790_v15, %v1680_v44  ;;  %v2143_v40 = vmul.f32 %v2111_v26, %v2047_v17  ;;  %v1954_v59 = vmul.f32 %v1922_v9, %v4229_v47  ;;  %v2048_v44 = vmul.f32 0.5, %v1856_v48 }
 0x25c   :  { %v1823_v31 = vsub.f32 %v1791_v50, %v1745_v57  ;;  %v1683_v6 = vpop.f32.mrf.mxu0  ;;  %v1748_v54 = vpop.f32.mrf.mxu1  ;;  %2226 = vmatmul.f32.vlgmr.msrb.gmra.mxu2 %v2142_v35  ;;  %v1955_v22 = vmul.f32 %v1923_v53, %v4232_v62  ;;  %v2049_v52 = vmul.f32 0.5, %v4221_v7 }
 0x25d   :  { %v4244_v41 = vadd.f32 %v4210_v60, %v1822_v23  ;;  %2291 = vmatmul.f32.vlgmr.msrb.gmra.mxu3 %v2143_v40  ;;  %v1986_v25 = vadd.f32 %v1954_v59, %v4229_v47 }
 0x25e   :  { %v4247_v10 = vadd.f32 %v4213_v12, %v1823_v31  ;;  %v1987_v63 = vadd.f32 %v1955_v22, %v4232_v62  ;;  %v2050_v22 = vmul.f32 0.5, %v4229_v47 }
 0x25f   :  { %v2946_v45 = vpop.eup %2945  ;;  %v1892_v57 = vmul.f32 0.044715, %v4244_v41  ;;  %v2018_v19 = vmul.f32 0.7978846, %v1986_v25 }
 0x260   :  { %v1893_v37 = vmul.f32 0.044715, %v4247_v10  ;;  %v2948_v55 = vpop.eup %2947  ;;  %v1489_v13 = vpop.f32.mrf.mxu2  ;;  %v2112_v1 = vadd.f32 1.0, %v2946_v45  ;;  %v2019_v20 = vmul.f32 0.7978846, %v1987_v63 }
 0x261   :  { %v1554_v32 = vpop.f32.mrf.mxu3  ;;  %v1792_v42 = vmul.f32 %v1489_v13, %v3755_v49  ;;  %v2113_v51 = vadd.f32 1.0, %v2948_v55  ;;  %v1924_v17 = vmul.f32 %v1892_v57, %v4244_v41  ;;  %2949 = vtanh.f32 %v2018_v19 }
 0x262   :  { %v1793_v18 = vmul.f32 %v1554_v32, %v3763_v56  ;;  %v2144_v48 = vmul.f32 %v2112_v1, %v2048_v44  ;;  %v1925_v2 = vmul.f32 %v1893_v37, %v4247_v10  ;;  %2951 = vtanh.f32 %v2019_v20 }
 0x263   :  { %v1824_v29 = vsub.f32 %v1792_v42, %v1683_v6  ;;  %v2145_v50 = vmul.f32 %v2113_v51, %v2049_v52  ;;  %v1956_v7 = vmul.f32 %v1924_v17, %v4244_v41  ;;  %v2051_v13 = vmul.f32 0.5, %v4232_v62 }
 0x264   :  { %v1825_v15 = vsub.f32 %v1793_v18, %v1748_v54  ;;  %v1686_v26 = vpop.f32.mrf.mxu0  ;;  %v1751_v35 = vpop.f32.mrf.mxu1  ;;  %2229 = vmatmul.f32.gmra.mxu2 %v2144_v48  ;;  %v1957_v49 = vmul.f32 %v1925_v2, %v4247_v10 }
 0x265   :  { %v4261_v56 = vadd.f32 %v4210_v60, %v1824_v29  ;;  %2294 = vmatmul.f32.gmra.mxu3 %v2145_v50  ;;  %v1988_v53 = vadd.f32 %v1956_v7, %v4244_v41 }
 0x266   :  { %v4264_v9 = vadd.f32 %v4213_v12, %v1825_v15  ;;  %v1989_v23 = vadd.f32 %v1957_v49, %v4247_v10 }
 0x267   :  { %v1894_v31 = vmul.f32 0.044715, %v4261_v56  ;;  %v2950_v6 = vpop.eup %2949  ;;  %v2020_v25 = vmul.f32 0.7978846, %v1988_v53 }
 0x268   :  { %v1895_v40 = vmul.f32 0.044715, %v4264_v9  ;;  %v1492_v54 = vpop.f32.mrf.mxu2  ;;  %v2021_v63 = vmul.f32 0.7978846, %v1989_v23  ;;  %v2952_v45 = vpop.eup %2951  ;;  %v2114_v37 = vadd.f32 1.0, %v2950_v6 }
 0x269   :  { %v1557_v59 = vpop.f32.mrf.mxu3  ;;  %v1794_v44 = vmul.f32 %v1492_v54, %v3767_v27  ;;  %v1926_v55 = vmul.f32 %v1894_v31, %v4261_v56  ;;  %v2115_v32 = vadd.f32 1.0, %v2952_v45  ;;  %2953 = vtanh.f32 %v2020_v25 }
 0x26a   :  { %v1795_v57 = vmul.f32 %v1557_v59, %v3775_v38  ;;  %v1927_v1 = vmul.f32 %v1895_v40, %v4264_v9  ;;  %v2146_v20 = vmul.f32 %v2114_v37, %v2050_v22  ;;  %2955 = vtanh.f32 %v2021_v63 }
 0x26b   :  { %v1826_v52 = vsub.f32 %v1794_v44, %v1686_v26  ;;  %v2147_v18 = vmul.f32 %v2115_v32, %v2051_v13  ;;  %v1958_v27 = vmul.f32 %v1926_v55, %v4261_v56  ;;  %v2053_v54 = vmul.f32 0.5, %v4247_v10 }
 0x26c   :  { %v1827_v19 = vsub.f32 %v1795_v57, %v1751_v35  ;;  %v1689_v47 = vpop.f32.mrf.mxu0  ;;  %v1754_v42 = vpop.f32.mrf.mxu1  ;;  %v1959_v38 = vmul.f32 %v1927_v1, %v4264_v9  ;;  %2232 = vmatmul.f32.gmra.mxu2 %v2146_v20  ;;  %v2052_v35 = vmul.f32 0.5, %v4244_v41 }
 0x26d   :  { %v4279_v51 = vadd.f32 %v4210_v60, %v1826_v52  ;;  %2297 = vmatmul.f32.gmra.mxu3 %v2147_v18  ;;  %v1990_v17 = vadd.f32 %v1958_v27, %v4261_v56 }
 0x26e   :  { %v4282_v62 = vadd.f32 %v4213_v12, %v1827_v19  ;;  %v1991_v48 = vadd.f32 %v1959_v38, %v4264_v9 }
 0x26f   :  { %v1896_v2 = vmul.f32 0.044715, %v4279_v51  ;;  %v2954_v15 = vpop.eup %2953  ;;  %v2022_v7 = vmul.f32 0.7978846, %v1990_v17 }
 0x270   :  { %v1897_v29 = vmul.f32 0.044715, %v4282_v62  ;;  %v1495_v50 = vpop.f32.mrf.mxu2  ;;  %v2023_v49 = vmul.f32 0.7978846, %v1991_v48  ;;  %v2956_v53 = vpop.eup %2955  ;;  %v2116_v40 = vadd.f32 1.0, %v2954_v15 }
 0x271   :  { %v1560_v26 = vpop.f32.mrf.mxu3  ;;  %v1796_v23 = vmul.f32 %v1495_v50, %v3777_v39  ;;  %v1928_v6 = vmul.f32 %v1896_v2, %v4279_v51  ;;  %v2117_v59 = vadd.f32 1.0, %v2956_v53  ;;  %2957 = vtanh.f32 %v2022_v7 }
 0x272   :  { %v1797_v31 = vmul.f32 %v1560_v26, %v3785_v33  ;;  %v1929_v22 = vmul.f32 %v1897_v29, %v4282_v62  ;;  %v2148_v45 = vmul.f32 %v2116_v40, %v2052_v35  ;;  %2959 = vtanh.f32 %v2023_v49 }
 0x273   :  { %v1828_v25 = vsub.f32 %v1796_v23, %v1689_v47  ;;  %v2149_v57 = vmul.f32 %v2117_v59, %v2053_v54  ;;  %v1960_v39 = vmul.f32 %v1928_v6, %v4279_v51  ;;  %v2054_v47 = vmul.f32 0.5, %v4261_v56 }
 0x274   :  { %v1829_v63 = vsub.f32 %v1797_v31, %v1754_v42  ;;  %v1692_v41 = vpop.f32.mrf.mxu0  ;;  %v1757_v44 = vpop.f32.mrf.mxu1  ;;  %v1961_v33 = vmul.f32 %v1929_v22, %v4282_v62  ;;  %2235 = vmatmul.f32.gmra.mxu2 %v2148_v45  ;;  %v2055_v29 = vmul.f32 0.5, %v4264_v9 }
 0x275   :  { %v4297_v37 = vadd.f32 %v4210_v60, %v1828_v25  ;;  %2300 = vmatmul.f32.gmra.mxu3 %v2149_v57  ;;  %v1992_v55 = vadd.f32 %v1960_v39, %v4279_v51 }
 0x276   :  { %v4300_v10 = vadd.f32 %v4213_v12, %v1829_v63  ;;  %v1993_v13 = vadd.f32 %v1961_v33, %v4282_v62  ;;  %v2056_v63 = vmul.f32 0.5, %v4279_v51 }
 0x277   :  { %v1898_v32 = vmul.f32 0.044715, %v4297_v37  ;;  %v2958_v52 = vpop.eup %2957  ;;  %v2024_v42 = vmul.f32 0.7978846, %v1992_v55 }
 0x278   :  { %v1899_v1 = vmul.f32 0.044715, %v4300_v10  ;;  %v1498_v19 = vpop.f32.mrf.mxu2  ;;  %v2025_v18 = vmul.f32 0.7978846, %v1993_v13  ;;  %v2960_v27 = vpop.eup %2959  ;;  %v2118_v48 = vadd.f32 1.0, %v2958_v52  ;;  %v2057_v13 = vmul.f32 0.5, %v4282_v62 }
 0x279   :  { %v1563_v20 = vpop.f32.mrf.mxu3  ;;  %v1798_v38 = vmul.f32 %v1498_v19, %v3789_v58  ;;  %v1930_v2 = vmul.f32 %v1898_v32, %v4297_v37  ;;  %v2119_v15 = vadd.f32 1.0, %v2960_v27  ;;  %2961 = vtanh.f32 %v2024_v42 }
 0x27a   :  { %v1799_v17 = vmul.f32 %v1563_v20, %v3797_v4  ;;  %v1931_v50 = vmul.f32 %v1899_v1, %v4300_v10  ;;  %v2150_v7 = vmul.f32 %v2118_v48, %v2054_v47  ;;  %2963 = vtanh.f32 %v2025_v18 }
 0x27b   :  { %v1830_v26 = vsub.f32 %v1798_v38, %v1692_v41  ;;  %v2151_v53 = vmul.f32 %v2119_v15, %v2055_v29  ;;  %v1962_v58 = vmul.f32 %v1930_v2, %v4297_v37 }
 0x27c   :  { %v1831_v35 = vsub.f32 %v1799_v17, %v1757_v44  ;;  %v1695_v56 = vpop.f32.mrf.mxu0  ;;  %v1760_v49 = vpop.f32.mrf.mxu1  ;;  %v1963_v4 = vmul.f32 %v1931_v50, %v4300_v10  ;;  %2238 = vmatmul.f32.gmra.mxu2 %v2150_v7  ;;  %v2058_v50 = vmul.f32 0.5, %v4297_v37 }
 0x27d   :  { %v4315_v23 = vadd.f32 %v4210_v60, %v1830_v26  ;;  %2303 = vmatmul.f32.gmra.mxu3 %v2151_v53  ;;  %v1994_v31 = vadd.f32 %v1962_v58, %v4297_v37 }
 0x27e   :  { %v4318_v9 = vadd.f32 %v4213_v12, %v1831_v35  ;;  %v1995_v40 = vadd.f32 %v1963_v4, %v4300_v10  ;;  %v2059_v4 = vmul.f32 0.5, %v4300_v10 }
 0x27f   :  { %v1900_v6 = vmul.f32 0.044715, %v4315_v23  ;;  %v2962_v59 = vpop.eup %2961  ;;  %v2026_v45 = vmul.f32 0.7978846, %v1994_v31 }
 0x280   :  { %v1901_v54 = vmul.f32 0.044715, %v4318_v9  ;;  %v1501_v22 = vpop.f32.mrf.mxu2  ;;  %v2027_v41 = vmul.f32 0.7978846, %v1995_v40  ;;  %v2964_v44 = vpop.eup %2963  ;;  %v2120_v33 = vadd.f32 1.0, %v2962_v59 }
 0x281   :  { %v1566_v25 = vpop.f32.mrf.mxu3  ;;  %v1800_v57 = vmul.f32 %v1501_v22, %v3799_v8  ;;  %v1932_v55 = vmul.f32 %v1900_v6, %v4315_v23  ;;  %v2121_v32 = vadd.f32 1.0, %v2964_v44  ;;  %2965 = vtanh.f32 %v2026_v45 }
 0x282   :  { %v1801_v39 = vmul.f32 %v1566_v25, %v3807_v43  ;;  %v1933_v1 = vmul.f32 %v1901_v54, %v4318_v9  ;;  %v2152_v20 = vmul.f32 %v2120_v33, %v2056_v63  ;;  %2967 = vtanh.f32 %v2027_v41 }
 0x283   :  { %v1832_v52 = vsub.f32 %v1800_v57, %v1695_v56  ;;  %v2153_v42 = vmul.f32 %v2121_v32, %v2057_v13  ;;  %v1964_v8 = vmul.f32 %v1932_v55, %v4315_v23  ;;  %v2060_v13 = vmul.f32 0.5, %v4315_v23 }
 0x284   :  { %v1833_v19 = vsub.f32 %v1801_v39, %v1760_v49  ;;  %v1698_v51 = vpop.f32.mrf.mxu0  ;;  %v1763_v47 = vpop.f32.mrf.mxu1  ;;  %v1965_v43 = vmul.f32 %v1933_v1, %v4318_v9  ;;  %2241 = vmatmul.f32.gmra.mxu2 %v2152_v20 }
 0x285   :  { %v4333_v18 = vadd.f32 %v4210_v60, %v1832_v52  ;;  %2306 = vmatmul.f32.gmra.mxu3 %v2153_v42  ;;  %v1996_v27 = vadd.f32 %v1964_v8, %v4315_v23  ;;  %v2061_v42 = vmul.f32 0.5, %v4318_v9 }
 0x286   :  { %v4336_v62 = vadd.f32 %v4213_v12, %v1833_v19  ;;  %v1997_v38 = vadd.f32 %v1965_v43, %v4318_v9 }
 0x287   :  { %v1902_v17 = vmul.f32 0.044715, %v4333_v18  ;;  %v2966_v2 = vpop.eup %2965  ;;  %v2028_v26 = vmul.f32 0.7978846, %v1996_v27 }
 0x288   :  { %v1903_v48 = vmul.f32 0.044715, %v4336_v62  ;;  %v1504_v29 = vpop.f32.mrf.mxu2  ;;  %v2029_v35 = vmul.f32 0.7978846, %v1997_v38  ;;  %v2968_v7 = vpop.eup %2967  ;;  %v2122_v53 = vadd.f32 1.0, %v2966_v2 }
 0x289   :  { %v1569_v15 = vpop.f32.mrf.mxu3  ;;  %v1802_v56 = vmul.f32 %v1504_v29, %v3811_v11  ;;  %v1934_v58 = vmul.f32 %v1902_v17, %v4333_v18  ;;  %v2123_v31 = vadd.f32 1.0, %v2968_v7  ;;  %2969 = vtanh.f32 %v2028_v26 }
 0x28a   :  { %v1803_v49 = vmul.f32 %v1569_v15, %v3819_v5  ;;  %v1935_v40 = vmul.f32 %v1903_v48, %v4336_v62  ;;  %v2154_v59 = vmul.f32 %v2122_v53, %v2058_v50  ;;  %2971 = vtanh.f32 %v2029_v35 }
 0x28b   :  { %v1834_v6 = vsub.f32 %v1802_v56, %v1698_v51  ;;  %v2155_v25 = vmul.f32 %v2123_v31, %v2059_v4  ;;  %v1966_v11 = vmul.f32 %v1934_v58, %v4333_v18  ;;  %v2062_v53 = vmul.f32 0.5, %v4333_v18 }
 0x28c   :  { %v1835_v54 = vsub.f32 %v1803_v49, %v1763_v47  ;;  %v1701_v37 = vpop.f32.mrf.mxu0  ;;  %v1766_v22 = vpop.f32.mrf.mxu1  ;;  %v1967_v5 = vmul.f32 %v1935_v40, %v4336_v62  ;;  %2244 = vmatmul.f32.gmra.mxu2 %v2154_v59 }
 0x28d   :  { %v4351_v63 = vadd.f32 %v4210_v60, %v1834_v6  ;;  %2309 = vmatmul.f32.gmra.mxu3 %v2155_v25  ;;  %v1998_v45 = vadd.f32 %v1966_v11, %v4333_v18 }
 0x28e   :  { %v4354_v10 = vadd.f32 %v4213_v12, %v1835_v54  ;;  %v1999_v41 = vadd.f32 %v1967_v5, %v4336_v62 }
 0x28f   :  { %v1904_v44 = vmul.f32 0.044715, %v4351_v63  ;;  %v2970_v39 = vpop.eup %2969  ;;  %v2030_v32 = vmul.f32 0.7978846, %v1998_v45 }
 0x290   :  { %v1905_v57 = vmul.f32 0.044715, %v4354_v10  ;;  %v1507_v33 = vpop.f32.mrf.mxu2  ;;  %v2031_v1 = vmul.f32 0.7978846, %v1999_v41  ;;  %v2972_v52 = vpop.eup %2971  ;;  %v2124_v51 = vadd.f32 1.0, %v2970_v39 }
 0x291   :  { %v1572_v55 = vpop.f32.mrf.mxu3  ;;  %v1804_v19 = vmul.f32 %v1507_v33, %v3821_v34  ;;  %v1936_v47 = vmul.f32 %v1904_v44, %v4351_v63  ;;  %v2125_v8 = vadd.f32 1.0, %v2972_v52  ;;  %2973 = vtanh.f32 %v2030_v32 }
 0x292   :  { %v1805_v20 = vmul.f32 %v1572_v55, %v3829_v61  ;;  %v1937_v43 = vmul.f32 %v1905_v57, %v4354_v10  ;;  %v2156_v17 = vmul.f32 %v2124_v51, %v2060_v13  ;;  %2975 = vtanh.f32 %v2031_v1 }
 0x293   :  { %v1836_v27 = vsub.f32 %v1804_v19, %v1701_v37  ;;  %v2157_v2 = vmul.f32 %v2125_v8, %v2061_v42  ;;  %v1968_v34 = vmul.f32 %v1936_v47, %v4351_v63  ;;  %v2063_v37 = vmul.f32 0.5, %v4336_v62 }
 0x294   :  { %v1837_v38 = vsub.f32 %v1805_v20, %v1766_v22  ;;  %v1704_v23 = vpop.f32.mrf.mxu0  ;;  %v1769_v48 = vpop.f32.mrf.mxu1  ;;  %v1969_v61 = vmul.f32 %v1937_v43, %v4354_v10  ;;  %2247 = vmatmul.f32.gmra.mxu2 %v2156_v17  ;;  %v2064_v19 = vmul.f32 0.5, %v4351_v63 }
 0x295   :  { %v4369_v29 = vadd.f32 %v4210_v60, %v1836_v27  ;;  %2312 = vmatmul.f32.gmra.mxu3 %v2157_v2  ;;  %v2000_v15 = vadd.f32 %v1968_v34, %v4351_v63 }
 0x296   :  { %v4372_v9 = vadd.f32 %v4213_v12, %v1837_v38  ;;  %v2001_v50 = vadd.f32 %v1969_v61, %v4354_v10  ;;  %v2065_v38 = vmul.f32 0.5, %v4354_v10 }
 0x297   :  { %v1906_v26 = vmul.f32 0.044715, %v4369_v29  ;;  %v2974_v7 = vpop.eup %2973  ;;  %v2032_v58 = vmul.f32 0.7978846, %v2000_v15 }
 0x298   :  { %v1907_v35 = vmul.f32 0.044715, %v4372_v9  ;;  %v1510_v56 = vpop.f32.mrf.mxu2  ;;  %v2033_v4 = vmul.f32 0.7978846, %v2001_v50  ;;  %v2976_v31 = vpop.eup %2975  ;;  %v2126_v54 = vadd.f32 1.0, %v2974_v7 }
 0x299   :  { %v1575_v49 = vpop.f32.mrf.mxu3  ;;  %v1806_v40 = vmul.f32 %v1510_v56, %v3833_v16  ;;  %v1938_v59 = vmul.f32 %v1906_v26, %v4369_v29  ;;  %v2127_v22 = vadd.f32 1.0, %v2976_v31  ;;  %2977 = vtanh.f32 %v2032_v58 }
 0x29a   :  { %v1807_v6 = vmul.f32 %v1575_v49, %v3839_v30  ;;  %v1939_v25 = vmul.f32 %v1907_v35, %v4372_v9  ;;  %v2158_v45 = vmul.f32 %v2126_v54, %v2062_v53  ;;  %2979 = vtanh.f32 %v2033_v4 }
 0x29b   :  { %v1838_v11 = vsub.f32 %v1806_v40, %v1704_v23  ;;  %v2159_v44 = vmul.f32 %v2127_v22, %v2063_v37  ;;  %v1970_v16 = vmul.f32 %v1938_v59, %v4369_v29  ;;  %v2066_v4 = vmul.f32 0.5, %v4369_v29 }
 0x29c   :  { %v1839_v5 = vsub.f32 %v1807_v6, %v1769_v48  ;;  %v1707_v18 = vpop.f32.mrf.mxu0  ;;  %v1772_v41 = vpop.f32.mrf.mxu1  ;;  %v1971_v30 = vmul.f32 %v1939_v25, %v4372_v9  ;;  %2250 = vmatmul.f32.gmra.mxu2 %v2158_v45  ;;  %v2067_v25 = vmul.f32 0.5, %v4372_v9 }
 0x29d   :  { %v4387_v57 = vadd.f32 %v4210_v60, %v1838_v11  ;;  %2315 = vmatmul.f32.gmra.mxu3 %v2159_v44  ;;  %v2002_v39 = vadd.f32 %v1970_v16, %v4369_v29 }
 0x29e   :  { %v4390_v62 = vadd.f32 %v4213_v12, %v1839_v5  ;;  %v2003_v33 = vadd.f32 %v1971_v30, %v4372_v9 }
 0x29f   :  { %v1908_v55 = vmul.f32 0.044715, %v4387_v57  ;;  %v2978_v32 = vpop.eup %2977  ;;  %v2034_v20 = vmul.f32 0.7978846, %v2002_v39 }
 0x2a0   :  { %v1909_v13 = vmul.f32 0.044715, %v4390_v62  ;;  %v1513_v1 = vpop.f32.mrf.mxu2  ;;  %v2035_v51 = vmul.f32 0.7978846, %v2003_v33  ;;  %v2980_v47 = vpop.eup %2979  ;;  %v2128_v43 = vadd.f32 1.0, %v2978_v32 }
 0x2a1   :  { %v1578_v52 = vpop.f32.mrf.mxu3  ;;  %v1808_v42 = vmul.f32 %v1513_v1, %v3841_v28  ;;  %v1940_v27 = vmul.f32 %v1908_v55, %v4387_v57  ;;  %v2129_v17 = vadd.f32 1.0, %v2980_v47  ;;  %2981 = vtanh.f32 %v2034_v20 }
 0x2a2   :  { %v1809_v8 = vmul.f32 %v1578_v52, %v3849_v46  ;;  %v1941_v23 = vmul.f32 %v1909_v13, %v4390_v62  ;;  %v2160_v34 = vmul.f32 %v2128_v43, %v2064_v19  ;;  %2983 = vtanh.f32 %v2035_v51 }
 0x2a3   :  { %v1840_v48 = vsub.f32 %v1808_v42, %v1707_v18  ;;  %v2161_v63 = vmul.f32 %v2129_v17, %v2065_v38  ;;  %v1972_v61 = vmul.f32 %v1940_v27, %v4387_v57  ;;  %v2068_v19 = vmul.f32 0.5, %v4387_v57 }
 0x2a4   :  { %v1841_v2 = vsub.f32 %v1809_v8, %v1772_v41  ;;  %v1973_v28 = vmul.f32 %v1941_v23, %v4390_v62  ;;  %v1710_v10 = vpop.f32.mrf.mxu0  ;;  %v1775_v50 = vpop.f32.mrf.mxu1  ;;  %2253 = vmatmul.f32.gmra.mxu2 %v2160_v34  ;;  %v2069_v38 = vmul.f32 0.5, %v4390_v62 }
 0x2a5   :  { %v4405_v46 = vadd.f32 %v4210_v60, %v1840_v48  ;;  %2318 = vmatmul.f32.gmra.mxu3 %v2161_v63  ;;  %v2004_v26 = vadd.f32 %v1972_v61, %v4387_v57 }
 0x2a6   :  { %v4408_v15 = vadd.f32 %v4213_v12, %v1841_v2  ;;  %v2005_v35 = vadd.f32 %v1973_v28, %v4390_v62 }
 0x2a7   :  { %v1910_v7 = vmul.f32 0.044715, %v4405_v46  ;;  %v2982_v49 = vpop.eup %2981  ;;  %v2036_v31 = vmul.f32 0.7978846, %v2004_v26 }
 0x2a8   :  { %v1911_v56 = vmul.f32 0.044715, %v4408_v15  ;;  %v1516_v53 = vpop.f32.mrf.mxu2  ;;  %v2037_v40 = vmul.f32 0.7978846, %v2005_v35  ;;  %v2984_v6 = vpop.eup %2983  ;;  %v2130_v37 = vadd.f32 1.0, %v2982_v49 }
 0x2a9   :  { %v1581_v58 = vpop.f32.mrf.mxu3  ;;  %v1810_v54 = vmul.f32 %v1516_v53, %v3853_v36  ;;  %v1942_v22 = vmul.f32 %v1910_v7, %v4405_v46  ;;  %v2131_v11 = vadd.f32 1.0, %v2984_v6  ;;  %2985 = vtanh.f32 %v2036_v31 }
 0x2aa   :  { %v1811_v59 = vmul.f32 %v1581_v58, %v3859_v21  ;;  %v1943_v5 = vmul.f32 %v1911_v56, %v4408_v15  ;;  %v2162_v41 = vmul.f32 %v2130_v37, %v2066_v4  ;;  %2987 = vtanh.f32 %v2037_v40 }
 0x2ab   :  { %v1842_v45 = vsub.f32 %v1810_v54, %v1710_v10  ;;  %v2163_v29 = vmul.f32 %v2131_v11, %v2067_v25  ;;  %v1974_v44 = vmul.f32 %v1942_v22, %v4405_v46  ;;  %v2070_v56 = vmul.f32 0.5, %v4405_v46 }
 0x2ac   :  { %v1843_v18 = vsub.f32 %v1811_v59, %v1775_v50  ;;  %v1975_v36 = vmul.f32 %v1943_v5, %v4408_v15  ;;  %2256 = vmatmul.f32.gmra.mxu2 %v2162_v41  ;;  %v1713_v39 = vpop.f32.mrf.mxu0  ;;  %v1778_v33 = vpop.f32.mrf.mxu1  ;;  %v2071_v37 = vmul.f32 0.5, %v4408_v15 }
 0x2ad   :  { %v4423_v21 = vadd.f32 %v4210_v60, %v1842_v45  ;;  %2321 = vmatmul.f32.gmra.mxu3 %v2163_v29  ;;  %v2006_v9 = vadd.f32 %v1974_v44, %v4405_v46 }
 0x2ae   :  { %v4426_v16 = vadd.f32 %v4213_v12, %v1843_v18  ;;  %v2007_v30 = vadd.f32 %v1975_v36, %v4408_v15 }
 0x2af   :  { %v1912_v55 = vmul.f32 0.044715, %v4423_v21  ;;  %v2986_v32 = vpop.eup %2985  ;;  %v2038_v20 = vmul.f32 0.7978846, %v2006_v9 }
 0x2b0   :  { %v1913_v13 = vmul.f32 0.044715, %v4426_v16  ;;  %v1519_v1 = vpop.f32.mrf.mxu2  ;;  %v2039_v51 = vmul.f32 0.7978846, %v2007_v30  ;;  %v2988_v47 = vpop.eup %2987  ;;  %v2132_v43 = vadd.f32 1.0, %v2986_v32 }
 0x2b1   :  { %v1584_v52 = vpop.f32.mrf.mxu3  ;;  %v1812_v42 = vmul.f32 %v1519_v1, %v3861_v14  ;;  %v1944_v27 = vmul.f32 %v1912_v55, %v4423_v21  ;;  %v2133_v17 = vadd.f32 1.0, %v2988_v47  ;;  %2989 = vtanh.f32 %v2038_v20 }
 0x2b2   :  { %v1813_v8 = vmul.f32 %v1584_v52, %v3869_v24  ;;  %v1945_v23 = vmul.f32 %v1913_v13, %v4426_v16  ;;  %v2164_v34 = vmul.f32 %v2132_v43, %v2068_v19  ;;  %2991 = vtanh.f32 %v2039_v51 }
 0x2b3   :  { %v1844_v48 = vsub.f32 %v1812_v42, %v1713_v39  ;;  %v2165_v57 = vmul.f32 %v2133_v17, %v2069_v38  ;;  %v1976_v63 = vmul.f32 %v1944_v27, %v4423_v21  ;;  %v2072_v55 = vmul.f32 0.5, %v4423_v21 }
 0x2b4   :  { %v1845_v2 = vsub.f32 %v1813_v8, %v1778_v33  ;;  %v1977_v14 = vmul.f32 %v1945_v23, %v4426_v16  ;;  %2259 = vmatmul.f32.gmra.mxu2 %v2164_v34  ;;  %v1716_v54 = vpop.f32.mrf.mxu0  ;;  %v1781_v59 = vpop.f32.mrf.mxu1 }
 0x2b5   :  { %v4441_v24 = vadd.f32 %v4210_v60, %v1844_v48  ;;  %2324 = vmatmul.f32.gmra.mxu3 %v2165_v57  ;;  %v2008_v62 = vadd.f32 %v1976_v63, %v4423_v21 }
 0x2b6   :  { %v4444_v61 = vadd.f32 %v4213_v12, %v1845_v2  ;;  %v2009_v28 = vadd.f32 %v1977_v14, %v4426_v16 }
 0x2b7   :  { %v1914_v10 = vmul.f32 0.044715, %v4441_v24  ;;  %v2990_v26 = vpop.eup %2989  ;;  %v2040_v49 = vmul.f32 0.7978846, %v2008_v62  ;;  %v2074_v38 = vmul.f32 0.5, %v4441_v24 }
 0x2b8   :  { %v1915_v50 = vmul.f32 0.044715, %v4444_v61  ;;  %v1522_v35 = vpop.f32.mrf.mxu2  ;;  %v2041_v53 = vmul.f32 0.7978846, %v2009_v28  ;;  %v2992_v58 = vpop.eup %2991  ;;  %v2134_v40 = vadd.f32 1.0, %v2990_v26 }
 0x2b9   :  { %v1587_v7 = vpop.f32.mrf.mxu3  ;;  %v1814_v4 = vmul.f32 %v1522_v35, %v3873_v3  ;;  %v1946_v6 = vmul.f32 %v1914_v10, %v4441_v24  ;;  %v2135_v22 = vadd.f32 1.0, %v2992_v58  ;;  %2993 = vtanh.f32 %v2040_v49 }
 0x2ba   :  { %v1815_v31 = vmul.f32 %v1587_v7, %v3883_v0  ;;  %v1947_v25 = vmul.f32 %v1915_v50, %v4444_v61  ;;  %v2166_v5 = vmul.f32 %v2134_v40, %v2070_v56  ;;  %2995 = vtanh.f32 %v2041_v53 }
 0x2bb   :  { %v1846_v11 = vsub.f32 %v1814_v4, %v1716_v54  ;;  %v2167_v45 = vmul.f32 %v2135_v22, %v2071_v37  ;;  %v1978_v3 = vmul.f32 %v1946_v6, %v4441_v24 }
 0x2bc   :  { %v1847_v46 = vsub.f32 %v1815_v31, %v1781_v59  ;;  %v1979_v0 = vmul.f32 %v1947_v25, %v4444_v61  ;;  %2262 = vmatmul.f32.gmra.mxu2 %v2166_v5 }
 0x2bd   :  { %v1884_v18 = vadd.f32 %v4210_v60, %v1846_v11  ;;  %2327 = vmatmul.f32.gmra.mxu3 %v2167_v45  ;;  %v2010_v15 = vadd.f32 %v1978_v3, %v4441_v24  ;;  %v2073_v60 = vmul.f32 0.5, %v4426_v16  ;;  %v2075_v16 = vmul.f32 0.5, %v4444_v61  ;;  %v4469_v24 = vld [vmem:[%s4621_s11] ss:$0 sm:$0xff] }
 0x2be   :  { %v1885_v41 = vadd.f32 %v4213_v12, %v1847_v46  ;;  %v2011_v29 = vadd.f32 %v1979_v0, %v4444_v61 }
 0x2bf   :  { %v1916_v44 = vmul.f32 0.044715, %v1884_v18  ;;  %v2994_v9 = vpop.eup %2993  ;;  %v2042_v30 = vmul.f32 0.7978846, %v2010_v15  ;;  %v2076_v63 = vmul.f32 0.5, %v1884_v18 }
 0x2c0   :  { %v1917_v36 = vmul.f32 0.044715, %v1885_v41  ;;  %v2043_v39 = vmul.f32 0.7978846, %v2011_v29  ;;  %v2996_v33 = vpop.eup %2995  ;;  %v2136_v13 = vadd.f32 1.0, %v2994_v9  ;;  %v2077_v62 = vmul.f32 0.5, %v1885_v41 }
 0x2c1   :  { %v1948_v32 = vmul.f32 %v1916_v44, %v1884_v18  ;;  %v2137_v12 = vadd.f32 1.0, %v2996_v33  ;;  %2997 = vtanh.f32 %v2042_v30 }
 0x2c2   :  { %v1949_v1 = vmul.f32 %v1917_v36, %v1885_v41  ;;  %v2168_v52 = vmul.f32 %v2136_v13, %v2072_v55  ;;  %2999 = vtanh.f32 %v2043_v39 }
 0x2c3   :  { %v1980_v19 = vmul.f32 %v1948_v32, %v1884_v18  ;;  %v2169_v51 = vmul.f32 %v2137_v12, %v2073_v60 }
 0x2c4   :  { %v1981_v20 = vmul.f32 %v1949_v1, %v1885_v41  ;;  %2265 = vmatmul.f32.gmra.mxu2 %v2168_v52 }
 0x2c5   :  { %v2012_v47 = vadd.f32 %v1980_v19, %v1884_v18  ;;  %2330 = vmatmul.f32.gmra.mxu3 %v2169_v51 }
 0x2c6   :  { %v2013_v42 = vadd.f32 %v1981_v20, %v1885_v41 }
 0x2c7   :  { %v2044_v8 = vmul.f32 0.7978846, %v2012_v47  ;;  %v2998_v27 = vpop.eup %2997 }
 0x2c8   :  { %v2045_v43 = vmul.f32 0.7978846, %v2013_v42  ;;  %v3000_v21 = vpop.eup %2999  ;;  %v2138_v17 = vadd.f32 1.0, %v2998_v27 }
 0x2c9   :  { %3001 = vtanh.f32 %v2044_v8  ;;  %v2139_v23 = vadd.f32 1.0, %v3000_v21 }
 0x2ca   :  { %3003 = vtanh.f32 %v2045_v43  ;;  %v2170_v48 = vmul.f32 %v2138_v17, %v2074_v38 }
 0x2cb   :  { %v2171_v2 = vmul.f32 %v2139_v23, %v2075_v16 }
 0x2cc   :  { %2268 = vmatmul.f32.gmra.mxu2 %v2170_v48 }
 0x2cd   :  { %2333 = vmatmul.f32.gmra.mxu3 %v2171_v2 }
 0x2cf   :  { %v3002_v34 = vpop.eup %3001 }
 0x2d0   :  { %v3004_v57 = vpop.eup %3003  ;;  %v2140_v14 = vadd.f32 1.0, %v3002_v34 }
 0x2d1   :  { %v2141_v28 = vadd.f32 1.0, %v3004_v57 }
 0x2d2   :  { %v2172_v10 = vmul.f32 %v2140_v14, %v2076_v63 }
 0x2d3   :  { %v2173_v50 = vmul.f32 %v2141_v28, %v2077_v62 }
 0x2d4   :  { %2271 = vmatmul.f32.gmra.mxu2 %v2172_v10  ;;  %v4647_v10 = vld [vmem:[#allocation2_spill] sm:$0xff] }
 0x2d5   :  { %2336 = vmatmul.f32.gmra.mxu3 %v2173_v50 }
 0x2df   :  { %v2227_v61 = vpop.f32.mrf.mxu2 }
 0x2e0   :  { %v2228_v26 = vadd.f32 %v4469_v24, %v2227_v61  ;;  %v2292_v35 = vpop.f32.mrf.mxu3 }
 0x2e2   :  { %v2293_v7 = vadd.f32 %v2292_v35, %v2228_v26 }
 0x2e4   :  { %2356 = vrot.lane.b32.xlu0 %v2293_v7, %s3006_s27 }
 0x2e7   :  { %v2230_v56 = vpop.f32.mrf.mxu2 }
 0x2e8   :  { %v2231_v49 = vadd.f32 %v4469_v24, %v2230_v56  ;;  %v2295_v53 = vpop.f32.mrf.mxu3 }
 0x2ea   :  { %v2296_v58 = vadd.f32 %v2295_v53, %v2231_v49  ;;  %v4648_v53 = vld [vmem:[#allocation3_spill] sm:$0xff] }
 0x2ec   :  { %2358 = vrot.lane.b32.xlu0 %v2296_v58, %s3006_s27 }
 0x2ef   :  { %v2233_v4 = vpop.f32.mrf.mxu2 }
 0x2f0   :  { %v2234_v31 = vadd.f32 %v4469_v24, %v2233_v4  ;;  %v2298_v40 = vpop.f32.mrf.mxu3  ;;  %v4649_v4 = vld [vmem:[#allocation6_spill] sm:$0xff] }
 0x2f2   :  { %v2299_v6 = vadd.f32 %v2298_v40, %v2234_v31 }
 0x2f4   :  { %2360 = vrot.lane.b32.xlu1 %v2299_v6, %s3006_s27  ;;  %v4650_v6 = vld [vmem:[#allocation7_spill] sm:$0xff] }
 0x2f7   :  { %v2236_v54 = vpop.f32.mrf.mxu2 }
 0x2f8   :  { %v2237_v59 = vadd.f32 %v4469_v24, %v2236_v54  ;;  %v2301_v37 = vpop.f32.mrf.mxu3 }
 0x2fa   :  { %v2302_v22 = vadd.f32 %v2301_v37, %v2237_v59  ;;  %v4651_v59 = vld [vmem:[#allocation4_spill] sm:$0xff] }
 0x2fc   :  { %2362 = vrot.lane.b32.xlu1 %v2302_v22, %s3006_s27 }
 0x2ff   :  { %v2239_v25 = vpop.f32.mrf.mxu2 }
 0x300   :  { %v2240_v11 = vadd.f32 %v4469_v24, %v2239_v25  ;;  %v2304_v46 = vpop.f32.mrf.mxu3  ;;  %v4652_v25 = vld [vmem:[#allocation5_spill] sm:$0xff] }
 0x302   :  { %v2305_v5 = vadd.f32 %v2304_v46, %v2240_v11  ;;  %v3005_v46 = vld [vmem:[%s4611_s2] ss:$0 sm:$0xff] }
 0x304   :  { %2364 = vrot.lane.b32.xlu2 %v2305_v5, %s3006_s27  ;;  %v4653_v5 = vld [vmem:[#allocation10_spill] sm:$0xff] }
 0x307   :  { %v2242_v45 = vpop.f32.mrf.mxu2 }
 0x308   :  { %v2243_v3 = vadd.f32 %v4469_v24, %v2242_v45  ;;  %v2307_v0 = vpop.f32.mrf.mxu3  ;;  %v299_v45 = vadd.f32 %v3005_v46, %v4653_v5 }
 0x30a   :  { %v2308_v18 = vadd.f32 %v2307_v0, %v2243_v3  ;;  %v4654_v3 = vld [vmem:[#allocation11_spill] sm:$0xff] }
 0x30b   :  { %v348_v0 = vadd.f32 %v4654_v3, %v299_v45 }
 0x30c   :  { %2366 = vrot.lane.b32.xlu2 %v2308_v18, %s3006_s27 }
 0x30f   :  { %v2245_v41 = vpop.f32.mrf.mxu2 }
 0x310   :  { %v2246_v15 = vadd.f32 %v4469_v24, %v2245_v41  ;;  %v2310_v29 = vpop.f32.mrf.mxu3 }
 0x312   :  { %v2311_v44 = vadd.f32 %v2310_v29, %v2246_v15  ;;  %v4655_v29 = vld [vmem:[#allocation8_spill] sm:$0xff] }
 0x314   :  { %2368 = vrot.lane.b32.xlu0 %v2311_v44, %s3006_s27 }
 0x317   :  { %v2248_v36 = vpop.f32.mrf.mxu2 }
 0x318   :  { %v2249_v9 = vadd.f32 %v4469_v24, %v2248_v36  ;;  %v2313_v30 = vpop.f32.mrf.mxu3 }
 0x31a   :  { %v2314_v39 = vadd.f32 %v2313_v30, %v2249_v9  ;;  %v4656_v9 = vld [vmem:[#allocation9_spill] sm:$0xff] }
 0x31c   :  { %2370 = vrot.lane.b32.xlu1 %v2314_v39, %s3006_s27  ;;  %v4657_v39 = vld [vmem:[#allocation16_spill] sm:$0xff] }
 0x31f   :  { %v2251_v33 = vpop.f32.mrf.mxu2 }
 0x320   :  { %v2252_v55 = vadd.f32 %v4469_v24, %v2251_v33  ;;  %v2316_v13 = vpop.f32.mrf.mxu3  ;;  %v306_v33 = vadd.f32 %v3005_v46, %v4657_v39 }
 0x322   :  { %v2317_v32 = vadd.f32 %v2316_v13, %v2252_v55  ;;  %v4658_v55 = vld [vmem:[#allocation17_spill] sm:$0xff] }
 0x323   :  { %v355_v13 = vadd.f32 %v4658_v55, %v306_v33 }
 0x324   :  { %2372 = vrot.lane.b32.xlu2 %v2317_v32, %s3006_s27 }
 0x327   :  { %v2254_v1 = vpop.f32.mrf.mxu2 }
 0x328   :  { %v2255_v60 = vadd.f32 %v4469_v24, %v2254_v1  ;;  %v2319_v12 = vpop.f32.mrf.mxu3 }
 0x32a   :  { %v2320_v52 = vadd.f32 %v2319_v12, %v2255_v60  ;;  %v4659_v60 = vld [vmem:[#allocation12_spill] sm:$0xff] }
 0x32b   :  { %v301_v12 = vadd.f32 %v3005_v46, %v4659_v60 }
 0x32c   :  { %2374 = vrot.lane.b32.xlu0 %v2320_v52, %s3006_s27  ;;  %v4660_v52 = vld [vmem:[#allocation13_spill] sm:$0xff] }
 0x32f   :  { %v2257_v19 = vpop.f32.mrf.mxu2 }
 0x330   :  { %v2258_v20 = vadd.f32 %v4469_v24, %v2257_v19  ;;  %v2322_v51 = vpop.f32.mrf.mxu3  ;;  %v350_v19 = vadd.f32 %v4660_v52, %v301_v12 }
 0x332   :  { %v2323_v47 = vadd.f32 %v2322_v51, %v2258_v20 }
 0x334   :  { %2376 = vrot.lane.b32.xlu1 %v2323_v47, %s3006_s27  ;;  %v4661_v47 = vld [vmem:[#allocation14_spill] sm:$0xff] }
 0x337   :  { %v2260_v42 = vpop.f32.mrf.mxu2 }
 0x338   :  { %v2261_v8 = vadd.f32 %v4469_v24, %v2260_v42  ;;  %v2325_v43 = vpop.f32.mrf.mxu3  ;;  %v304_v42 = vadd.f32 %v3005_v46, %v4661_v47 }
 0x33a   :  { %v2326_v27 = vadd.f32 %v2325_v43, %v2261_v8  ;;  %v4662_v8 = vld [vmem:[#allocation15_spill] sm:$0xff] }
 0x33b   :  { %v353_v43 = vadd.f32 %v4662_v8, %v304_v42 }
 0x33c   :  { %2378 = vrot.lane.b32.xlu2 %v2326_v27, %s3006_s27 }
 0x33f   :  { %v2263_v21 = vpop.f32.mrf.mxu2 }
 0x340   :  { %v2264_v38 = vadd.f32 %v4469_v24, %v2263_v21  ;;  %v2328_v17 = vpop.f32.mrf.mxu3 }
 0x342   :  { %v2329_v16 = vadd.f32 %v2328_v17, %v2264_v38  ;;  %v4663_v38 = vld [vmem:[#allocation22_spill] sm:$0xff] }
 0x343   :  { %v314_v17 = vadd.f32 %v3005_v46, %v4663_v38 }
 0x344   :  { %2380 = vrot.lane.b32.xlu0 %v2329_v16, %s3006_s27  ;;  %v4664_v16 = vld [vmem:[#allocation23_spill] sm:$0xff] }
 0x347   :  { %v2266_v23 = vpop.f32.mrf.mxu2 }
 0x348   :  { %v2267_v48 = vadd.f32 %v4469_v24, %v2266_v23  ;;  %v2331_v2 = vpop.f32.mrf.mxu3  ;;  %v363_v23 = vadd.f32 %v4664_v16, %v314_v17 }
 0x34a   :  { %v2332_v34 = vadd.f32 %v2331_v2, %v2267_v48 }
 0x34c   :  { %2382 = vrot.lane.b32.xlu1 %v2332_v34, %s3006_s27  ;;  %v4665_v34 = vld [vmem:[#allocation18_spill] sm:$0xff] }
 0x34f   :  { %v2269_v57 = vpop.f32.mrf.mxu2 }
 0x350   :  { %v2270_v63 = vadd.f32 %v4469_v24, %v2269_v57  ;;  %v2334_v14 = vpop.f32.mrf.mxu3  ;;  %v309_v57 = vadd.f32 %v3005_v46, %v4665_v34 }
 0x352   :  { %v2335_v62 = vadd.f32 %v2334_v14, %v2270_v63  ;;  %v4666_v63 = vld [vmem:[#allocation19_spill] sm:$0xff] }
 0x353   :  { %v358_v14 = vadd.f32 %v4666_v63, %v309_v57 }
 0x354   :  { %2384 = vrot.lane.b32.xlu2 %v2335_v62, %s3006_s27 }
 0x356   :  { %v2357_v28 = vpop.permute.xlu0 %2356 }
 0x357   :  { %v2404_v50 = vsel %vm1411_vm2, %v4647_v10, %v2357_v28  ;;  %v2272_v61 = vpop.f32.mrf.mxu2  ;;  %v4667_v10 = vld [vmem:[#allocation20_spill] sm:$0xff] }
 0x358   :  { %2421 = vst.msk [vmem:[%s4622_s12] sm:$0xff] %vm2420_vm4, %v2404_v50  ;;  %v2273_v26 = vadd.f32 %v4469_v24, %v2272_v61  ;;  %v2337_v35 = vpop.f32.mrf.mxu3  ;;  %v311_v50 = vadd.f32 %v3005_v46, %v4667_v10  ;;  %v4668_v61 = vld [vmem:[#allocation21_spill] sm:$0xff] }
 0x35a   :  { %v2338_v7 = vadd.f32 %v2337_v35, %v2273_v26  ;;  %v360_v26 = vadd.f32 %v4668_v61, %v311_v50 }
 0x35c   :  { %2386 = vrot.lane.b32.xlu0 %v2338_v7, %s3006_s27 }
 0x35e   :  { %v2359_v56 = vpop.permute.xlu0 %2358  ;;  %v2365_v49 = vpop.permute.xlu2 %2364 }
 0x35f   :  { %v2405_v58 = vsel %vm1411_vm2, %v4648_v53, %v2359_v56  ;;  %v2408_v31 = vsel %vm1411_vm2, %v4649_v4, %v2365_v49  ;;  %v4669_v56 = vld [vmem:[#allocation24_spill] sm:$0xff]  ;;  %v4670_v53 = vld [vmem:[#allocation25_spill] sm:$0xff] }
 0x360   :  { %2422 = vst.msk [vmem:[%s4622_s12 + $0x8] sm:$0xff] %vm2420_vm4, %v2405_v58  ;;  %v316_v49 = vadd.f32 %v3005_v46, %v4669_v56 }
 0x361   :  { %2425 = vst.msk [vmem:[%s4622_s12 + $0x20] sm:$0xff] %vm2420_vm4, %v2408_v31 }
 0x362   :  { %v365_v58 = vadd.f32 %v4670_v53, %v316_v49 }
 0x366   :  { %v2367_v24 = vpop.permute.xlu2 %2366  ;;  %v2361_v40 = vpop.permute.xlu1 %2360 }
 0x367   :  { %v2409_v54 = vsel %vm1411_vm2, %v4650_v6, %v2367_v24  ;;  %v2406_v37 = vsel %vm1411_vm2, %v4651_v59, %v2361_v40 }
 0x368   :  { %2426 = vst.msk [vmem:[%s4622_s12 + $0x28] sm:$0xff] %vm2420_vm4, %v2409_v54 }
 0x369   :  { %2423 = vst.msk [vmem:[%s4622_s12 + $0x10] sm:$0xff] %vm2420_vm4, %v2406_v37 }
 0x36e   :  { %v2363_v22 = vpop.permute.xlu1 %2362 }
 0x36f   :  { %v2407_v11 = vsel %vm1411_vm2, %v4652_v25, %v2363_v22 }
 0x370   :  { %2424 = vst.msk [vmem:[%s4622_s12 + $0x18] sm:$0xff] %vm2420_vm4, %v2407_v11 }
 0x37e   :  { %v2373_v18 = vpop.permute.xlu2 %2372 }
 0x37f   :  { %v2412_v41 = vsel %vm1411_vm2, %v348_v0, %v2373_v18 }
 0x380   :  { %2429 = vst.msk [vmem:[%s4622_s12 + $0x40] sm:$0xff] %vm2420_vm4, %v2412_v41 }
 0x386   :  { %v2369_v15 = vpop.permute.xlu0 %2368 }
 0x387   :  { %v2410_v44 = vsel %vm1411_vm2, %v4655_v29, %v2369_v15 }
 0x388   :  { %2427 = vst.msk [vmem:[%s4622_s12 + $0x30] sm:$0xff] %vm2420_vm4, %v2410_v44 }
 0x38e   :  { %v2371_v36 = vpop.permute.xlu1 %2370 }
 0x38f   :  { %v2411_v30 = vsel %vm1411_vm2, %v4656_v9, %v2371_v36 }
 0x390   :  { %2428 = vst.msk [vmem:[%s4622_s12 + $0x38] sm:$0xff] %vm2420_vm4, %v2411_v30 }
 0x396   :  { %v2379_v32 = vpop.permute.xlu2 %2378 }
 0x397   :  { %v2415_v1 = vsel %vm1411_vm2, %v355_v13, %v2379_v32 }
 0x398   :  { %2432 = vst.msk [vmem:[%s4622_s12 + $0x58] sm:$0xff] %vm2420_vm4, %v2415_v1 }
 0x39e   :  { %v2375_v20 = vpop.permute.xlu0 %2374 }
 0x39f   :  { %v2413_v51 = vsel %vm1411_vm2, %v350_v19, %v2375_v20 }
 0x3a0   :  { %2430 = vst.msk [vmem:[%s4622_s12 + $0x48] sm:$0xff] %vm2420_vm4, %v2413_v51 }
 0x3a6   :  { %v2377_v27 = vpop.permute.xlu1 %2376 }
 0x3a7   :  { %v2414_v21 = vsel %vm1411_vm2, %v353_v43, %v2377_v27 }
 0x3a8   :  { %2431 = vst.msk [vmem:[%s4622_s12 + $0x50] sm:$0xff] %vm2420_vm4, %v2414_v21 }
 0x3ae   :  { %v2385_v48 = vpop.permute.xlu2 %2384 }
 0x3af   :  { %v2418_v2 = vsel %vm1411_vm2, %v363_v23, %v2385_v48 }
 0x3b0   :  { %2435 = vst.msk [vmem:[%s4622_s12 + $0x70] sm:$0xff] %vm2420_vm4, %v2418_v2 }
 0x3b6   :  { %v2381_v62 = vpop.permute.xlu0 %2380 }
 0x3b7   :  { %v2416_v28 = vsel %vm1411_vm2, %v358_v14, %v2381_v62 }
 0x3b8   :  { %2433 = vst.msk [vmem:[%s4622_s12 + $0x60] sm:$0xff] %vm2420_vm4, %v2416_v28 }
 0x3be   :  { %v2383_v35 = vpop.permute.xlu1 %2382 }
 0x3bf   :  { %v2417_v7 = vsel %vm1411_vm2, %v360_v26, %v2383_v35 }
 0x3c0   :  { %2434 = vst.msk [vmem:[%s4622_s12 + $0x68] sm:$0xff] %vm2420_vm4, %v2417_v7 }
 0x3ce   :  { %v2387_v4 = vpop.permute.xlu0 %2386 }
 0x3cf   :  { %v2419_v31 = vsel %vm1411_vm2, %v365_v58, %v2387_v4 }
 0x3d0   :  { %2436 = vst.msk [vmem:[%s4622_s12 + $0x78] sm:$0xff] %vm2420_vm4, %v2419_v31 }

</bundles_post_ra>
